<compile_context>
chip_gen: v6e
topology: v6e:2x2x1
jax: 0.10.0
libtpu: 0.0.40
codegen_flags: <defaults>
</compile_context>

<pallas_src>
import math
from functools import partial

import jax
import jax.numpy as jnp
from jax import lax
from jax.experimental import pallas as pl
from jax.experimental.pallas import tpu as pltpu


# --------------------------------------------------------------------------
# Kernels
# --------------------------------------------------------------------------
def _flash_kernel(q_ref, kv_ref, o_ref, qs_ref, m_ref, l_ref, acc_ref, *,
                  scale, num_heads, num_kv_heads, head_dim):
    """Online-softmax flash attention, reduction over the KV grid axis."""
    H, Hk, D = num_heads, num_kv_heads, head_dim
    rep = H // Hk
    ki = pl.program_id(2)

    @pl.when(ki == 0)
    def _():
        # The q block index does not change along ki: fold the softmax scale
        # into q once per q-tile (instead of once per reduction step).
        qs_ref[...] = (q_ref[0].astype(jnp.float32) * scale).astype(qs_ref.dtype)
        m_ref[...] = jnp.full_like(m_ref, -jnp.inf)
        l_ref[...] = jnp.zeros_like(l_ref)
        acc_ref[...] = jnp.zeros_like(acc_ref)

    for h in range(H):                       # static unroll over heads
        hk = h // rep                        # GQA / MQA: shared kv head
        q_h = qs_ref[:, h * D:(h + 1) * D]                     # (tq, D)
        k_h = kv_ref[0, :, hk * D:(hk + 1) * D]                # (tk, D)
        v_h = kv_ref[0, :, (Hk + hk) * D:(Hk + hk + 1) * D]    # (tk, D)

        # scores: contract head_dim directly, no k transpose through the XLU
        s = lax.dot_general(q_h, k_h, (((1,), (1,)), ((), ())),
                            preferred_element_type=jnp.float32)  # (tq, tk)

        m_prev = m_ref[:, h:h + 1]                               # (tq, 1)
        m_new = jnp.maximum(m_prev, jnp.max(s, axis=-1, keepdims=True))
        alpha = jnp.exp(m_prev - m_new)
        p = jnp.exp(s - m_new)                                   # (tq, tk)

        l_ref[:, h:h + 1] = alpha * l_ref[:, h:h + 1] + jnp.sum(
            p, axis=-1, keepdims=True)
        acc_ref[:, h * D:(h + 1) * D] = (
            alpha * acc_ref[:, h * D:(h + 1) * D]
            + jnp.dot(p.astype(v_h.dtype), v_h,
                      preferred_element_type=jnp.float32))
        m_ref[:, h:h + 1] = m_new

    @pl.when(ki == pl.num_programs(2) - 1)
    def _():
        # In-place per-head normalization, then one lane-dense slab store.
        for h in range(H):
            inv_l = pl.reciprocal(l_ref[:, h:h + 1], approx=True)
            acc_ref[:, h * D:(h + 1) * D] = acc_ref[:, h * D:(h + 1) * D] * inv_l
        o_ref[0] = acc_ref[...].astype(o_ref.dtype)


def _single_step_kernel(q_ref, kv_ref, o_ref, *,
                        scale, num_heads, num_kv_heads, head_dim):
    """Whole KV in one VMEM tile: plain softmax, no stats scratch needed."""
    H, Hk, D = num_heads, num_kv_heads, head_dim
    rep = H // Hk

    for h in range(H):
        hk = h // rep
        q_h = (q_ref[0, :, h * D:(h + 1) * D].astype(jnp.float32) * scale
               ).astype(q_ref.dtype)                               # (tq, D)
        k_h = kv_ref[0, :, hk * D:(hk + 1) * D]                    # (Sk, D)
        v_h = kv_ref[0, :, (Hk + hk) * D:(Hk + hk + 1) * D]        # (Sk, D)

        s = lax.dot_general(q_h, k_h, (((1,), (1,)), ((), ())),
                            preferred_element_type=jnp.float32)    # (tq, Sk)
        m = jnp.max(s, axis=-1, keepdims=True)
        p = jnp.exp(s - m)
        l = jnp.sum(p, axis=-1, keepdims=True)
        o = jnp.dot(p.astype(v_h.dtype), v_h,
                    preferred_element_type=jnp.float32)             # (tq, D)
        o_ref[0, :, h * D:(h + 1) * D] = (
            o * pl.reciprocal(l, approx=True)).astype(o_ref.dtype)


# --------------------------------------------------------------------------
# Tile selection / VMEM budgeting
# --------------------------------------------------------------------------
def _pad_lanes(n):
    return max(128, ((n + 127) // 128) * 128)


def _pick_tile(s, target):
    """Largest tile <= target that divides s and is a multiple of 8, else s."""
    if s <= target:
        return s
    for t in range(min(target, s), 7, -1):
        if t % 8 == 0 and s % t == 0:
            return t
    return s


def _device_budget():
    """(per-TensorCore VMEM bytes, kv-tile target for the MXU depth)."""
    kind = ""
    try:
        kind = jax.devices()[0].device_kind.lower()
    except Exception:
        pass
    old_gen = any(g in kind for g in ("v2", "v3", "v4", "v5"))
    vmem_cap = None
    try:
        vmem_cap = int(pltpu.get_tpu_info().vmem_capacity_bytes)
    except Exception:
        pass
    if vmem_cap is None or vmem_cap <= 0:
        # v7x has 64 MiB per TensorCore; v5e/v6e have 128 MiB.
        vmem_cap = (128 << 20) if (old_gen or "v6" in kind) else (64 << 20)
    tk_target = 128 if old_gen else 256       # MXU is 128-deep on v5e, 256 on v6e/v7x
    return vmem_cap, tk_target


def _multi_footprint(tq, tk, H, Hk, D, itemsize):
    hd = _pad_lanes(H * D)
    kvd = _pad_lanes(2 * Hk * D)
    blocks = 2 * itemsize * (tq * hd + tk * kvd + tq * hd)   # double-buffered q/kv/out
    scratch = itemsize * tq * hd                             # pre-scaled q
    scratch += 2 * 4 * tq * 128                              # m, l (lane-padded)
    scratch += 4 * tq * hd                                   # f32 accumulator
    temps = 6 * 4 * tq * max(tk, 128)                        # s / p / exp temporaries
    return blocks + scratch + temps


def _single_footprint(tq, Sk, H, Hk, D, itemsize):
    hd = _pad_lanes(H * D)
    kvd = _pad_lanes(2 * Hk * D)
    blocks = 2 * itemsize * (tq * hd + Sk * kvd + tq * hd)
    temps = 6 * 4 * tq * _pad_lanes(Sk)
    return blocks + temps


# --------------------------------------------------------------------------
# Wrapper
# --------------------------------------------------------------------------
def flash_cross_attention(q, kv, softmax_scale=None, causal=False,
                          q_tile=None, kv_tile=None):
    """Equivalent of FlashCrossAttention.forward in eval mode (dropout=0),
    padded path (cu_seqlens is None), no alibi, full window."""
    assert not causal  # TODO(synk): causal masking not implemented
    assert q.dtype in (jnp.float16, jnp.bfloat16)
    assert kv.dtype == q.dtype
    B, Sq, H, D = q.shape
    Bk, Sk, two, Hk, Dk = kv.shape
    assert Bk == B and two == 2 and Dk == D and H % Hk == 0

    scale = float(softmax_scale) if softmax_scale is not None else 1.0 / math.sqrt(D)
    itemsize = jnp.dtype(q.dtype).itemsize

    vmem_cap, tk_target = _device_budget()
    budget = min(int(vmem_cap * 0.6), 96 << 20)

    # Free reshapes only (no transposes, no kv slicing, no head repeat):
    qf = q.reshape(B, Sq, H * D)             # lane-packed query heads
    kvf = kv.reshape(B, Sk, 2 * Hk * D)      # [k heads | v heads] in lanes

    # ---- tile selection --------------------------------------------------
    tq = _pick_tile(Sq, 256 if q_tile is None else q_tile)
    # v7x has 2 TensorCores: keep the parallel grid (B * Sq/tq) >= 2.
    if B * (Sq // tq) < 2:
        tq_half = _pick_tile(Sq, max(8, tq // 2))
        if tq_half < tq and (Sq // tq_half) >= 2:
            tq = tq_half

    single = (kv_tile is None
              and _single_footprint(tq, Sk, H, Hk, D, itemsize) <= budget)

    if single:
        tk = Sk
        footprint = _single_footprint(tq, Sk, H, Hk, D, itemsize)
    else:
        tk = _pick_tile(Sk, tk_target if kv_tile is None else kv_tile)

        def _shrink(cur, full):
            nxt = _pick_tile(full, max(8, cur // 2))
            return nxt if nxt < cur else None

        while _multi_footprint(tq, tk, H, Hk, D, itemsize) > budget:
            nxt = _shrink(tq, Sq)
            if nxt is None:
                break
            tq = nxt
        while _multi_footprint(tq, tk, H, Hk, D, itemsize) > budget:
            nxt = _shrink(tk, Sk)
            if nxt is None:
                break
            tk = nxt
        footprint = _multi_footprint(tq, tk, H, Hk, D, itemsize)

    vmem_limit = int(min(max(footprint + (4 << 20), 32 << 20),
                         vmem_cap - (4 << 20)))

    # ---- pallas_call -----------------------------------------------------
    if single:
        out = pl.pallas_call(
            partial(_single_step_kernel, scale=scale, num_heads=H,
                    num_kv_heads=Hk, head_dim=D),
            out_shape=jax.ShapeDtypeStruct((B, Sq, H * D), q.dtype),
            grid_spec=pltpu.PrefetchScalarGridSpec(
                num_scalar_prefetch=0,
                grid=(B, Sq // tq),
                in_specs=[
                    pl.BlockSpec((1, tq, H * D), lambda b, qi: (b, qi, 0)),
                    pl.BlockSpec((1, Sk, 2 * Hk * D), lambda b, qi: (b, 0, 0)),
                ],
                out_specs=pl.BlockSpec((1, tq, H * D), lambda b, qi: (b, qi, 0)),
            ),
            compiler_params=pltpu.CompilerParams(
                dimension_semantics=("parallel", "parallel"),
                vmem_limit_bytes=vmem_limit),
        )(qf, kvf)
    else:
        out = pl.pallas_call(
            partial(_flash_kernel, scale=scale, num_heads=H,
                    num_kv_heads=Hk, head_dim=D),
            out_shape=jax.ShapeDtypeStruct((B, Sq, H * D), q.dtype),
            grid_spec=pltpu.PrefetchScalarGridSpec(
                num_scalar_prefetch=0,
                grid=(B, Sq // tq, Sk // tk),
                in_specs=[
                    pl.BlockSpec((1, tq, H * D), lambda b, qi, ki: (b, qi, 0)),
                    pl.BlockSpec((1, tk, 2 * Hk * D), lambda b, qi, ki: (b, ki, 0)),
                ],
                out_specs=pl.BlockSpec((1, tq, H * D), lambda b, qi, ki: (b, qi, 0)),
                scratch_shapes=[
                    pltpu.VMEM((tq, H * D), q.dtype),      # pre-scaled q
                    pltpu.VMEM((tq, H), jnp.float32),      # running max m (lane-packed)
                    pltpu.VMEM((tq, H), jnp.float32),      # running denom l (lane-packed)
                    pltpu.VMEM((tq, H * D), jnp.float32),  # lane-packed accumulator
                ],
            ),
            compiler_params=pltpu.CompilerParams(
                dimension_semantics=("parallel", "parallel", "arbitrary"),
                vmem_limit_bytes=vmem_limit),
        )(qf, kvf)

    return out.reshape(B, Sq, H, D)


# --------------------------------------------------------------------------
# Reference + test
# --------------------------------------------------------------------------
def _reference(q, kv, scale):
    H, Hk = q.shape[2], kv.shape[3]
    k = kv[:, :, 0].astype(jnp.float32)
    v = kv[:, :, 1].astype(jnp.float32)
    if Hk != H:
        rep = H // Hk
        k = jnp.repeat(k, rep, axis=2)
        v = jnp.repeat(v, rep, axis=2)
    qf = q.astype(jnp.float32)
    s = jnp.einsum("bqhd,bkhd->bhqk", qf, k) * scale
    p = jax.nn.softmax(s, axis=-1)
    return jnp.einsum("bhqk,bkhd->bqhd", p, v)


if __name__ == "__main__":
    root = jax.random.PRNGKey(0)

    def run_case(B, Sq, Sk, H, Hk, D, kv_tile=None):
        kq, kkv = jax.random.split(jax.random.fold_in(root, Sq * Sk + H))
        q = jax.random.normal(kq, (B, Sq, H, D), dtype=jnp.float32).astype(jnp.bfloat16)
        kv = jax.random.normal(kkv, (B, Sk, 2, Hk, D), dtype=jnp.float32).astype(jnp.bfloat16)
        out = jax.block_until_ready(flash_cross_attention(q, kv, kv_tile=kv_tile))
        assert out.shape == (B, Sq, H, D) and out.dtype == jnp.bfloat16
        ref = _reference(q, kv, 1.0 / math.sqrt(D))
        err = float(jnp.max(jnp.abs(out.astype(jnp.float32) - ref)))
        assert bool(jnp.allclose(out.astype(jnp.float32), ref,
                                 atol=2e-2, rtol=2e-2)), f"max abs err {err}"

    # 1) short-KV fast path (single KV tile, grid (B, Sq//tq)), MHA
    run_case(B=2, Sq=128, Sk=128, H=4, Hk=4, D=32)
    # 2) multi-step online-softmax path with GQA (forced small kv tile)
    run_case(B=1, Sq=256, Sk=512, H=8, Hk=2, D=64, kv_tile=128)

    print("KERNEL_OK")
</pallas_src>

<mosaic_0001>
module attributes {stable_mosaic.version = 11 : i64} {
  func.func @_single_step_kernel(%arg0: i32, %arg1: i32, %arg2: memref<1x128x128xbf16, #tpu.memory_space<vmem>>, %arg3: memref<1x128x256xbf16, #tpu.memory_space<vmem>>, %arg4: memref<1x128x128xbf16, #tpu.memory_space<vmem>>) attributes {dimension_semantics = [#tpu.dimension_semantics<parallel>, #tpu.dimension_semantics<parallel>], iteration_bounds = array<i64: 2, 1>, scalar_prefetch = 0 : i64, scratch_operands = 0 : i64, tpu.core_type = #tpu.core_type<tc>, window_params = [{transform_indices = @transform_0, window_bounds = array<i64: 1, 128, 128>}, {transform_indices = @transform_1, window_bounds = array<i64: 1, 128, 256>}, {transform_indices = @transform_2, window_bounds = array<i64: 1, 128, 128>}]} {
    %c0 = arith.constant 0 : index
    %c0_0 = arith.constant 0 : index
    %c0_1 = arith.constant 0 : index
    %0 = vector.load %arg2[%c0, %c0_0, %c0_1] : memref<1x128x128xbf16, #tpu.memory_space<vmem>>, vector<1x128x32xbf16>
    %1 = vector.shape_cast %0 : vector<1x128x32xbf16> to vector<128x32xbf16>
    %2 = arith.extf %1 : vector<128x32xbf16> to vector<128x32xf32>
    %cst = arith.constant 0.176776692 : f32
    %3 = vector.broadcast %cst : f32 to vector<128x32xf32>
    %4 = arith.mulf %2, %3 : vector<128x32xf32>
    %5 = arith.truncf %4 : vector<128x32xf32> to vector<128x32xbf16>
    %c0_2 = arith.constant 0 : index
    %c0_3 = arith.constant 0 : index
    %c0_4 = arith.constant 0 : index
    %6 = vector.load %arg3[%c0_2, %c0_3, %c0_4] : memref<1x128x256xbf16, #tpu.memory_space<vmem>>, vector<1x128x32xbf16>
    %7 = vector.shape_cast %6 : vector<1x128x32xbf16> to vector<128x32xbf16>
    %c0_5 = arith.constant 0 : index
    %c0_6 = arith.constant 0 : index
    %c128 = arith.constant 128 : index
    %8 = vector.load %arg3[%c0_5, %c0_6, %c128] : memref<1x128x256xbf16, #tpu.memory_space<vmem>>, vector<1x128x32xbf16>
    %9 = vector.shape_cast %8 : vector<1x128x32xbf16> to vector<128x32xbf16>
    %cst_7 = arith.constant dense<0.000000e+00> : vector<128x128xf32>
    %10 = tpu.matmul %5, %7, %cst_7 {dimension_numbers = #tpu.dot_dimension_numbers<[1], [1], [0], [0], [0, 0, 1, 0], [], []>} : vector<128x32xbf16>, vector<128x32xbf16>, vector<128x128xf32> -> vector<128x128xf32>
    %cst_8 = arith.constant dense<0xFF800000> : vector<128xf32>
    %11 = vector.multi_reduction <maximumf>, %10, %cst_8 [1] : vector<128x128xf32> to vector<128xf32>
    %12 = vector.shape_cast %11 : vector<128xf32> to vector<128x1xf32>
    %13 = vector.broadcast %12 : vector<128x1xf32> to vector<128x128xf32>
    %14 = arith.subf %10, %13 : vector<128x128xf32>
    %15 = math.exp %14 : vector<128x128xf32>
    %cst_9 = arith.constant dense<0.000000e+00> : vector<128xf32>
    %16 = vector.multi_reduction <add>, %15, %cst_9 [1] : vector<128x128xf32> to vector<128xf32>
    %17 = vector.shape_cast %16 : vector<128xf32> to vector<128x1xf32>
    %18 = arith.truncf %15 : vector<128x128xf32> to vector<128x128xbf16>
    %cst_10 = arith.constant dense<0.000000e+00> : vector<128x32xf32>
    %19 = tpu.matmul %18, %9, %cst_10 {dimension_numbers = #tpu.dot_dimension_numbers<[1], [0], [0], [1], [0, 0, 1, 1], [], []>} : vector<128x128xbf16>, vector<128x32xbf16>, vector<128x32xf32> -> vector<128x32xf32>
    %20 = tpu.reciprocal %17 {approx = true} : vector<128x1xf32> -> vector<128x1xf32>
    %21 = vector.broadcast %20 : vector<128x1xf32> to vector<128x32xf32>
    %22 = arith.mulf %19, %21 : vector<128x32xf32>
    %23 = arith.truncf %22 : vector<128x32xf32> to vector<128x32xbf16>
    %c0_11 = arith.constant 0 : index
    %c0_12 = arith.constant 0 : index
    %c0_13 = arith.constant 0 : index
    %24 = vector.load %arg4[%c0_11, %c0_12, %c0_13] : memref<1x128x128xbf16, #tpu.memory_space<vmem>>, vector<1x128x32xbf16>
    %25 = vector.shape_cast %24 : vector<1x128x32xbf16> to vector<128x32xbf16>
    %26 = vector.shape_cast %23 : vector<128x32xbf16> to vector<1x128x32xbf16>
    tpu.vector_store %arg4[%c0_11, %c0_12, %c0_13], %26 {strides = array<i32>} : memref<1x128x128xbf16, #tpu.memory_space<vmem>>, vector<1x128x32xbf16>,
    %c0_14 = arith.constant 0 : index
    %c0_15 = arith.constant 0 : index
    %c32 = arith.constant 32 : index
    %27 = vector.load %arg2[%c0_14, %c0_15, %c32] : memref<1x128x128xbf16, #tpu.memory_space<vmem>>, vector<1x128x32xbf16>
    %28 = vector.shape_cast %27 : vector<1x128x32xbf16> to vector<128x32xbf16>
    %29 = arith.extf %28 : vector<128x32xbf16> to vector<128x32xf32>
    %cst_16 = arith.constant 0.176776692 : f32
    %30 = vector.broadcast %cst_16 : f32 to vector<128x32xf32>
    %31 = arith.mulf %29, %30 : vector<128x32xf32>
    %32 = arith.truncf %31 : vector<128x32xf32> to vector<128x32xbf16>
    %c0_17 = arith.constant 0 : index
    %c0_18 = arith.constant 0 : index
    %c32_19 = arith.constant 32 : index
    %33 = vector.load %arg3[%c0_17, %c0_18, %c32_19] : memref<1x128x256xbf16, #tpu.memory_space<vmem>>, vector<1x128x32xbf16>
    %34 = vector.shape_cast %33 : vector<1x128x32xbf16> to vector<128x32xbf16>
    %c0_20 = arith.constant 0 : index
    %c0_21 = arith.constant 0 : index
    %c160 = arith.constant 160 : index
    %35 = vector.load %arg3[%c0_20, %c0_21, %c160] : memref<1x128x256xbf16, #tpu.memory_space<vmem>>, vector<1x128x32xbf16>
    %36 = vector.shape_cast %35 : vector<1x128x32xbf16> to vector<128x32xbf16>
    %cst_22 = arith.constant dense<0.000000e+00> : vector<128x128xf32>
    %37 = tpu.matmul %32, %34, %cst_22 {dimension_numbers = #tpu.dot_dimension_numbers<[1], [1], [0], [0], [0, 0, 1, 0], [], []>} : vector<128x32xbf16>, vector<128x32xbf16>, vector<128x128xf32> -> vector<128x128xf32>
    %cst_23 = arith.constant dense<0xFF800000> : vector<128xf32>
    %38 = vector.multi_reduction <maximumf>, %37, %cst_23 [1] : vector<128x128xf32> to vector<128xf32>
    %39 = vector.shape_cast %38 : vector<128xf32> to vector<128x1xf32>
    %40 = vector.broadcast %39 : vector<128x1xf32> to vector<128x128xf32>
    %41 = arith.subf %37, %40 : vector<128x128xf32>
    %42 = math.exp %41 : vector<128x128xf32>
    %cst_24 = arith.constant dense<0.000000e+00> : vector<128xf32>
    %43 = vector.multi_reduction <add>, %42, %cst_24 [1] : vector<128x128xf32> to vector<128xf32>
    %44 = vector.shape_cast %43 : vector<128xf32> to vector<128x1xf32>
    %45 = arith.truncf %42 : vector<128x128xf32> to vector<128x128xbf16>
    %cst_25 = arith.constant dense<0.000000e+00> : vector<128x32xf32>
    %46 = tpu.matmul %45, %36, %cst_25 {dimension_numbers = #tpu.dot_dimension_numbers<[1], [0], [0], [1], [0, 0, 1, 1], [], []>} : vector<128x128xbf16>, vector<128x32xbf16>, vector<128x32xf32> -> vector<128x32xf32>
    %47 = tpu.reciprocal %44 {approx = true} : vector<128x1xf32> -> vector<128x1xf32>
    %48 = vector.broadcast %47 : vector<128x1xf32> to vector<128x32xf32>
    %49 = arith.mulf %46, %48 : vector<128x32xf32>
    %50 = arith.truncf %49 : vector<128x32xf32> to vector<128x32xbf16>
    %c0_26 = arith.constant 0 : index
    %c0_27 = arith.constant 0 : index
    %c32_28 = arith.constant 32 : index
    %51 = vector.load %arg4[%c0_26, %c0_27, %c32_28] : memref<1x128x128xbf16, #tpu.memory_space<vmem>>, vector<1x128x32xbf16>
    %52 = vector.shape_cast %51 : vector<1x128x32xbf16> to vector<128x32xbf16>
    %53 = vector.shape_cast %50 : vector<128x32xbf16> to vector<1x128x32xbf16>
    tpu.vector_store %arg4[%c0_26, %c0_27, %c32_28], %53 {strides = array<i32>} : memref<1x128x128xbf16, #tpu.memory_space<vmem>>, vector<1x128x32xbf16>,
    %c0_29 = arith.constant 0 : index
    %c0_30 = arith.constant 0 : index
    %c64 = arith.constant 64 : index
    %54 = vector.load %arg2[%c0_29, %c0_30, %c64] : memref<1x128x128xbf16, #tpu.memory_space<vmem>>, vector<1x128x32xbf16>
    %55 = vector.shape_cast %54 : vector<1x128x32xbf16> to vector<128x32xbf16>
    %56 = arith.extf %55 : vector<128x32xbf16> to vector<128x32xf32>
    %cst_31 = arith.constant 0.176776692 : f32
    %57 = vector.broadcast %cst_31 : f32 to vector<128x32xf32>
    %58 = arith.mulf %56, %57 : vector<128x32xf32>
    %59 = arith.truncf %58 : vector<128x32xf32> to vector<128x32xbf16>
    %c0_32 = arith.constant 0 : index
    %c0_33 = arith.constant 0 : index
    %c64_34 = arith.constant 64 : index
    %60 = vector.load %arg3[%c0_32, %c0_33, %c64_34] : memref<1x128x256xbf16, #tpu.memory_space<vmem>>, vector<1x128x32xbf16>
    %61 = vector.shape_cast %60 : vector<1x128x32xbf16> to vector<128x32xbf16>
    %c0_35 = arith.constant 0 : index
    %c0_36 = arith.constant 0 : index
    %c192 = arith.constant 192 : index
    %62 = vector.load %arg3[%c0_35, %c0_36, %c192] : memref<1x128x256xbf16, #tpu.memory_space<vmem>>, vector<1x128x32xbf16>
    %63 = vector.shape_cast %62 : vector<1x128x32xbf16> to vector<128x32xbf16>
    %cst_37 = arith.constant dense<0.000000e+00> : vector<128x128xf32>
    %64 = tpu.matmul %59, %61, %cst_37 {dimension_numbers = #tpu.dot_dimension_numbers<[1], [1], [0], [0], [0, 0, 1, 0], [], []>} : vector<128x32xbf16>, vector<128x32xbf16>, vector<128x128xf32> -> vector<128x128xf32>
    %cst_38 = arith.constant dense<0xFF800000> : vector<128xf32>
    %65 = vector.multi_reduction <maximumf>, %64, %cst_38 [1] : vector<128x128xf32> to vector<128xf32>
    %66 = vector.shape_cast %65 : vector<128xf32> to vector<128x1xf32>
    %67 = vector.broadcast %66 : vector<128x1xf32> to vector<128x128xf32>
    %68 = arith.subf %64, %67 : vector<128x128xf32>
    %69 = math.exp %68 : vector<128x128xf32>
    %cst_39 = arith.constant dense<0.000000e+00> : vector<128xf32>
    %70 = vector.multi_reduction <add>, %69, %cst_39 [1] : vector<128x128xf32> to vector<128xf32>
    %71 = vector.shape_cast %70 : vector<128xf32> to vector<128x1xf32>
    %72 = arith.truncf %69 : vector<128x128xf32> to vector<128x128xbf16>
    %cst_40 = arith.constant dense<0.000000e+00> : vector<128x32xf32>
    %73 = tpu.matmul %72, %63, %cst_40 {dimension_numbers = #tpu.dot_dimension_numbers<[1], [0], [0], [1], [0, 0, 1, 1], [], []>} : vector<128x128xbf16>, vector<128x32xbf16>, vector<128x32xf32> -> vector<128x32xf32>
    %74 = tpu.reciprocal %71 {approx = true} : vector<128x1xf32> -> vector<128x1xf32>
    %75 = vector.broadcast %74 : vector<128x1xf32> to vector<128x32xf32>
    %76 = arith.mulf %73, %75 : vector<128x32xf32>
    %77 = arith.truncf %76 : vector<128x32xf32> to vector<128x32xbf16>
    %c0_41 = arith.constant 0 : index
    %c0_42 = arith.constant 0 : index
    %c64_43 = arith.constant 64 : index
    %78 = vector.load %arg4[%c0_41, %c0_42, %c64_43] : memref<1x128x128xbf16, #tpu.memory_space<vmem>>, vector<1x128x32xbf16>
    %79 = vector.shape_cast %78 : vector<1x128x32xbf16> to vector<128x32xbf16>
    %80 = vector.shape_cast %77 : vector<128x32xbf16> to vector<1x128x32xbf16>
    tpu.vector_store %arg4[%c0_41, %c0_42, %c64_43], %80 {strides = array<i32>} : memref<1x128x128xbf16, #tpu.memory_space<vmem>>, vector<1x128x32xbf16>,
    %c0_44 = arith.constant 0 : index
    %c0_45 = arith.constant 0 : index
    %c96 = arith.constant 96 : index
    %81 = vector.load %arg2[%c0_44, %c0_45, %c96] : memref<1x128x128xbf16, #tpu.memory_space<vmem>>, vector<1x128x32xbf16>
    %82 = vector.shape_cast %81 : vector<1x128x32xbf16> to vector<128x32xbf16>
    %83 = arith.extf %82 : vector<128x32xbf16> to vector<128x32xf32>
    %cst_46 = arith.constant 0.176776692 : f32
    %84 = vector.broadcast %cst_46 : f32 to vector<128x32xf32>
    %85 = arith.mulf %83, %84 : vector<128x32xf32>
    %86 = arith.truncf %85 : vector<128x32xf32> to vector<128x32xbf16>
    %c0_47 = arith.constant 0 : index
    %c0_48 = arith.constant 0 : index
    %c96_49 = arith.constant 96 : index
    %87 = vector.load %arg3[%c0_47, %c0_48, %c96_49] : memref<1x128x256xbf16, #tpu.memory_space<vmem>>, vector<1x128x32xbf16>
    %88 = vector.shape_cast %87 : vector<1x128x32xbf16> to vector<128x32xbf16>
    %c0_50 = arith.constant 0 : index
    %c0_51 = arith.constant 0 : index
    %c224 = arith.constant 224 : index
    %89 = vector.load %arg3[%c0_50, %c0_51, %c224] : memref<1x128x256xbf16, #tpu.memory_space<vmem>>, vector<1x128x32xbf16>
    %90 = vector.shape_cast %89 : vector<1x128x32xbf16> to vector<128x32xbf16>
    %cst_52 = arith.constant dense<0.000000e+00> : vector<128x128xf32>
    %91 = tpu.matmul %86, %88, %cst_52 {dimension_numbers = #tpu.dot_dimension_numbers<[1], [1], [0], [0], [0, 0, 1, 0], [], []>} : vector<128x32xbf16>, vector<128x32xbf16>, vector<128x128xf32> -> vector<128x128xf32>
    %cst_53 = arith.constant dense<0xFF800000> : vector<128xf32>
    %92 = vector.multi_reduction <maximumf>, %91, %cst_53 [1] : vector<128x128xf32> to vector<128xf32>
    %93 = vector.shape_cast %92 : vector<128xf32> to vector<128x1xf32>
    %94 = vector.broadcast %93 : vector<128x1xf32> to vector<128x128xf32>
    %95 = arith.subf %91, %94 : vector<128x128xf32>
    %96 = math.exp %95 : vector<128x128xf32>
    %cst_54 = arith.constant dense<0.000000e+00> : vector<128xf32>
    %97 = vector.multi_reduction <add>, %96, %cst_54 [1] : vector<128x128xf32> to vector<128xf32>
    %98 = vector.shape_cast %97 : vector<128xf32> to vector<128x1xf32>
    %99 = arith.truncf %96 : vector<128x128xf32> to vector<128x128xbf16>
    %cst_55 = arith.constant dense<0.000000e+00> : vector<128x32xf32>
    %100 = tpu.matmul %99, %90, %cst_55 {dimension_numbers = #tpu.dot_dimension_numbers<[1], [0], [0], [1], [0, 0, 1, 1], [], []>} : vector<128x128xbf16>, vector<128x32xbf16>, vector<128x32xf32> -> vector<128x32xf32>
    %101 = tpu.reciprocal %98 {approx = true} : vector<128x1xf32> -> vector<128x1xf32>
    %102 = vector.broadcast %101 : vector<128x1xf32> to vector<128x32xf32>
    %103 = arith.mulf %100, %102 : vector<128x32xf32>
    %104 = arith.truncf %103 : vector<128x32xf32> to vector<128x32xbf16>
    %c0_56 = arith.constant 0 : index
    %c0_57 = arith.constant 0 : index
    %c96_58 = arith.constant 96 : index
    %105 = vector.load %arg4[%c0_56, %c0_57, %c96_58] : memref<1x128x128xbf16, #tpu.memory_space<vmem>>, vector<1x128x32xbf16>
    %106 = vector.shape_cast %105 : vector<1x128x32xbf16> to vector<128x32xbf16>
    %107 = vector.shape_cast %104 : vector<128x32xbf16> to vector<1x128x32xbf16>
    tpu.vector_store %arg4[%c0_56, %c0_57, %c96_58], %107 {strides = array<i32>} : memref<1x128x128xbf16, #tpu.memory_space<vmem>>, vector<1x128x32xbf16>,
    return
  }
  func.func @transform_0(%arg0: i32, %arg1: i32) -> (i32, i32, i32) {
    %c0_i32 = arith.constant 0 : i32
    %c0_i32_0 = arith.constant 0 : i32
    return %arg0, %arg1, %c0_i32 : i32, i32, i32
  }
  func.func @transform_1(%arg0: i32, %arg1: i32) -> (i32, i32, i32) {
    %c0_i32 = arith.constant 0 : i32
    %c0_i32_0 = arith.constant 0 : i32
    %c0_i32_1 = arith.constant 0 : i32
    return %arg0, %c0_i32, %c0_i32_0 : i32, i32, i32
  }
  func.func @transform_2(%arg0: i32, %arg1: i32) -> (i32, i32, i32) {
    %c0_i32 = arith.constant 0 : i32
    %c0_i32_0 = arith.constant 0 : i32
    return %arg0, %arg1, %c0_i32 : i32, i32, i32
  }
}

</mosaic_0001>

<bundles_post_ra>
// kernel: tpu_custom_call.1
= control target key start
LH: loop header
LB: loop body
LE: loop exit
PB: predicated region body
PF: predicated region fallthrough
CT: control target
= control target key end

     0   :  { %7 = vsyncpa [#allocation3], 0  ;;  %s5985_s0 = inlined_call_operand.hbm [shape: bf16[2,128,128], index: 0, kind: input, shape index: {}]   ;;  %s5986_s1 = inlined_call_operand.hbm [shape: bf16[2,128,256], index: 1, kind: input, shape index: {}]   ;;  %s5987_s2 = inlined_call_operand.hbm [shape: bf16[2,128,128], index: 2, kind: output, shape index: {}]  }
   0x1   :  { %9 = vsyncpa [#allocation3 + $0x1], 0 }
   0x2   :  { %10 = vsyncpa [#allocation6], 0 }
   0x3   :  { %12 = vsyncpa [#allocation6 + $0x1], 0 }
   0x4   :  { %13 = vsyncpa [#allocation4], 0 }
   0x5   :  { %15 = vsyncpa [#allocation4 + $0x1], 0  ;;  %s4599_s9 = smov 0   ;;  %s4601_s10 = smov 0  }
   0x6   :  { %s4603_s11 = smov 0   ;;  %s4605_s12 = smov 0  }
   0x7   :  { %s4607_s13 = smov 0   ;;  %s4609_s14 = smov 0  }
   0x8 LB: > { %s3218_s15 = sadd.s32 4294967295, %s4571_s14   ;;  %s3219_s16 = sadd.s32 4294967294, %s4571_s14   ;;  %s4571_s14 = sphi %s4609_s14, %s21_s14   ;;  %s4567_s13 = sphi %s4607_s13, %s6107_s13   ;;  %s4563_s12 = sphi %s4605_s12, %s6106_s12   ;;  %s4559_s11 = sphi %s4603_s11, %s6105_s11   ;;  %s4555_s10 = sphi %s4601_s10, %s6104_s10   ;;  %s4551_s9 = sphi %s4599_s9, %s6103_s9  }
   0x9   : > { %s33_s17 = sadd.s32 1, %s4567_s13  ;;  %s42_s18 = sadd.s32 1, %s4559_s11 }
   0xa   : > { %p35_p0 = scmp.ge.s32.totalorder %s33_s17, 2  ;;  %p49_p1 = scmp.ne.s32.totalorder %s4559_s11, %s4555_s10 }
   0xb   : > { %p50_p2 = scmp.eq.s32.totalorder %s4571_s14, 0  ;;  %p55_p3 = scmp.ne.s32.totalorder %s4555_s10, %s4551_s9 }
   0xc   : > { %s6109_s17 = smov (%p35_p0, %s33_s17), 0  ;;  %p56_p5 = scmp.eq.s32.totalorder %s3218_s15, 0 }
   0xd   : > { %p4640_p4 = por %p50_p2, %p49_p1  ;;  %s37_s20 = ssub.s32 %s4567_s13, %s6109_s17 }
   0xe   : > { %p107_p6 = scmp.eq.s32.totalorder %s3218_s15, 1  ;;  %p40_p7 = scmp.eq.s32.totalorder %s37_s20, 0 }
   0xf   : > { %p4646_p8 = por %p56_p5, %p55_p3  ;;  %p113_p10 = scmp.eq.s32.totalorder %s3219_s16, 1 }
  0x10   : > { %p4650_p9 = por %p107_p6, %p49_p1  ;;  %p3221_p12 = scmp.ge.s32.totalorder %s4571_s14, 2 }
  0x11   : > { %s4655_s23 = scalar_select %p40_p7, %s4559_s11, %s42_s18  }
  0x12   : > { %p4657_p11 = por %p113_p10, %p55_p3  ;;  %p4053_p13 = scmp.lt.s32.totalorder %s4571_s14, 2 }
  0x13   : > { %s4664_s25 = sand.u32 1, %s4559_s11   ;;  %s3397_s27 = sshll.u32 %s4567_s13, 10 }
  0x14   : > { %s3222_s26 = sshll.u32 %s4664_s25, 6  ;;  %s145_s30 = scalar_lea.hbm %s5985_s0, %s3397_s27 }
  0x15   : > { %s137_s3 = scalar_lea.vmem [#allocation2], %s3222_s26  ;;  %p4673_p0 = pnand %p4053_p13, %p4640_p4 }
  0x16   : > { %s146_s4 = sshll.u32 %s137_s3, 4  ;;  %p3228_p1 = scmp.ge.s32.totalorder %s4571_s14, 1  ;;  %s147_s4 = int_to_ptr.vmem [resolvable:$true] %s146_s4 }
  0x17   : > { %s134_s6 = scalar_lea.sflag [#allocation3], %s4664_s25  ;;  %p4433_p2 = pneg %p4673_p0 }
  0x18   : > { %s4444_s7 = scalar_lea.vmem %s147_s4, 1024  ;;  %s4573_s8 = smov [#allocation2]  }
  0x19   : > { %p4445_p3 = scmp.ne.s32.totalorder %s147_s4, %s4444_s7  ;;  %s4449_s15 = sshll.u32 %s4573_s8, 4  ;;  %s4450_s15 = int_to_ptr.vmem [resolvable:$false] %s4449_s15 }
  0x1a   : > { %s4451_s16 = scalar_lea.vmem %s4450_s15, 2048  ;;  %p4452_p4 = scmp.lt.s32.totalorder %s147_s4, %s4450_s15 }
  0x1b   : > { %p4447_p5 = pnand %p4445_p3, %p4433_p2  ;;  %p4453_p7 = scmp.lt.s32.totalorder %s4451_s16, %s4444_s7 }
  0x1d   : > { %p4448_p6 = pneg %p4447_p5  ;;  %p4454_p10 = por %p4453_p7, %p4452_p4 }
  0x1f   : > { %p4455_p13 = pnand %p4454_p10, %p4448_p6 }
  0x21   : > { %4458 = shalt.err (!%p4455_p13)
}
  0x22   : > { %s4574_s18 = smov 64   ;;  %s4575_s19 = smov 4  }
  0x23   : > { %4045 = dma.hbm_to_vmem [thread:$0]  (!%p4673_p0), %s145_s30, 1024, %s147_s4, %s134_s6, %s4574_s18, %s4574_s18, %s4575_s19  }
  0x24   : > { %p175_p3 = scmp.lt.s32.totalorder %s4571_s14, 3  ;;  %s3225_s20 = sshll.u32 %s4664_s25, 7 }
  0x25   : > { %s3398_s26 = sshll.u32 %s4567_s13, 11  ;;  %s160_s7 = scalar_lea.vmem [#allocation5], %s3225_s20 }
  0x26   : > { %p4691_p5 = pnand %p3228_p1, %p175_p3  ;;  %s166_s3 = scalar_lea.hbm %s5986_s1, %s3398_s26 }
  0x27   : > { %s167_s8 = sshll.u32 %s160_s7, 4  ;;  %s157_s15 = scalar_lea.sflag [#allocation6], %s4664_s25  ;;  %s168_s8 = int_to_ptr.vmem [resolvable:$true] %s167_s8 }
  0x28   : > { %s4472_s16 = scalar_lea.vmem %s168_s8, 2048  ;;  %s4576_s30 = smov [#allocation5]  }
  0x29   : > { %p4473_p6 = scmp.ne.s32.totalorder %s168_s8, %s4472_s16  ;;  %s4477_s4 = sshll.u32 %s4576_s30, 4  ;;  %s4478_s4 = int_to_ptr.vmem [resolvable:$false] %s4477_s4 }
  0x2a   : > { %s4479_s6 = scalar_lea.vmem %s4478_s4, 4096  ;;  %p4480_p1 = scmp.lt.s32.totalorder %s168_s8, %s4478_s4 }
  0x2b   : > { %p4475_p4 = pnand %p4473_p6, %p4433_p2  ;;  %p4481_p10 = scmp.lt.s32.totalorder %s4479_s6, %s4472_s16 }
  0x2d   : > { %p4476_p7 = pneg %p4475_p4  ;;  %p4482_p13 = por %p4481_p10, %p4480_p1 }
  0x2f   : > { %p4483_p3 = pnand %p4482_p13, %p4476_p7 }
  0x31   : > { %4486 = shalt.err (!%p4483_p3)
}
  0x32   : > { %s4577_s18 = smov 128   ;;  %s4578_s19 = smov 8  }
  0x33   : > { %4048 = dma.hbm_to_vmem [thread:$0]  (!%p4673_p0), %s166_s3, 2048, %s168_s8, %s157_s15, %s4577_s18, %s4577_s18, %s4578_s19  }
  0x34   : > { %179 = sbr.rel (%p4691_p5) target bundleno = 2277 (0x8e5), region = 28 }
  0x39   : > { %s4707_s25 = sand.u32 1, %s4555_s10  }
  0x3a   : > { %s3229_s20 = sshll.u32 %s4707_s25, 6  ;;  %s182_s26 = scalar_lea.sflag [#allocation3], %s4707_s25 }
  0x3b   : > { %s4713_s28 = scalar_lea.vmem [#allocation2], %s3229_s20 }
  0x3c   : > { %4538 = dma.done.wait (%p4646_p8), %s182_s26, 1024  }
  0x3d   : > { %4540 = vsyncadd (%p4646_p8), %s182_s26, 4294966272  ;;  %s3230_s5 = sshll.u32 %s4707_s25, 7  ;;  %s191_s27 = scalar_lea.sflag [#allocation6], %s4707_s25 }
  0x3e   : > { %s4721_s29 = scalar_lea.vmem [#allocation5], %s3230_s5 }
  0x3f   : > { %4542 = dma.done.wait (%p4646_p8), %s191_s27, 2048  }
  0x40   : > { %4544 = vsyncadd (%p4646_p8), %s191_s27, 4294965248  ;;  %vm351_vm0 = vcmask 261120   ;;  %v4111_v0 = vld [vmem:[%s4721_s29 + $0x70] ss:$8 sps:$4 sm:$0xff]   ;;  %v4112_v1 = vld [vmem:[%s4721_s29 + $0x60] ss:$8 sps:$4 sm:$0xff]  }
  0x41   : > { %4004 = vmatprep.subr.msk.bf16.mxu0 %vm351_vm0, %v4111_v0  ;;  %v398_v2 = vsel %vm351_vm0, %v4111_v0, 0  ;;  %v3465_v3 = vld [vmem:[%s4713_s28] sm:$0xff]   ;;  %v395_v6 = vsel %vm351_vm0, %v4112_v1, 0  ;;  %v4113_v7 = vld [vmem:[%s4721_s29 + $0x50] ss:$8 sps:$4 sm:$0xff]   ;;  %s4579_s21 = smov 96  }
  0x42   : > { %3749 = vmatpush3.bf16.xpose.msra.mxu0 %v398_v2  ;;  %v3466_v4 = vunpack.c.l.bf16 %v3465_v3  ;;  %v3467_v5 = vunpack.c.h.bf16 %v3465_v3  ;;  %v4114_v11 = vld [vmem:[%s4721_s29 + $0x40] ss:$8 sps:$4 sm:$0xff]   ;;  %v4115_v12 = vld [vmem:[%s4721_s29 + $0x30] ss:$8 sps:$4 sm:$0xff]   ;;  %v392_v16 = vsel %vm351_vm0, %v4113_v7, 0  ;;  %s4580_s3 = smov 64  }
  0x43   : > { %4005 = vmatprep.subr.msk.bf16.mxu0 %vm351_vm0, %v4112_v1  ;;  %v4116_v13 = vld [vmem:[%s4721_s29 + $0x20] ss:$8 sps:$4 sm:$0xff]   ;;  %v4117_v14 = vld [vmem:[%s4721_s29 + $0x10] ss:$8 sps:$4 sm:$0xff]   ;;  %v389_v18 = vsel %vm351_vm0, %v4114_v11, 0  ;;  %v386_v19 = vsel %vm351_vm0, %v4115_v12, 0 }
  0x44   : > { %v255_v8 = vmul.f32 0.17677669, %v3466_v4  ;;  %v256_v9 = vmul.f32 0.17677669, %v3467_v5  ;;  %v4119_v15 = vld [vmem:[%s4721_s29 + $0x60] ss:$8 sps:$4 sm:$0xff]  }
  0x45   : > { %v4120_v17 = vld [vmem:[%s4721_s29 + $0x70] ss:$8 sps:$4 sm:$0xff]   ;;  %1039 = vrot.lane.b32.xlu1 %v4119_v15, %s4579_s21  ;;  %v383_v20 = vsel %vm351_vm0, %v4116_v13, 0  ;;  %v380_v21 = vsel %vm351_vm0, %v4117_v14, 0  ;;  %v4118_v23 = vld [vmem:[%s4721_s29] ss:$8 sps:$4 sm:$0xff]  }
  0x46   : > { %v4736_v10 = vpack.c.bf16 %v256_v9, %v255_v8  ;;  %1041 = vrot.lane.b32.xlu0 %v4120_v17, %s4579_s21  ;;  %v4121_v22 = vld [vmem:[%s4721_s29 + $0x50] ss:$8 sps:$4 sm:$0xff]   ;;  %v3592_v24 = vld [vmem:[%s4713_s28 + $0x8] sm:$0xff]   ;;  %v377_v30 = vsel %vm351_vm0, %v4118_v23, 0  ;;  %v3595_v36 = vld [vmem:[%s4713_s28 + $0x20] sm:$0xff]   ;;  %s4581_s7 = smov 32  }
  0x47   : > { %v3593_v25 = vld [vmem:[%s4713_s28 + $0x10] sm:$0xff]   ;;  %v3470_v26 = vunpack.c.l.bf16 %v3592_v24  ;;  %v3471_v27 = vunpack.c.h.bf16 %v3592_v24  ;;  %v3594_v35 = vld [vmem:[%s4713_s28 + $0x18] sm:$0xff]   ;;  %v3482_v41 = vunpack.c.l.bf16 %v3595_v36  ;;  %v3483_v42 = vunpack.c.h.bf16 %v3595_v36  ;;  %v3596_v47 = vld [vmem:[%s4713_s28 + $0x28] sm:$0xff]   ;;  %s5663_s8 = scalar_lea.vmem [#allocation7], %s3229_s20  ;;  %s3463_s15 = sshll.u32 %s4563_s12, 10 }
  0x48   : > { %3764 = vmatprep.mubr.msk.bf16.mxu0 %vm351_vm0, %v4736_v10  ;;  %v3474_v28 = vunpack.c.l.bf16 %v3593_v25  ;;  %v3475_v29 = vunpack.c.h.bf16 %v3593_v25  ;;  %v3478_v38 = vunpack.c.l.bf16 %v3594_v35  ;;  %v3479_v39 = vunpack.c.h.bf16 %v3594_v35  ;;  %v3597_v48 = vld [vmem:[%s4713_s28 + $0x30] sm:$0xff]   ;;  %v3598_v59 = vld [vmem:[%s4713_s28 + $0x38] sm:$0xff]   ;;  %v4124_v4 = vld [vmem:[%s4721_s29 + $0x64] ss:$8 sps:$4 sm:$0xff]   ;;  %s3108_s16 = sshll.u32 %s5663_s8, 4  ;;  %s5931_s6 = scalar_lea.hbm %s5987_s2, %s3463_s15  ;;  %s5933_s16 = int_to_ptr.vmem [resolvable:$true] %s3108_s16 }
  0x49   : > { %v257_v31 = vmul.f32 0.17677669, %v3470_v26  ;;  %v258_v32 = vmul.f32 0.17677669, %v3471_v27  ;;  %v263_v45 = vmul.f32 0.17677669, %v3482_v41  ;;  %v3486_v50 = vunpack.c.l.bf16 %v3596_v47 }
  0x4a   : > { %3751 = vmatpush3.bf16.xpose.msra.mxu0 %v395_v6  ;;  %1037 = vrot.lane.b32.xlu0 %v4121_v22, %s4579_s21  ;;  %v259_v33 = vmul.f32 0.17677669, %v3474_v28  ;;  %v260_v34 = vmul.f32 0.17677669, %v3475_v29  ;;  %v261_v43 = vmul.f32 0.17677669, %v3478_v38  ;;  %v3487_v51 = vunpack.c.h.bf16 %v3596_v47 }
  0x4b   : > { %4006 = vmatprep.subr.msk.bf16.mxu0 %vm351_vm0, %v4113_v7  ;;  %v4766_v37 = vpack.c.bf16 %v258_v32, %v257_v31  ;;  %v262_v44 = vmul.f32 0.17677669, %v3479_v39  ;;  %v264_v46 = vmul.f32 0.17677669, %v3483_v42  ;;  %v3490_v53 = vunpack.c.l.bf16 %v3597_v48  ;;  %v4123_v3 = vld [vmem:[%s4721_s29 + $0x74] ss:$8 sps:$4 sm:$0xff]  }
  0x4c   : > { %v4768_v40 = vpack.c.bf16 %v260_v34, %v259_v33  ;;  %v3491_v54 = vunpack.c.h.bf16 %v3597_v48  ;;  %v265_v55 = vmul.f32 0.17677669, %v3486_v50  ;;  %v266_v56 = vmul.f32 0.17677669, %v3487_v51  ;;  %3780 = vmatprep.subr.bf16.mxu1 %v4123_v3  ;;  %v4125_v5 = vld [vmem:[%s4721_s29 + $0x54] ss:$8 sps:$4 sm:$0xff]  }
  0x4d   : > { %v4776_v49 = vpack.c.bf16 %v262_v44, %v261_v43  ;;  %v4778_v52 = vpack.c.bf16 %v264_v46, %v263_v45  ;;  %v267_v57 = vmul.f32 0.17677669, %v3490_v53  ;;  %v3494_v61 = vunpack.c.l.bf16 %v3598_v59  ;;  %3781 = vmatpush3.bf16.msra.mxu1 %v4123_v3  ;;  %v4126_v6 = vld [vmem:[%s4721_s29 + $0x44] ss:$8 sps:$4 sm:$0xff]   ;;  %v4127_v7 = vld [vmem:[%s4721_s29 + $0x34] ss:$8 sps:$4 sm:$0xff]  }
  0x4e   : > { %v268_v58 = vmul.f32 0.17677669, %v3491_v54  ;;  %v4785_v60 = vpack.c.bf16 %v266_v56, %v265_v55  ;;  %v3495_v62 = vunpack.c.h.bf16 %v3598_v59  ;;  %3782 = vmatprep.subr.bf16.mxu1 %v4124_v4  ;;  %v4128_v8 = vld [vmem:[%s4721_s29 + $0x24] ss:$8 sps:$4 sm:$0xff]   ;;  %v4129_v9 = vld [vmem:[%s4721_s29 + $0x14] ss:$8 sps:$4 sm:$0xff]  }
  0x4f   : > { %v269_v0 = vmul.f32 0.17677669, %v3494_v61  ;;  %v4122_v25 = vld [vmem:[%s4721_s29 + $0x40] ss:$8 sps:$4 sm:$0xff]   ;;  %v4133_v32 = vld [vmem:[%s4721_s29 + $0x10] ss:$8 sps:$4 sm:$0xff]  }
  0x50   : > { %v4787_v63 = vpack.c.bf16 %v268_v58, %v267_v57  ;;  %v270_v1 = vmul.f32 0.17677669, %v3495_v62  ;;  %v4132_v31 = vld [vmem:[%s4721_s29 + $0x20] ss:$8 sps:$4 sm:$0xff]   ;;  %vm858_vm1 = vcmask 257024   ;;  %vm1597_vm2 = vcmask 519424  }
  0x51   : > { %3783 = vmatpush3.bf16.msra.mxu1 %v4124_v4  ;;  %v4134_v33 = vld [vmem:[%s4721_s29] ss:$8 sps:$4 sm:$0xff]   ;;  %vm2336_vm3 = vcmask 781824   ;;  %vm3075_vm4 = vcmask 1044224   ;;  %s3093_s18 = scalar_lea.sflag [#allocation4], %s4707_s25  ;;  %s4487_s19 = scalar_lea.vmem %s5933_s16, 1024 }
  0x52   : > { %3753 = vmatpush3.bf16.xpose.msra.mxu0 %v392_v16  ;;  %v4793_v2 = vpack.c.bf16 %v270_v1, %v269_v0  ;;  %3784 = vmatprep.subr.bf16.mxu1 %v4125_v5  ;;  %p4488_p8 = scmp.ne.s32.totalorder %s5933_s16, %s4487_s19  ;;  %s4582_s12 = smov [#allocation7]  }
  0x53   : > { %4007 = vmatprep.subr.msk.bf16.mxu0 %vm351_vm0, %v4114_v11  ;;  %v4130_v11 = vld [vmem:[%s4721_s29 + $0x4] ss:$8 sps:$4 sm:$0xff]   ;;  %s4491_s20 = sshll.u32 %s4582_s12, 4  ;;  %s4492_s20 = int_to_ptr.vmem [resolvable:$false] %s4491_s20 }
  0x54   : > { %p4489_p0 = pnand %p4488_p8, %p4650_p9  ;;  %s4493_s26 = scalar_lea.vmem %s4492_s20, 2048 }
  0x55   : > { %3785 = vmatpush3.bf16.msra.mxu1 %v4125_v5  ;;  %p4494_p5 = scmp.lt.s32.totalorder %s5933_s16, %s4492_s20  ;;  %p4495_p6 = scmp.lt.s32.totalorder %s4493_s26, %s4487_s19 }
  0x56   : > { %3786 = vmatprep.subr.bf16.mxu1 %v4126_v6  ;;  %p4490_p2 = pneg %p4489_p0 }
  0x57   : > { %p4496_p4 = por %p4495_p6, %p4494_p5 }
  0x59   : > { %3787 = vmatpush3.bf16.msra.mxu1 %v4126_v6  ;;  %p4497_p7 = pnand %p4496_p4, %p4490_p2 }
  0x5a   : > { %3755 = vmatpush3.bf16.xpose.msra.mxu0 %v389_v18  ;;  %3788 = vmatprep.subr.bf16.mxu1 %v4127_v7 }
  0x5b   : > { %4008 = vmatprep.subr.msk.bf16.mxu0 %vm351_vm0, %v4115_v12 }
  0x5d   : > { %3789 = vmatpush3.bf16.msra.mxu1 %v4127_v7 }
  0x5e   : > { %3790 = vmatprep.subr.bf16.mxu1 %v4128_v8 }
  0x61   : > { %3791 = vmatpush3.bf16.msra.mxu1 %v4128_v8 }
  0x62   : > { %3757 = vmatpush3.bf16.xpose.msra.mxu0 %v386_v19  ;;  %3792 = vmatprep.subr.bf16.mxu1 %v4129_v9 }
  0x63   : > { %4009 = vmatprep.subr.msk.bf16.mxu0 %vm351_vm0, %v4116_v13 }
  0x65   : > { %3793 = vmatpush3.bf16.msra.mxu1 %v4129_v9 }
  0x66   : > { %3794 = vmatprep.subr.bf16.mxu1 %v4130_v11 }
  0x69   : > { %3795 = vmatpush3.bf16.msra.mxu1 %v4130_v11 }
  0x6a   : > { %3759 = vmatpush3.bf16.xpose.msra.mxu0 %v383_v20 }
  0x6b   : > { %4010 = vmatprep.subr.msk.bf16.mxu0 %vm351_vm0, %v4117_v14 }
  0x72   : > { %3761 = vmatpush3.bf16.xpose.msra.mxu0 %v380_v21 }
  0x73   : > { %4011 = vmatprep.subr.msk.bf16.mxu0 %vm351_vm0, %v4118_v23 }
  0x7a   : > { %3763 = vmatpush3.bf16.xpose.msra.mxu0 %v377_v30  ;;  %v4131_v30 = vld [vmem:[%s4721_s29 + $0x30] ss:$8 sps:$4 sm:$0xff]  }
  0x81   : > { %3765 = vmatmul.mubr.msk.bf16.vlgmr.msra.gmra.mxu0 %vm351_vm0, %v4766_v37 }
  0x82   : > { %3768 = vmatprep.mubr.msk.bf16.mxu0 %vm351_vm0, %v4768_v40 }
  0x89   : > { %3769 = vmatmul.mubr.msk.bf16.gmra.mxu0 %vm351_vm0, %v4776_v49 }
  0x8a   : > { %3772 = vmatprep.mubr.msk.bf16.mxu0 %vm351_vm0, %v4778_v52 }
  0x91   : > { %3773 = vmatmul.mubr.msk.bf16.gmra.mxu0 %vm351_vm0, %v4785_v60 }
  0x92   : > { %3776 = vmatprep.mubr.msk.bf16.mxu0 %vm351_vm0, %v4787_v63 }
  0x99   : > { %3777 = vmatmul.mubr.msk.bf16.gmra.mxu0 %vm351_vm0, %v4793_v2 }
  0xb7   : > { %v1040_v34 = vpop.permute.xlu1 %1039 }
  0xb8   : > { %v4805_v12 = vpop.permute.xlu0 %1041 }
  0xb9   : > { %4012 = vmatprep.subr.msk.bf16.mxu1 %vm351_vm0, %v4805_v12  ;;  %v1089_v8 = vsel %vm351_vm0, %v4805_v12, 0 }
  0xbc   : > { %v1038_v35 = vpop.permute.xlu0 %1037 }
 0x141   : > { %v3766_v13 = vpop.f32.mrf.mxu0 }
 0x142   : > { %501 = vmax.xlane.f32.xlu1 %v3766_v13 }
 0x143   : > { %v434_v14 = vpop.f32.mrf.mxu0 }
 0x144   : > { %497 = vmax.xlane.f32.xlu0 %v434_v14 }
 0x145   : > { %v3767_v15 = vpop.f32.mrf.mxu0 }
 0x146   : > { %503 = vmax.xlane.f32.xlu1 %v3767_v15 }
 0x147   : > { %v437_v16 = vpop.f32.mrf.mxu0 }
 0x148   : > { %499 = vmax.xlane.f32.xlu0 %v437_v16 }
 0x149   : > { %v4809_v17 = vpop.f32.mrf.mxu0 }
 0x14a   : > { %509 = vmax.xlane.f32.xlu1 %v4809_v17 }
 0x14b   : > { %v4812_v18 = vpop.f32.mrf.mxu0 }
 0x14d   : > { %v4814_v19 = vpop.f32.mrf.mxu0 }
 0x14e   : > { %505 = vmax.xlane.f32.xlu1 %v4812_v18 }
 0x14f   : > { %v4817_v20 = vpop.f32.mrf.mxu0 }
 0x151   : > { %v4819_v21 = vpop.f32.mrf.mxu0 }
 0x152   : > { %511 = vmax.xlane.f32.xlu1 %v4814_v19 }
 0x153   : > { %v4822_v22 = vpop.f32.mrf.mxu0 }
 0x155   : > { %v4824_v23 = vpop.f32.mrf.mxu0 }
 0x156   : > { %507 = vmax.xlane.f32.xlu1 %v4817_v20 }
 0x157   : > { %v4827_v24 = vpop.f32.mrf.mxu0 }
 0x159   : > { %v4831_v26 = vpop.f32.mrf.mxu0 }
 0x15a   : > { %515 = vmax.xlane.f32.xlu1 %v4827_v24 }
 0x15b   : > { %v4835_v27 = vpop.f32.mrf.mxu0 }
 0x15d   : > { %v4838_v28 = vpop.f32.mrf.mxu0 }
 0x15e   : > { %1035 = vrot.lane.b32.xlu0 %v4122_v25, %s4579_s21  ;;  %525 = vmax.xlane.f32.xlu1 %v4831_v26 }
 0x15f   : > { %v4841_v29 = vpop.f32.mrf.mxu0 }
 0x162   : > { %521 = vmax.xlane.f32.xlu1 %v4835_v27 }
 0x166   : > { %527 = vmax.xlane.f32.xlu1 %v4838_v28 }
 0x16a   : > { %523 = vmax.xlane.f32.xlu1 %v4841_v29 }
 0x17b   : > { %1033 = vrot.lane.b32.xlu1 %v4131_v30, %s4579_s21 }
 0x17d   : > { %517 = vmax.xlane.f32.xlu0 %v4819_v21 }
 0x17f   : > { %973 = vrot.lane.b32.xlu1 %v4766_v37, %s4579_s21 }
 0x181   : > { %513 = vmax.xlane.f32.xlu0 %v4822_v22 }
 0x183   : > { %977 = vrot.lane.b32.xlu1 %v4776_v49, %s4579_s21 }
 0x185   : > { %519 = vmax.xlane.f32.xlu0 %v4824_v23 }
 0x187   : > { %981 = vrot.lane.b32.xlu1 %v4785_v60, %s4579_s21 }
 0x18b   : > { %985 = vrot.lane.b32.xlu1 %v4793_v2, %s4579_s21 }
 0x19b   : > { %1031 = vrot.lane.b32.xlu0 %v4132_v31, %s4579_s21 }
 0x19f   : > { %1029 = vrot.lane.b32.xlu0 %v4133_v32, %s4579_s21 }
 0x1a3   : > { %1027 = vrot.lane.b32.xlu0 %v4134_v33, %s4579_s21 }
 0x1a7   : > { %971 = vrot.lane.b32.xlu0 %v4736_v10, %s4579_s21 }
 0x1ab   : > { %975 = vrot.lane.b32.xlu0 %v4768_v40, %s4579_s21 }
 0x1af   : > { %979 = vrot.lane.b32.xlu0 %v4778_v52, %s4579_s21 }
 0x1b3   : > { %983 = vrot.lane.b32.xlu0 %v4787_v63, %s4579_s21 }
 0x1cb   : > { %v502_v36 = vpop.xlane.xlu1 %501 }
 0x1cc   : > { %v531_v41 = vsub.f32 %v3766_v13, %v502_v36 }
 0x1cd   : > { %v498_v38 = vpop.xlane.xlu0 %497 }
 0x1ce   : > { %v529_v39 = vsub.f32 %v434_v14, %v498_v38  ;;  %v549_v48 = vmul.f32 1.442695, %v531_v41  ;;  %v1086_v14 = vsel %vm351_vm0, %v1040_v34, 0 }
 0x1cf   : > { %v504_v42 = vpop.xlane.xlu1 %503 }
 0x1d0   : > { %v545_v43 = vmul.f32 1.442695, %v529_v39  ;;  %v532_v44 = vsub.f32 %v3767_v15, %v504_v42 }
 0x1d1   : > { %v500_v45 = vpop.xlane.xlu0 %499 }
 0x1d2   : > { %v551_v46 = vmul.f32 1.442695, %v532_v44  ;;  %v530_v47 = vsub.f32 %v437_v16, %v500_v45  ;;  %4175 = vpow2.f32 %v545_v43 }
 0x1d3   : > { %v510_v50 = vpop.xlane.xlu1 %509 }
 0x1d4   : > { %v547_v51 = vmul.f32 1.442695, %v530_v47  ;;  %4177 = vpow2.f32 %v551_v46  ;;  %v535_v57 = vsub.f32 %v4809_v17, %v510_v50 }
 0x1d5   : > { %v1036_v25 = vpop.permute.xlu0 %1035 }
 0x1d6   : > { %4179 = vpow2.f32 %v547_v51  ;;  %v557_v0 = vmul.f32 1.442695, %v535_v57  ;;  %v1080_v32 = vsel %vm351_vm0, %v1036_v25, 0 }
 0x1d7   : > { %4181 = vpow2.f32 %v549_v48  ;;  %v506_v53 = vpop.xlane.xlu1 %505 }
 0x1d8   : > { %v533_v54 = vsub.f32 %v4812_v18, %v506_v53 }
 0x1da   : > { %v553_v58 = vmul.f32 1.442695, %v533_v54 }
 0x1db   : > { %v512_v55 = vpop.xlane.xlu1 %511 }
 0x1dc   : > { %v536_v56 = vsub.f32 %v4814_v19, %v512_v55  ;;  %4183 = vpow2.f32 %v553_v58 }
 0x1de   : > { %v559_v59 = vmul.f32 1.442695, %v536_v56 }
 0x1df   : > { %v508_v61 = vpop.xlane.xlu1 %507  ;;  %v4875_v63 = vpop.eup %4175 }
 0x1e0   : > { %v534_v62 = vsub.f32 %v4817_v20, %v508_v61  ;;  %4185 = vpow2.f32 %v559_v59  ;;  %v1083_v20 = vsel %vm351_vm0, %v1038_v35, 0 }
 0x1e1   : > { %v4877_v1 = vpop.eup %4177 }
 0x1e2   : > { %6005 = vst [vmem:[#allocation11_spill] sm:$0xff] %v4877_v1  ;;  %v555_v2 = vmul.f32 1.442695, %v534_v62 }
 0x1e3   : > { %v4879_v3 = vpop.eup %4179  ;;  %v516_v4 = vpop.xlane.xlu1 %515 }
 0x1e4   : > { %6006 = vst [vmem:[#allocation12_spill] sm:$0xff] %v4879_v3  ;;  %v4881_v5 = vpop.eup %4181  ;;  %4187 = vpow2.f32 %v555_v2  ;;  %v609_v6 = vpack.c.bf16 %v4879_v3, %v4875_v63 }
 0x1e5   : > { %4189 = vpow2.f32 %v557_v0  ;;  %v610_v7 = vpack.c.bf16 %v4877_v1, %v4881_v5 }
 0x1e6   : > { %3796 = vmatprep.mubr.bf16.mxu1 %v609_v6 }
 0x1e7   : > { %3797 = vmatmul.mubr.bf16.vlgmr.msra.gmra.mxu1 %v610_v7  ;;  %v526_v9 = vpop.xlane.xlu1 %525 }
 0x1e8   : > { %3813 = vmatpush3.bf16.xpose.msra.mxu1 %v1089_v8  ;;  %v543_v51 = vsub.f32 %v4831_v26, %v526_v9 }
 0x1e9   : > { %4013 = vmatprep.subr.msk.bf16.mxu1 %vm351_vm0, %v1040_v34  ;;  %v4890_v13 = vpop.eup %4183  ;;  %v538_v34 = vsub.f32 %v4827_v24, %v516_v4 }
 0x1ea   : > { %v573_v54 = vmul.f32 1.442695, %v543_v51 }
 0x1eb   : > { %v522_v11 = vpop.xlane.xlu1 %521 }
 0x1ec   : > { %v541_v43 = vsub.f32 %v4835_v27, %v522_v11 }
 0x1ed   : > { %v4893_v15 = vpop.eup %4185 }
 0x1ee   : > { %6007 = vst [vmem:[#allocation13_spill] sm:$0xff] %v4893_v15  ;;  %v569_v48 = vmul.f32 1.442695, %v541_v43 }
 0x1ef   : > { %v528_v19 = vpop.xlane.xlu1 %527 }
 0x1f0   : > { %3815 = vmatpush3.bf16.xpose.msra.mxu1 %v1086_v14  ;;  %v544_v50 = vsub.f32 %v4838_v28, %v528_v19  ;;  %v4136_v19 = vld [vmem:[%s4721_s29 + $0x64] ss:$8 sps:$4 sm:$0xff]  }
 0x1f1   : > { %v4895_v16 = vpop.eup %4187  ;;  %4014 = vmatprep.subr.msk.bf16.mxu1 %vm351_vm0, %v1038_v35  ;;  %v563_v35 = vmul.f32 1.442695, %v538_v34  ;;  %1360 = vrot.lane.b32.xlu1 %v4136_v19, %s4579_s21  ;;  %v4140_v34 = vld [vmem:[%s4721_s29 + $0x34] ss:$8 sps:$4 sm:$0xff]   ;;  %v4145_v19 = vld [vmem:[%s4721_s29 + $0x40] ss:$8 sps:$4 sm:$0xff]  }
 0x1f2   : > { %6008 = vst [vmem:[#allocation14_spill] sm:$0xff] %v4895_v16  ;;  %v4898_v17 = vpop.eup %4189  ;;  %v611_v12 = vpack.c.bf16 %v4895_v16, %v4890_v13  ;;  %v575_v27 = vmul.f32 1.442695, %v544_v50 }
 0x1f3   : > { %v612_v18 = vpack.c.bf16 %v4893_v15, %v4898_v17  ;;  %v524_v30 = vpop.xlane.xlu1 %523  ;;  %4191 = vpow2.f32 %v563_v35 }
 0x1f4   : > { %3800 = vmatprep.mubr.bf16.mxu1 %v611_v12  ;;  %v542_v38 = vsub.f32 %v4841_v29, %v524_v30  ;;  %v4135_v12 = vld [vmem:[%s4721_s29 + $0x74] ss:$8 sps:$4 sm:$0xff]   ;;  %v4138_v30 = vld [vmem:[%s4721_s29 + $0x44] ss:$8 sps:$4 sm:$0xff]  }
 0x1f5   : > { %3801 = vmatmul.mubr.bf16.gmra.mxu1 %v612_v18  ;;  %1362 = vrot.lane.b32.xlu0 %v4135_v12, %s4579_s21 }
 0x1f6   : > { %v571_v44 = vmul.f32 1.442695, %v542_v38  ;;  %v4143_v38 = vld [vmem:[%s4721_s29 + $0x14] ss:$8 sps:$4 sm:$0xff]  }
 0x1f7   : > { %v1034_v31 = vpop.permute.xlu1 %1033 }
 0x1f8   : > { %3817 = vmatpush3.bf16.xpose.msra.mxu1 %v1083_v20  ;;  %v1077_v33 = vsel %vm351_vm0, %v1034_v31, 0  ;;  %v4137_v20 = vld [vmem:[%s4721_s29 + $0x54] ss:$8 sps:$4 sm:$0xff]  }
 0x1f9   : > { %4015 = vmatprep.subr.msk.bf16.mxu1 %vm351_vm0, %v1036_v25  ;;  %v4139_v25 = vld [vmem:[%s4721_s29 + $0x24] ss:$8 sps:$4 sm:$0xff]   ;;  %1358 = vrot.lane.b32.xlu0 %v4137_v20, %s4579_s21  ;;  %v4146_v20 = vld [vmem:[%s4721_s29 + $0x50] ss:$8 sps:$4 sm:$0xff]  }
 0x1fa   : > { %1352 = vrot.lane.b32.xlu1 %v4139_v25, %s4579_s21 }
 0x1fb   : > { %v974_v9 = vpop.permute.xlu1 %973 }
 0x1fd   : > { %1356 = vrot.lane.b32.xlu0 %v4138_v30, %s4579_s21  ;;  %v4147_v30 = vld [vmem:[%s4721_s29 + $0x30] ss:$8 sps:$4 sm:$0xff]  }
 0x1ff   : > { %v978_v14 = vpop.permute.xlu1 %977 }
 0x200   : > { %3819 = vmatpush3.bf16.xpose.msra.mxu1 %v1080_v32  ;;  %v4921_v55 = vpop.eup %4191 }
 0x201   : > { %4016 = vmatprep.subr.msk.bf16.mxu1 %vm351_vm0, %v1034_v31  ;;  %6009 = vst [vmem:[#allocation15_spill] sm:$0xff] %v4921_v55  ;;  %1354 = vrot.lane.b32.xlu0 %v4140_v34, %s4579_s21 }
 0x203   : > { %v982_v31 = vpop.permute.xlu1 %981 }
 0x205   : > { %1350 = vrot.lane.b32.xlu0 %v4143_v38, %s4579_s21 }
 0x206   : > { %v518_v36 = vpop.xlane.xlu0 %517 }
 0x207   : > { %v539_v39 = vsub.f32 %v4819_v21, %v518_v36  ;;  %v4142_v36 = vld [vmem:[%s4721_s29 + $0x60] ss:$8 sps:$4 sm:$0xff]   ;;  %v986_v35 = vpop.permute.xlu1 %985 }
 0x208   : > { %3821 = vmatpush3.bf16.xpose.msra.mxu1 %v1077_v33  ;;  %v4141_v33 = vld [vmem:[%s4721_s29 + $0x4] ss:$8 sps:$4 sm:$0xff]  }
 0x209   : > { %v565_v46 = vmul.f32 1.442695, %v539_v39  ;;  %1348 = vrot.lane.b32.xlu1 %v4141_v33, %s4579_s21  ;;  %v4144_v39 = vld [vmem:[%s4721_s29 + $0x70] ss:$8 sps:$4 sm:$0xff]  }
 0x20a   : > { %v514_v41 = vpop.xlane.xlu0 %513  ;;  %1780 = vrot.lane.b32.xlu0 %v4144_v39, %s4580_s3 }
 0x20b   : > { %v537_v42 = vsub.f32 %v4822_v22, %v514_v41 }
 0x20d   : > { %v561_v45 = vmul.f32 1.442695, %v537_v42  ;;  %1778 = vrot.lane.b32.xlu1 %v4142_v36, %s4580_s3 }
 0x20e   : > { %v520_v47 = vpop.xlane.xlu0 %519 }
 0x20f   : > { %4193 = vpow2.f32 %v561_v45  ;;  %v540_v24 = vsub.f32 %v4824_v23, %v520_v47 }
 0x210   : > { %4195 = vpow2.f32 %v571_v44 }
 0x211   : > { %v567_v29 = vmul.f32 1.442695, %v540_v24  ;;  %4197 = vpow2.f32 %v565_v46 }
 0x212   : > { %v1032_v21 = vpop.permute.xlu0 %1031 }
 0x213   : > { %4199 = vpow2.f32 %v567_v29  ;;  %4017 = vmatprep.subr.msk.bf16.mxu1 %vm351_vm0, %v1032_v21  ;;  %v1074_v22 = vsel %vm351_vm0, %v1032_v21, 0 }
 0x214   : > { %4201 = vpow2.f32 %v569_v48  ;;  %3823 = vmatpush3.bf16.xpose.msra.mxu1 %v1074_v22 }
 0x215   : > { %4203 = vpow2.f32 %v575_v27 }
 0x216   : > { %v1030_v53 = vpop.permute.xlu0 %1029  ;;  %4205 = vpow2.f32 %v573_v54 }
 0x217   : > { %4018 = vmatprep.subr.msk.bf16.mxu1 %vm351_vm0, %v1030_v53  ;;  %v1071_v23 = vsel %vm351_vm0, %v1030_v53, 0 }
 0x21a   : > { %v1028_v28 = vpop.permute.xlu0 %1027 }
 0x21b   : > { %v1068_v0 = vsel %vm351_vm0, %v1028_v28, 0 }
 0x21c   : > { %v4923_v26 = vpop.eup %4193  ;;  %3825 = vmatpush3.bf16.xpose.msra.mxu1 %v1071_v23 }
 0x21d   : > { %v613_v56 = vpack.c.bf16 %v4921_v55, %v4923_v26  ;;  %4019 = vmatprep.subr.msk.bf16.mxu1 %vm351_vm0, %v1028_v28  ;;  %v4928_v57 = vpop.eup %4195 }
 0x21e   : > { %6010 = vst [vmem:[#allocation16_spill] sm:$0xff] %v4928_v57  ;;  %v4930_v58 = vpop.eup %4197  ;;  %v972_v8 = vpop.permute.xlu0 %971 }
 0x21f   : > { %6011 = vst [vmem:[#allocation17_spill] sm:$0xff] %v4930_v58  ;;  %3804 = vmatprep.mubr.bf16.mxu1 %v613_v56 }
 0x220   : > { %v4932_v59 = vpop.eup %4199 }
 0x221   : > { %6012 = vst [vmem:[#allocation18_spill] sm:$0xff] %v4932_v59  ;;  %v4934_v61 = vpop.eup %4201  ;;  %v614_v62 = vpack.c.bf16 %v4932_v59, %v4930_v58 }
 0x222   : > { %6013 = vst [vmem:[#allocation19_spill] sm:$0xff] %v4934_v61  ;;  %v615_v2 = vpack.c.bf16 %v4928_v57, %v4934_v61  ;;  %v4941_v4 = vpop.eup %4203  ;;  %v976_v11 = vpop.permute.xlu0 %975 }
 0x223   : > { %3805 = vmatmul.mubr.bf16.gmra.mxu1 %v614_v62  ;;  %6014 = vst [vmem:[#allocation20_spill] sm:$0xff] %v4941_v4  ;;  %v4943_v6 = vpop.eup %4205 }
 0x224   : > { %3808 = vmatprep.mubr.bf16.mxu1 %v615_v2  ;;  %3827 = vmatpush3.bf16.xpose.msra.mxu1 %v1068_v0  ;;  %6015 = vst [vmem:[#allocation21_spill] sm:$0xff] %v4943_v6  ;;  %v616_v7 = vpack.c.bf16 %v4941_v4, %v4943_v6  ;;  %v3615_v4 = vld [vmem:[%s4713_s28 + $0x18] sm:$0xff]   ;;  %v3617_v6 = vld [vmem:[%s4713_s28 + $0x28] sm:$0xff]  }
 0x225   : > { %v3575_v3 = vunpack.c.h.bf16 %v3615_v4 }
 0x226   : > { %v980_v18 = vpop.permute.xlu0 %979 }
 0x22a   : > { %v984_v32 = vpop.permute.xlu0 %983 }
 0x22b   : > { %3809 = vmatmul.mubr.bf16.gmra.mxu1 %v616_v7 }
 0x22c   : > { %3828 = vmatprep.mubr.msk.bf16.mxu1 %vm351_vm0, %v972_v8 }
 0x233   : > { %3829 = vmatmul.mubr.msk.bf16.vlgmr.msra.gmra.mxu1 %vm351_vm0, %v974_v9 }
 0x234   : > { %3832 = vmatprep.mubr.msk.bf16.mxu1 %vm351_vm0, %v976_v11 }
 0x23b   : > { %3833 = vmatmul.mubr.msk.bf16.gmra.mxu1 %vm351_vm0, %v978_v14 }
 0x23c   : > { %3836 = vmatprep.mubr.msk.bf16.mxu1 %vm351_vm0, %v980_v18 }
 0x243   : > { %3837 = vmatmul.mubr.msk.bf16.gmra.mxu1 %vm351_vm0, %v982_v31 }
 0x244   : > { %3840 = vmatprep.mubr.msk.bf16.mxu1 %vm351_vm0, %v984_v32 }
 0x24b   : > { %3841 = vmatmul.mubr.msk.bf16.gmra.mxu1 %vm351_vm0, %v986_v35 }
 0x263   : > { %v1361_v42 = vpop.permute.xlu1 %1360 }
 0x267   : > { %v1363_v41 = vpop.permute.xlu0 %1362 }
 0x268   : > { %3844 = vmatprep.subr.bf16.mxu0 %v1363_v41 }
 0x269   : > { %3845 = vmatpush3.bf16.msra.mxu0 %v1363_v41 }
 0x26a   : > { %3846 = vmatprep.subr.bf16.mxu0 %v1361_v42 }
 0x26b   : > { %v1359_v43 = vpop.permute.xlu0 %1358 }
 0x26c   : > { %v1353_v46 = vpop.permute.xlu1 %1352 }
 0x26d   : > { %3847 = vmatpush3.bf16.msra.mxu0 %v1361_v42 }
 0x26e   : > { %3848 = vmatprep.subr.bf16.mxu0 %v1359_v43 }
 0x26f   : > { %v1357_v44 = vpop.permute.xlu0 %1356 }
 0x271   : > { %3849 = vmatpush3.bf16.msra.mxu0 %v1359_v43  ;;  %v4148_v43 = vld [vmem:[%s4721_s29 + $0x20] ss:$8 sps:$4 sm:$0xff]  }
 0x272   : > { %3850 = vmatprep.subr.bf16.mxu0 %v1357_v44 }
 0x273   : > { %v1355_v45 = vpop.permute.xlu0 %1354 }
 0x275   : > { %3851 = vmatpush3.bf16.msra.mxu0 %v1357_v44  ;;  %v3612_v44 = vld [vmem:[%s4713_s28 + $0x38] sm:$0xff]  }
 0x276   : > { %3852 = vmatprep.subr.bf16.mxu0 %v1355_v45 }
 0x277   : > { %v1351_v47 = vpop.permute.xlu0 %1350 }
 0x279   : > { %3853 = vmatpush3.bf16.msra.mxu0 %v1355_v45  ;;  %v3558_v45 = vunpack.c.l.bf16 %v3612_v44 }
 0x27a   : > { %3854 = vmatprep.subr.bf16.mxu0 %v1353_v46 }
 0x27b   : > { %v1349_v48 = vpop.permute.xlu1 %1348 }
 0x27c   : > { %v4977_v50 = vpop.permute.xlu0 %1780 }
 0x27d   : > { %3855 = vmatpush3.bf16.msra.mxu0 %v1353_v46  ;;  %v3559_v46 = vunpack.c.h.bf16 %v3612_v44 }
 0x27e   : > { %3856 = vmatprep.subr.bf16.mxu0 %v1351_v47 }
 0x27f   : > { %v1779_v44 = vpop.permute.xlu1 %1778 }
 0x281   : > { %3857 = vmatpush3.bf16.msra.mxu0 %v1351_v47  ;;  %v1660_v47 = vmul.f32 0.17677669, %v3558_v45 }
 0x282   : > { %3858 = vmatprep.subr.bf16.mxu0 %v1349_v48 }
 0x285   : > { %3859 = vmatpush3.bf16.msra.mxu0 %v1349_v48  ;;  %v1661_v48 = vmul.f32 0.17677669, %v3559_v46 }
 0x286   : > { %4020 = vmatprep.subr.msk.bf16.mxu0 %vm351_vm0, %v4977_v50 }
 0x2a7   : > { %v4975_v24 = vpop.f32.mrf.mxu1 }
 0x2a8   : > { %6016 = vst [vmem:[#allocation22_spill] sm:$0xff] %v4975_v24 }
 0x2a9   : > { %v4979_v29 = vpop.f32.mrf.mxu1 }
 0x2aa   : > { %6017 = vst [vmem:[#allocation23_spill] sm:$0xff] %v4979_v29  ;;  %v3613_v29 = vld [vmem:[%s4713_s28 + $0x8] sm:$0xff]  }
 0x2ab   : > { %v4983_v21 = vpop.f32.mrf.mxu1 }
 0x2ac   : > { %6018 = vst [vmem:[#allocation24_spill] sm:$0xff] %v4983_v21 }
 0x2ad   : > { %v4985_v51 = vpop.f32.mrf.mxu1 }
 0x2ae   : > { %6019 = vst [vmem:[#allocation25_spill] sm:$0xff] %v4985_v51 }
 0x2b5   : > { %v4987_v22 = vpop.f32.mrf.mxu1 }
 0x2b6   : > { %6020 = vst [vmem:[#allocation26_spill] sm:$0xff] %v4987_v22 }
 0x2b7   : > { %v4989_v27 = vpop.f32.mrf.mxu1 }
 0x2b8   : > { %6021 = vst [vmem:[#allocation27_spill] sm:$0xff] %v4989_v27  ;;  %v4164_v27 = vld [vmem:[%s4721_s29 + $0x30] ss:$8 sps:$4 sm:$0xff]  }
 0x2b9   : > { %v4991_v53 = vpop.f32.mrf.mxu1 }
 0x2ba   : > { %6022 = vst [vmem:[#allocation28_spill] sm:$0xff] %v4991_v53 }
 0x2bb   : > { %v4993_v54 = vpop.f32.mrf.mxu1 }
 0x2bc   : > { %6023 = vst [vmem:[#allocation29_spill] sm:$0xff] %v4993_v54 }
 0x2e3   : > { %v4995_v23 = vpop.f32.mrf.mxu1 }
 0x2e4   : > { %6024 = vst [vmem:[#allocation30_spill] sm:$0xff] %v4995_v23 }
 0x2e5   : > { %v4997_v28 = vpop.f32.mrf.mxu1 }
 0x2e6   : > { %6025 = vst [vmem:[#allocation31_spill] sm:$0xff] %v4997_v28 }
 0x2e7   : > { %v4999_v56 = vpop.f32.mrf.mxu1 }
 0x2e8   : > { %6026 = vst [vmem:[#allocation32_spill] sm:$0xff] %v4999_v56 }
 0x2e9   : > { %v5001_v62 = vpop.f32.mrf.mxu1 }
 0x2ea   : > { %6027 = vst [vmem:[#allocation33_spill] sm:$0xff] %v5001_v62 }
 0x2eb   : > { %v5003_v0 = vpop.f32.mrf.mxu1 }
 0x2ec   : > { %6028 = vst [vmem:[#allocation34_spill] sm:$0xff] %v5003_v0 }
 0x2ed   : > { %v5005_v2 = vpop.f32.mrf.mxu1 }
 0x2ee   : > { %6029 = vst [vmem:[#allocation35_spill] sm:$0xff] %v5005_v2 }
 0x2ef   : > { %v5007_v7 = vpop.f32.mrf.mxu1 }
 0x2f0   : > { %6030 = vst [vmem:[#allocation36_spill] sm:$0xff] %v5007_v7 }
 0x2f1   : > { %v5009_v8 = vpop.f32.mrf.mxu1 }
 0x2f2   : > { %6031 = vst [vmem:[#allocation37_spill] sm:$0xff] %v5009_v8 }
 0x2f3   : > { %v5011_v9 = vpop.f32.mrf.mxu1 }
 0x2f4   : > { %1192 = vmax.xlane.f32.xlu1 %v5011_v9 }
 0x2f5   : > { %v5014_v11 = vpop.f32.mrf.mxu1 }
 0x2f6   : > { %1188 = vmax.xlane.f32.xlu0 %v5014_v11 }
 0x2f7   : > { %v5017_v14 = vpop.f32.mrf.mxu1 }
 0x2f8   : > { %1194 = vmax.xlane.f32.xlu1 %v5017_v14 }
 0x2f9   : > { %v5020_v12 = vpop.f32.mrf.mxu1 }
 0x2fb   : > { %v5023_v18 = vpop.f32.mrf.mxu1 }
 0x2fc   : > { %1190 = vmax.xlane.f32.xlu1 %v5020_v12 }
 0x2fd   : > { %v5027_v25 = vpop.f32.mrf.mxu1 }
 0x2ff   : > { %v5032_v31 = vpop.f32.mrf.mxu1 }
 0x301   : > { %v5035_v32 = vpop.f32.mrf.mxu1 }
 0x303   : > { %v5037_v33 = vpop.f32.mrf.mxu1 }
 0x305   : > { %v5039_v34 = vpop.f32.mrf.mxu1 }
 0x307   : > { %v5041_v36 = vpop.f32.mrf.mxu1 }
 0x309   : > { %v5043_v38 = vpop.f32.mrf.mxu1 }
 0x30b   : > { %v5045_v35 = vpop.f32.mrf.mxu1 }
 0x30c   : > { %1774 = vrot.lane.b32.xlu0 %v4145_v19, %s4580_s3  ;;  %v5070_v19 = vpack.c.bf16 %v1661_v48, %v1660_v47 }
 0x30d   : > { %1776 = vrot.lane.b32.xlu1 %v4146_v20, %s4580_s3  ;;  %v5047_v39 = vpop.f32.mrf.mxu1  ;;  %v4149_v20 = vld [vmem:[%s4721_s29 + $0x10] ss:$8 sps:$4 sm:$0xff]  }
 0x30f   : > { %v5049_v41 = vpop.f32.mrf.mxu1 }
 0x310   : > { %1772 = vrot.lane.b32.xlu0 %v4147_v30, %s4580_s3  ;;  %v3611_v30 = vld [vmem:[%s4713_s28 + $0x30] sm:$0xff]  }
 0x311   : > { %v5053_v42 = vpop.f32.mrf.mxu1 }
 0x32f   : > { %1200 = vmax.xlane.f32.xlu0 %v5023_v18 }
 0x331   : > { %1196 = vmax.xlane.f32.xlu1 %v5027_v25 }
 0x333   : > { %1202 = vmax.xlane.f32.xlu0 %v5032_v31 }
 0x335   : > { %1214 = vmax.xlane.f32.xlu1 %v5053_v42 }
 0x337   : > { %1198 = vmax.xlane.f32.xlu0 %v5035_v32 }
 0x33b   : > { %1208 = vmax.xlane.f32.xlu0 %v5037_v33 }
 0x33f   : > { %1204 = vmax.xlane.f32.xlu0 %v5039_v34 }
 0x343   : > { %1210 = vmax.xlane.f32.xlu0 %v5041_v36 }
 0x346   : > { %1770 = vrot.lane.b32.xlu1 %v4148_v43, %s4580_s3  ;;  %v3555_v43 = vunpack.c.h.bf16 %v3611_v30 }
 0x347   : > { %1206 = vmax.xlane.f32.xlu0 %v5043_v38 }
 0x348   : > { %v1659_v46 = vmul.f32 0.17677669, %v3555_v43 }
 0x34a   : > { %1716 = vrot.lane.b32.xlu1 %v4776_v49, %s4580_s3  ;;  %v4150_v49 = vld [vmem:[%s4721_s29] ss:$8 sps:$4 sm:$0xff]  }
 0x34b   : > { %1216 = vmax.xlane.f32.xlu0 %v5045_v35 }
 0x34e   : > { %1720 = vrot.lane.b32.xlu1 %v4785_v60, %s4580_s3  ;;  %v3554_v60 = vunpack.c.l.bf16 %v3611_v30 }
 0x34f   : > { %1212 = vmax.xlane.f32.xlu0 %v5047_v39 }
 0x350   : > { %v1658_v45 = vmul.f32 0.17677669, %v3554_v60 }
 0x352   : > { %1724 = vrot.lane.b32.xlu1 %v5070_v19, %s4580_s3  ;;  %v5089_v48 = vpack.c.bf16 %v1659_v46, %v1658_v45 }
 0x353   : > { %1218 = vmax.xlane.f32.xlu0 %v5049_v41 }
 0x369   : > { %1768 = vrot.lane.b32.xlu0 %v4149_v20, %s4580_s3 }
 0x36d   : > { %1766 = vrot.lane.b32.xlu0 %v4150_v49, %s4580_s3 }
 0x371   : > { %1710 = vrot.lane.b32.xlu0 %v4736_v10, %s4580_s3 }
 0x375   : > { %1712 = vrot.lane.b32.xlu0 %v4766_v37, %s4580_s3 }
 0x379   : > { %1714 = vrot.lane.b32.xlu0 %v4768_v40, %s4580_s3 }
 0x37d   : > { %v1193_v47 = vpop.xlane.xlu1 %1192  ;;  %1718 = vrot.lane.b32.xlu0 %v4778_v52, %s4580_s3 }
 0x37e   : > { %v1222_v30 = vsub.f32 %v5011_v9, %v1193_v47 }
 0x37f   : > { %v1189_v20 = vpop.xlane.xlu0 %1188 }
 0x380   : > { %v1220_v10 = vsub.f32 %v5014_v11, %v1189_v20  ;;  %v1240_v8 = vmul.f32 1.442695, %v1222_v30 }
 0x381   : > { %v1195_v49 = vpop.xlane.xlu1 %1194  ;;  %1722 = vrot.lane.b32.xlu0 %v5089_v48, %s4580_s3 }
 0x382   : > { %v1223_v37 = vsub.f32 %v5017_v14, %v1195_v49  ;;  %v1236_v40 = vmul.f32 1.442695, %v1220_v10 }
 0x383   : > { %v1775_v10 = vpop.permute.xlu0 %1774 }
 0x384   : > { %v1242_v60 = vmul.f32 1.442695, %v1223_v37  ;;  %4207 = vpow2.f32 %v1236_v40  ;;  %v1819_v49 = vsel %vm351_vm0, %v1775_v10, 0 }
 0x385   : > { %v1191_v43 = vpop.xlane.xlu1 %1190 }
 0x386   : > { %v1221_v7 = vsub.f32 %v5020_v12, %v1191_v43  ;;  %4209 = vpow2.f32 %v1242_v60 }
 0x387   : > { %v1773_v37 = vpop.permute.xlu0 %1772 }
 0x388   : > { %v1238_v52 = vmul.f32 1.442695, %v1221_v7  ;;  %v1828_v7 = vsel %vm351_vm0, %v4977_v50, 0  ;;  %v1816_v40 = vsel %vm351_vm0, %v1773_v37, 0 }
 0x389   : > { %v1777_v47 = vpop.permute.xlu1 %1776 }
 0x38a   : > { %4211 = vpow2.f32 %v1238_v52  ;;  %v1822_v20 = vsel %vm351_vm0, %v1777_v47, 0 }
 0x38b   : > { %4213 = vpow2.f32 %v1240_v8  ;;  %v1825_v8 = vsel %vm351_vm0, %v1779_v44, 0 }
 0x391   : > { %v5097_v11 = vpop.eup %4207 }
 0x393   : > { %v5099_v45 = vpop.eup %4209 }
 0x397   : > { %v5101_v46 = vpop.eup %4211 }
 0x398   : > { %v5103_v14 = vpop.eup %4213  ;;  %v1300_v9 = vpack.c.bf16 %v5101_v46, %v5097_v11 }
 0x399   : > { %v1301_v12 = vpack.c.bf16 %v5099_v45, %v5103_v14 }
 0x39a   : > { %3860 = vmatprep.mubr.bf16.mxu0 %v1300_v9 }
 0x39b   : > { %3861 = vmatmul.mubr.bf16.vlgmr.msra.gmra.mxu0 %v1301_v12 }
 0x39c   : > { %3877 = vmatpush3.bf16.xpose.msra.mxu0 %v1828_v7 }
 0x39d   : > { %4021 = vmatprep.subr.msk.bf16.mxu0 %vm351_vm0, %v1779_v44 }
 0x3a4   : > { %3879 = vmatpush3.bf16.xpose.msra.mxu0 %v1825_v8 }
 0x3a5   : > { %4022 = vmatprep.subr.msk.bf16.mxu0 %vm351_vm0, %v1777_v47 }
 0x3ac   : > { %3881 = vmatpush3.bf16.xpose.msra.mxu0 %v1822_v20 }
 0x3ad   : > { %4023 = vmatprep.subr.msk.bf16.mxu0 %vm351_vm0, %v1775_v10 }
 0x3b4   : > { %3883 = vmatpush3.bf16.xpose.msra.mxu0 %v1819_v49 }
 0x3b5   : > { %4024 = vmatprep.subr.msk.bf16.mxu0 %vm351_vm0, %v1773_v37 }
 0x3b8   : > { %v1201_v50 = vpop.xlane.xlu0 %1200 }
 0x3b9   : > { %v1226_v52 = vsub.f32 %v5023_v18, %v1201_v50 }
 0x3ba   : > { %v1197_v30 = vpop.xlane.xlu1 %1196 }
 0x3bb   : > { %v1224_v44 = vsub.f32 %v5027_v25, %v1197_v30  ;;  %v1248_v20 = vmul.f32 1.442695, %v1226_v52 }
 0x3bc   : > { %3885 = vmatpush3.bf16.xpose.msra.mxu0 %v1816_v40  ;;  %v1203_v60 = vpop.xlane.xlu0 %1202 }
 0x3bd   : > { %v1227_v43 = vsub.f32 %v5032_v31, %v1203_v60  ;;  %v1244_v12 = vmul.f32 1.442695, %v1224_v44 }
 0x3be   : > { %v1215_v9 = vpop.xlane.xlu1 %1214 }
 0x3bf   : > { %v1250_v7 = vmul.f32 1.442695, %v1227_v43  ;;  %4215 = vpow2.f32 %v1244_v12 }
 0x3c0   : > { %v1199_v8 = vpop.xlane.xlu0 %1198 }
 0x3c1   : > { %v1225_v47 = vsub.f32 %v5035_v32, %v1199_v8  ;;  %4217 = vpow2.f32 %v1250_v7 }
 0x3c2   : > { %v1771_v10 = vpop.permute.xlu1 %1770 }
 0x3c3   : > { %v1246_v49 = vmul.f32 1.442695, %v1225_v47  ;;  %4025 = vmatprep.subr.msk.bf16.mxu0 %vm351_vm0, %v1771_v10  ;;  %v1813_v25 = vsel %vm351_vm0, %v1771_v10, 0 }
 0x3c4   : > { %v1209_v37 = vpop.xlane.xlu0 %1208  ;;  %3887 = vmatpush3.bf16.xpose.msra.mxu0 %v1813_v25 }
 0x3c5   : > { %4219 = vpow2.f32 %v1246_v49  ;;  %v1230_v32 = vsub.f32 %v5037_v33, %v1209_v37  ;;  %v1233_v33 = vsub.f32 %v5053_v42, %v1215_v9 }
 0x3c6   : > { %4221 = vpow2.f32 %v1248_v20 }
 0x3c7   : > { %v1256_v8 = vmul.f32 1.442695, %v1230_v32 }
 0x3c8   : > { %v1205_v18 = vpop.xlane.xlu0 %1204 }
 0x3c9   : > { %v1228_v31 = vsub.f32 %v5039_v34, %v1205_v18 }
 0x3cb   : > { %v1252_v44 = vmul.f32 1.442695, %v1228_v31 }
 0x3cc   : > { %v1211_v50 = vpop.xlane.xlu0 %1210  ;;  %v5128_v40 = vpop.eup %4215 }
 0x3cd   : > { %v1231_v30 = vsub.f32 %v5041_v36, %v1211_v50  ;;  %4223 = vpow2.f32 %v1252_v44  ;;  %v4151_v44 = vld [vmem:[%s4721_s29 + $0x74] ss:$8 sps:$4 sm:$0xff]  }
 0x3ce   : > { %v5130_v52 = vpop.eup %4217  ;;  %2101 = vrot.lane.b32.xlu0 %v4151_v44, %s4580_s3 }
 0x3cf   : > { %v1258_v60 = vmul.f32 1.442695, %v1231_v30 }
 0x3d0   : > { %v1207_v43 = vpop.xlane.xlu0 %1206 }
 0x3d1   : > { %v1229_v12 = vsub.f32 %v5043_v38, %v1207_v43  ;;  %4225 = vpow2.f32 %v1258_v60  ;;  %v1262_v38 = vmul.f32 1.442695, %v1233_v33  ;;  %v4152_v60 = vld [vmem:[%s4721_s29 + $0x64] ss:$8 sps:$4 sm:$0xff]  }
 0x3d2   : > { %v5133_v7 = vpop.eup %4219  ;;  %2099 = vrot.lane.b32.xlu1 %v4152_v60, %s4580_s3  ;;  %v4159_v60 = vld [vmem:[%s4721_s29 + $0x70] ss:$8 sps:$4 sm:$0xff]  }
 0x3d3   : > { %v5135_v47 = vpop.eup %4221  ;;  %v1254_v34 = vmul.f32 1.442695, %v1229_v12  ;;  %v1302_v36 = vpack.c.bf16 %v5133_v7, %v5128_v40 }
 0x3d4   : > { %v1217_v20 = vpop.xlane.xlu0 %1216  ;;  %v1303_v10 = vpack.c.bf16 %v5130_v52, %v5135_v47 }
 0x3d5   : > { %4227 = vpow2.f32 %v1254_v34  ;;  %3864 = vmatprep.mubr.bf16.mxu0 %v1302_v36  ;;  %v1234_v49 = vsub.f32 %v5045_v35, %v1217_v20  ;;  %v4156_v34 = vld [vmem:[%s4721_s29 + $0x24] ss:$8 sps:$4 sm:$0xff]  }
 0x3d6   : > { %4229 = vpow2.f32 %v1256_v8  ;;  %3865 = vmatmul.mubr.bf16.gmra.mxu0 %v1303_v10  ;;  %v4153_v8 = vld [vmem:[%s4721_s29 + $0x54] ss:$8 sps:$4 sm:$0xff]   ;;  %v4154_v10 = vld [vmem:[%s4721_s29 + $0x44] ss:$8 sps:$4 sm:$0xff]   ;;  %2091 = vrot.lane.b32.xlu1 %v4156_v34, %s4580_s3 }
 0x3d7   : > { %4231 = vpow2.f32 %v1262_v38  ;;  %v1264_v42 = vmul.f32 1.442695, %v1234_v49  ;;  %2097 = vrot.lane.b32.xlu0 %v4153_v8, %s4580_s3  ;;  %v4158_v38 = vld [vmem:[%s4721_s29 + $0x4] ss:$8 sps:$4 sm:$0xff]   ;;  %v1717_v8 = vpop.permute.xlu1 %1716 }
 0x3d8   : > { %v1213_v25 = vpop.xlane.xlu0 %1212 }
 0x3d9   : > { %v1232_v37 = vsub.f32 %v5047_v39, %v1213_v25 }
 0x3da   : > { %v5145_v30 = vpop.eup %4223  ;;  %2087 = vrot.lane.b32.xlu1 %v4158_v38, %s4580_s3  ;;  %v4162_v38 = vld [vmem:[%s4721_s29 + $0x40] ss:$8 sps:$4 sm:$0xff]  }
 0x3db   : > { %v1260_v18 = vmul.f32 1.442695, %v1232_v37  ;;  %2095 = vrot.lane.b32.xlu0 %v4154_v10, %s4580_s3  ;;  %v4161_v10 = vld [vmem:[%s4721_s29 + $0x60] ss:$8 sps:$4 sm:$0xff]  }
 0x3dc   : > { %v1219_v9 = vpop.xlane.xlu0 %1218 }
 0x3dd   : > { %4233 = vpow2.f32 %v1260_v18  ;;  %v1235_v31 = vsub.f32 %v5049_v41, %v1219_v9  ;;  %v4155_v18 = vld [vmem:[%s4721_s29 + $0x34] ss:$8 sps:$4 sm:$0xff]  }
 0x3de   : > { %4235 = vpow2.f32 %v1264_v42  ;;  %v5147_v35 = vpop.eup %4225  ;;  %v4160_v42 = vld [vmem:[%s4721_s29 + $0x50] ss:$8 sps:$4 sm:$0xff]  }
 0x3df   : > { %v1266_v50 = vmul.f32 1.442695, %v1235_v31  ;;  %2093 = vrot.lane.b32.xlu0 %v4155_v18, %s4580_s3  ;;  %2515 = vrot.lane.b32.xlu1 %v4160_v42, %s4581_s7 }
 0x3e0   : > { %v1769_v32 = vpop.permute.xlu0 %1768 }
 0x3e1   : > { %4237 = vpow2.f32 %v1266_v50  ;;  %4026 = vmatprep.subr.msk.bf16.mxu0 %vm351_vm0, %v1769_v32  ;;  %v1810_v39 = vsel %vm351_vm0, %v1769_v32, 0 }
 0x3e2   : > { %v5153_v43 = vpop.eup %4227  ;;  %3889 = vmatpush3.bf16.xpose.msra.mxu0 %v1810_v39  ;;  %v4157_v39 = vld [vmem:[%s4721_s29 + $0x14] ss:$8 sps:$4 sm:$0xff]  }
 0x3e3   : > { %v5155_v41 = vpop.eup %4229  ;;  %v1304_v12 = vpack.c.bf16 %v5153_v43, %v5145_v30  ;;  %2089 = vrot.lane.b32.xlu0 %v4157_v39, %s4580_s3 }
 0x3e4   : > { %v1305_v36 = vpack.c.bf16 %v5147_v35, %v5155_v41  ;;  %v1767_v33 = vpop.permute.xlu0 %1766  ;;  %v5171_v49 = vpop.eup %4231 }
 0x3e5   : > { %3868 = vmatprep.mubr.bf16.mxu0 %v1304_v12  ;;  %4027 = vmatprep.subr.msk.bf16.mxu0 %vm351_vm0, %v1767_v33  ;;  %v1807_v20 = vsel %vm351_vm0, %v1767_v33, 0 }
 0x3e6   : > { %3869 = vmatmul.mubr.bf16.gmra.mxu0 %v1305_v36  ;;  %v1721_v36 = vpop.permute.xlu1 %1720 }
 0x3e7   : > { %2519 = vrot.lane.b32.xlu0 %v4159_v60, %s4581_s7 }
 0x3e8   : > { %v1711_v31 = vpop.permute.xlu0 %1710 }
 0x3ea   : > { %v5173_v25 = vpop.eup %4233  ;;  %3891 = vmatpush3.bf16.xpose.msra.mxu0 %v1807_v20  ;;  %v1725_v20 = vpop.permute.xlu1 %1724 }
 0x3eb   : > { %v1306_v37 = vpack.c.bf16 %v5171_v49, %v5173_v25  ;;  %v5181_v9 = vpop.eup %4235  ;;  %2517 = vrot.lane.b32.xlu0 %v4161_v10, %s4581_s7 }
 0x3ec   : > { %v1713_v44 = vpop.permute.xlu0 %1712 }
 0x3ed   : > { %3872 = vmatprep.mubr.bf16.mxu0 %v1306_v37 }
 0x3ee   : > { %v5183_v50 = vpop.eup %4237 }
 0x3ef   : > { %v1307_v32 = vpack.c.bf16 %v5183_v50, %v5181_v9  ;;  %2513 = vrot.lane.b32.xlu0 %v4162_v38, %s4581_s7 }
 0x3f0   : > { %v1715_v12 = vpop.permute.xlu0 %1714 }
 0x3f1   : > { %3873 = vmatmul.mubr.bf16.gmra.mxu0 %v1307_v32 }
 0x3f2   : > { %3892 = vmatprep.mubr.msk.bf16.mxu0 %vm351_vm0, %v1711_v31 }
 0x3f4   : > { %v1719_v34 = vpop.permute.xlu0 %1718 }
 0x3f8   : > { %v1723_v33 = vpop.permute.xlu0 %1722 }
 0x3f9   : > { %3893 = vmatmul.mubr.msk.bf16.vlgmr.msra.gmra.mxu0 %vm351_vm0, %v1713_v44 }
 0x3fa   : > { %3896 = vmatprep.mubr.msk.bf16.mxu0 %vm351_vm0, %v1715_v12 }
 0x401   : > { %3897 = vmatmul.mubr.msk.bf16.gmra.mxu0 %vm351_vm0, %v1717_v8 }
 0x402   : > { %3900 = vmatprep.mubr.msk.bf16.mxu0 %vm351_vm0, %v1719_v34 }
 0x409   : > { %3901 = vmatmul.mubr.msk.bf16.gmra.mxu0 %vm351_vm0, %v1721_v36 }
 0x40a   : > { %3904 = vmatprep.mubr.msk.bf16.mxu0 %vm351_vm0, %v1723_v33 }
 0x411   : > { %3905 = vmatmul.mubr.msk.bf16.gmra.mxu0 %vm351_vm0, %v1725_v20 }
 0x440   : > { %v2102_v37 = vpop.permute.xlu0 %2101 }
 0x441   : > { %3908 = vmatprep.subr.bf16.mxu1 %v2102_v37 }
 0x442   : > { %3909 = vmatpush3.bf16.msra.mxu1 %v2102_v37 }
 0x444   : > { %v2100_v18 = vpop.permute.xlu1 %2099 }
 0x445   : > { %3910 = vmatprep.subr.bf16.mxu1 %v2100_v18 }
 0x446   : > { %3911 = vmatpush3.bf16.msra.mxu1 %v2100_v18 }
 0x448   : > { %v2092_v39 = vpop.permute.xlu1 %2091 }
 0x449   : > { %v2098_v42 = vpop.permute.xlu0 %2097 }
 0x44a   : > { %3912 = vmatprep.subr.bf16.mxu1 %v2098_v42 }
 0x44b   : > { %3913 = vmatpush3.bf16.msra.mxu1 %v2098_v42 }
 0x44c   : > { %v2088_v60 = vpop.permute.xlu1 %2087 }
 0x44d   : > { %v2096_v31 = vpop.permute.xlu0 %2095 }
 0x44e   : > { %3914 = vmatprep.subr.bf16.mxu1 %v2096_v31 }
 0x44f   : > { %3915 = vmatpush3.bf16.msra.mxu1 %v2096_v31 }
 0x451   : > { %v2094_v32 = vpop.permute.xlu0 %2093 }
 0x452   : > { %3916 = vmatprep.subr.bf16.mxu1 %v2094_v32 }
 0x453   : > { %3917 = vmatpush3.bf16.msra.mxu1 %v2094_v32 }
 0x454   : > { %3918 = vmatprep.subr.bf16.mxu1 %v2092_v39 }
 0x455   : > { %v2090_v44 = vpop.permute.xlu0 %2089 }
 0x457   : > { %3919 = vmatpush3.bf16.msra.mxu1 %v2092_v39 }
 0x458   : > { %3920 = vmatprep.subr.bf16.mxu1 %v2090_v44 }
 0x459   : > { %v5209_v34 = vpop.permute.xlu0 %2519 }
 0x45b   : > { %3921 = vmatpush3.bf16.msra.mxu1 %v2090_v44  ;;  %v5205_v12 = vpop.f32.mrf.mxu0 }
 0x45c   : > { %3922 = vmatprep.subr.bf16.mxu1 %v2088_v60  ;;  %6032 = vst [vmem:[#allocation38_spill] sm:$0xff] %v5205_v12 }
 0x45d   : > { %v5207_v8 = vpop.f32.mrf.mxu0 }
 0x45e   : > { %6033 = vst [vmem:[#allocation39_spill] sm:$0xff] %v5207_v8  ;;  %v3616_v8 = vld [vmem:[%s4713_s28 + $0x20] sm:$0xff]  }
 0x45f   : > { %3923 = vmatpush3.bf16.msra.mxu1 %v2088_v60  ;;  %v5213_v36 = vpop.f32.mrf.mxu0  ;;  %v3578_v16 = vunpack.c.l.bf16 %v3616_v8  ;;  %v3579_v1 = vunpack.c.h.bf16 %v3616_v8 }
 0x460   : > { %4028 = vmatprep.subr.msk.bf16.mxu1 %vm351_vm0, %v5209_v34  ;;  %6034 = vst [vmem:[#allocation40_spill] sm:$0xff] %v5213_v36  ;;  %v3567_v36 = vunpack.c.h.bf16 %v3613_v29 }
 0x461   : > { %v5215_v33 = vpop.f32.mrf.mxu0  ;;  %v2394_v58 = vmul.f32 0.17677669, %v3579_v1  ;;  %v5313_v1 = vpop.permute.xlu0 %2517 }
 0x462   : > { %6035 = vst [vmem:[#allocation41_spill] sm:$0xff] %v5215_v33  ;;  %v2388_v55 = vmul.f32 0.17677669, %v3567_v36  ;;  %v2392_v36 = vmul.f32 0.17677669, %v3575_v3  ;;  %v5315_v3 = vpop.permute.xlu1 %2515 }
 0x496   : > { %v5217_v20 = vpop.f32.mrf.mxu0 }
 0x497   : > { %6036 = vst [vmem:[#allocation42_spill] sm:$0xff] %v5217_v20  ;;  %v3566_v20 = vunpack.c.l.bf16 %v3613_v29 }
 0x498   : > { %v5219_v10 = vpop.f32.mrf.mxu0 }
 0x499   : > { %6037 = vst [vmem:[#allocation43_spill] sm:$0xff] %v5219_v10  ;;  %v4165_v10 = vld [vmem:[%s4721_s29 + $0x10] ss:$8 sps:$4 sm:$0xff]   ;;  %v2387_v59 = vmul.f32 0.17677669, %v3566_v20 }
 0x49a   : > { %v5221_v38 = vpop.f32.mrf.mxu0 }
 0x49b   : > { %6038 = vst [vmem:[#allocation44_spill] sm:$0xff] %v5221_v38  ;;  %v3614_v38 = vld [vmem:[%s4713_s28 + $0x10] sm:$0xff]   ;;  %v2402_v29 = vpack.c.bf16 %v2388_v55, %v2387_v59 }
 0x49c   : > { %v5223_v37 = vpop.f32.mrf.mxu0  ;;  %v3570_v33 = vunpack.c.l.bf16 %v3614_v38  ;;  %v3571_v12 = vunpack.c.h.bf16 %v3614_v38  ;;  %v2393_v38 = vmul.f32 0.17677669, %v3578_v16  ;;  %v5317_v16 = vpop.permute.xlu0 %2513 }
 0x49d   : > { %6039 = vst [vmem:[#allocation45_spill] sm:$0xff] %v5223_v37 }
 0x49e   : > { %v2389_v15 = vmul.f32 0.17677669, %v3570_v33 }
 0x4a6   : > { %v5225_v18 = vpop.f32.mrf.mxu0 }
 0x4a7   : > { %6040 = vst [vmem:[#allocation46_spill] sm:$0xff] %v5225_v18 }
 0x4a8   : > { %v5227_v42 = vpop.f32.mrf.mxu0 }
 0x4a9   : > { %6041 = vst [vmem:[#allocation47_spill] sm:$0xff] %v5227_v42 }
 0x4aa   : > { %v5229_v31 = vpop.f32.mrf.mxu0 }
 0x4ab   : > { %6042 = vst [vmem:[#allocation48_spill] sm:$0xff] %v5229_v31 }
 0x4ac   : > { %v5231_v32 = vpop.f32.mrf.mxu0 }
 0x4ad   : > { %6043 = vst [vmem:[#allocation49_spill] sm:$0xff] %v5231_v32 }
 0x4b1   : > { %v5233_v39 = vpop.f32.mrf.mxu0 }
 0x4b2   : > { %6044 = vst [vmem:[#allocation50_spill] sm:$0xff] %v5233_v39  ;;  %v4163_v39 = vld [vmem:[%s4721_s29 + $0x20] ss:$8 sps:$4 sm:$0xff]  }
 0x4b3   : > { %v5235_v44 = vpop.f32.mrf.mxu0 }
 0x4b4   : > { %6045 = vst [vmem:[#allocation51_spill] sm:$0xff] %v5235_v44 }
 0x4b5   : > { %v5237_v60 = vpop.f32.mrf.mxu0 }
 0x4b6   : > { %6046 = vst [vmem:[#allocation52_spill] sm:$0xff] %v5237_v60 }
 0x4b7   : > { %v5239_v56 = vpop.f32.mrf.mxu0 }
 0x4b8   : > { %6047 = vst [vmem:[#allocation53_spill] sm:$0xff] %v5239_v56 }
 0x4b9   : > { %v5241_v62 = vpop.f32.mrf.mxu0 }
 0x4ba   : > { %1931 = vmax.xlane.f32.xlu1 %v5241_v62 }
 0x4bb   : > { %v5244_v53 = vpop.f32.mrf.mxu0 }
 0x4bc   : > { %1927 = vmax.xlane.f32.xlu0 %v5244_v53 }
 0x4bd   : > { %v5247_v54 = vpop.f32.mrf.mxu0 }
 0x4be   : > { %1933 = vmax.xlane.f32.xlu1 %v5247_v54 }
 0x4bf   : > { %v5250_v21 = vpop.f32.mrf.mxu0 }
 0x4c1   : > { %v5252_v51 = vpop.f32.mrf.mxu0 }
 0x4c2   : > { %1929 = vmax.xlane.f32.xlu1 %v5250_v21  ;;  %1939 = vmax.xlane.f32.xlu0 %v5252_v51 }
 0x4c3   : > { %v5256_v0 = vpop.f32.mrf.mxu0 }
 0x4c5   : > { %v5258_v2 = vpop.f32.mrf.mxu0 }
 0x4c6   : > { %1935 = vmax.xlane.f32.xlu1 %v5256_v0 }
 0x4c7   : > { %v5261_v23 = vpop.f32.mrf.mxu0 }
 0x4c8   : > { %1937 = vmax.xlane.f32.xlu0 %v5261_v23 }
 0x4c9   : > { %v5265_v28 = vpop.f32.mrf.mxu0 }
 0x4ca   : > { %1941 = vmax.xlane.f32.xlu1 %v5258_v2 }
 0x4cb   : > { %v5268_v60 = vpop.f32.mrf.mxu0 }
 0x4cd   : > { %v5271_v22 = vpop.f32.mrf.mxu0 }
 0x4ce   : > { %1947 = vmax.xlane.f32.xlu1 %v5265_v28 }
 0x4cf   : > { %v5274_v56 = vpop.f32.mrf.mxu0 }
 0x4d1   : > { %v5281_v31 = vpop.f32.mrf.mxu0 }
 0x4d2   : > { %1943 = vmax.xlane.f32.xlu1 %v5268_v60 }
 0x4d3   : > { %v5284_v44 = vpop.f32.mrf.mxu0 }
 0x4d5   : > { %v5287_v24 = vpop.f32.mrf.mxu0 }
 0x4d6   : > { %1949 = vmax.xlane.f32.xlu1 %v5271_v22 }
 0x4d7   : > { %v5290_v32 = vpop.f32.mrf.mxu0 }
 0x4da   : > { %1945 = vmax.xlane.f32.xlu1 %v5274_v56 }
 0x4de   : > { %2509 = vrot.lane.b32.xlu0 %v4163_v39, %s4581_s7 }
 0x4eb   : > { %2511 = vrot.lane.b32.xlu1 %v4164_v27, %s4581_s7  ;;  %v3561_v27 = vld [vmem:[%s4713_s28] sm:$0xff]  }
 0x4ec   : > { %v3562_v39 = vunpack.c.l.bf16 %v3561_v27  ;;  %v3563_v18 = vunpack.c.h.bf16 %v3561_v27  ;;  %v2390_v27 = vmul.f32 0.17677669, %v3571_v12  ;;  %v2405_v12 = vpack.c.bf16 %v2394_v58, %v2393_v38 }
 0x4ee   : > { %v2385_v42 = vmul.f32 0.17677669, %v3562_v39  ;;  %v2386_v37 = vmul.f32 0.17677669, %v3563_v18  ;;  %v4166_v39 = vld [vmem:[%s4721_s29] ss:$8 sps:$4 sm:$0xff]   ;;  %v3574_v18 = vunpack.c.l.bf16 %v3615_v4  ;;  %v2403_v61 = vpack.c.bf16 %v2390_v27, %v2389_v15 }
 0x4f0   : > { %v2401_v57 = vpack.c.bf16 %v2386_v37, %v2385_v42  ;;  %v2391_v20 = vmul.f32 0.17677669, %v3574_v18  ;;  %v3582_v37 = vunpack.c.l.bf16 %v3617_v6 }
 0x4f2   : > { %v2404_v8 = vpack.c.bf16 %v2392_v36, %v2391_v20  ;;  %v2395_v4 = vmul.f32 0.17677669, %v3582_v37 }
 0x4fd   : > { %1955 = vmax.xlane.f32.xlu0 %v5281_v31 }
 0x501   : > { %1951 = vmax.xlane.f32.xlu0 %v5284_v44 }
 0x505   : > { %1957 = vmax.xlane.f32.xlu0 %v5287_v24 }
 0x50f   : > { %1953 = vmax.xlane.f32.xlu1 %v5290_v32 }
 0x51b   : > { %2507 = vrot.lane.b32.xlu0 %v4165_v10, %s4581_s7  ;;  %v3583_v10 = vunpack.c.h.bf16 %v3617_v6 }
 0x51d   : > { %v2396_v33 = vmul.f32 0.17677669, %v3583_v10 }
 0x51f   : > { %2449 = vrot.lane.b32.xlu0 %v2401_v57, %s4581_s7  ;;  %v2406_v15 = vpack.c.bf16 %v2396_v33, %v2395_v4 }
 0x520   : > { %2505 = vrot.lane.b32.xlu1 %v4166_v39, %s4581_s7 }
 0x523   : > { %2453 = vrot.lane.b32.xlu0 %v2403_v61, %s4581_s7 }
 0x524   : > { %2451 = vrot.lane.b32.xlu1 %v2402_v29, %s4581_s7 }
 0x527   : > { %2457 = vrot.lane.b32.xlu0 %v2405_v12, %s4581_s7 }
 0x528   : > { %2455 = vrot.lane.b32.xlu1 %v2404_v8, %s4581_s7 }
 0x52b   : > { %2461 = vrot.lane.b32.xlu0 %v5089_v48, %s4581_s7 }
 0x52c   : > { %2459 = vrot.lane.b32.xlu1 %v2406_v15, %s4581_s7 }
 0x530   : > { %2463 = vrot.lane.b32.xlu1 %v5070_v19, %s4581_s7 }
 0x543   : > { %v1932_v55 = vpop.xlane.xlu1 %1931 }
 0x544   : > { %v1961_v6 = vsub.f32 %v5241_v62, %v1932_v55 }
 0x545   : > { %v1928_v57 = vpop.xlane.xlu0 %1927 }
 0x546   : > { %v1959_v58 = vsub.f32 %v5244_v53, %v1928_v57  ;;  %v1979_v18 = vmul.f32 1.442695, %v1961_v6 }
 0x547   : > { %v1934_v59 = vpop.xlane.xlu1 %1933 }
 0x548   : > { %v1962_v61 = vsub.f32 %v5247_v54, %v1934_v59  ;;  %v1975_v48 = vmul.f32 1.442695, %v1959_v58 }
 0x54a   : > { %v1981_v27 = vmul.f32 1.442695, %v1962_v61  ;;  %4239 = vpow2.f32 %v1975_v48 }
 0x54b   : > { %v1930_v42 = vpop.xlane.xlu1 %1929  ;;  %v1940_v39 = vpop.xlane.xlu0 %1939 }
 0x54c   : > { %v1960_v19 = vsub.f32 %v5250_v21, %v1930_v42  ;;  %v1965_v38 = vsub.f32 %v5252_v51, %v1940_v39  ;;  %4241 = vpow2.f32 %v1981_v27 }
 0x54e   : > { %v1977_v29 = vmul.f32 1.442695, %v1960_v19  ;;  %v1987_v37 = vmul.f32 1.442695, %v1965_v38 }
 0x54f   : > { %v1936_v20 = vpop.xlane.xlu1 %1935 }
 0x550   : > { %v1963_v53 = vsub.f32 %v5256_v0, %v1936_v20  ;;  %4243 = vpow2.f32 %v1977_v29  ;;  %v2564_v20 = vsel %vm351_vm0, %v5313_v1, 0 }
 0x551   : > { %v1938_v36 = vpop.xlane.xlu0 %1937  ;;  %4245 = vpow2.f32 %v1979_v18 }
 0x552   : > { %v1983_v54 = vmul.f32 1.442695, %v1963_v53  ;;  %v1964_v62 = vsub.f32 %v5261_v23, %v1938_v36 }
 0x553   : > { %v1942_v10 = vpop.xlane.xlu1 %1941 }
 0x554   : > { %v1985_v12 = vmul.f32 1.442695, %v1964_v62  ;;  %v1966_v21 = vsub.f32 %v5258_v2, %v1942_v10  ;;  %4247 = vpow2.f32 %v1983_v54 }
 0x556   : > { %4249 = vpow2.f32 %v1985_v12  ;;  %v1989_v8 = vmul.f32 1.442695, %v1966_v21  ;;  %v2510_v12 = vpop.permute.xlu0 %2509 }
 0x557   : > { %4251 = vpow2.f32 %v1987_v37  ;;  %v1948_v51 = vpop.xlane.xlu1 %1947  ;;  %v5327_v33 = vpop.eup %4239 }
 0x558   : > { %4253 = vpow2.f32 %v1989_v8  ;;  %v1969_v61 = vsub.f32 %v5265_v28, %v1948_v51  ;;  %v2552_v51 = vsel %vm351_vm0, %v2510_v12, 0 }
 0x559   : > { %v5329_v0 = vpop.eup %4241 }
 0x55a   : > { %v1995_v29 = vmul.f32 1.442695, %v1969_v61 }
 0x55b   : > { %v1944_v4 = vpop.xlane.xlu1 %1943 }
 0x55c   : > { %v1967_v23 = vsub.f32 %v5268_v60, %v1944_v4  ;;  %v2567_v60 = vsel %vm351_vm0, %v5209_v34, 0 }
 0x55d   : > { %v5331_v15 = vpop.eup %4243 }
 0x55e   : > { %v5334_v55 = vpop.eup %4245  ;;  %v2039_v2 = vpack.c.bf16 %v5331_v15, %v5327_v33  ;;  %v1991_v48 = vmul.f32 1.442695, %v1967_v23 }
 0x55f   : > { %v1950_v57 = vpop.xlane.xlu1 %1949  ;;  %v2040_v59 = vpack.c.bf16 %v5329_v0, %v5334_v55 }
 0x560   : > { %v1970_v58 = vsub.f32 %v5271_v22, %v1950_v57  ;;  %3924 = vmatprep.mubr.bf16.mxu1 %v2039_v2  ;;  %4255 = vpow2.f32 %v1991_v48 }
 0x561   : > { %v5342_v6 = vpop.eup %4247  ;;  %3925 = vmatmul.mubr.bf16.vlgmr.msra.gmra.mxu1 %v2040_v59 }
 0x562   : > { %v1997_v27 = vmul.f32 1.442695, %v1970_v58  ;;  %3941 = vmatpush3.bf16.xpose.msra.mxu1 %v2567_v60 }
 0x563   : > { %v5346_v42 = vpop.eup %4249  ;;  %v1946_v39 = vpop.xlane.xlu1 %1945  ;;  %4029 = vmatprep.subr.msk.bf16.mxu1 %vm351_vm0, %v5313_v1 }
 0x564   : > { %v5348_v19 = vpop.eup %4251  ;;  %v1968_v22 = vsub.f32 %v5274_v56, %v1946_v39  ;;  %v2041_v28 = vpack.c.bf16 %v5346_v42, %v5342_v6  ;;  %4257 = vpow2.f32 %v1997_v27  ;;  %v2561_v56 = vsel %vm351_vm0, %v5315_v3, 0 }
 0x565   : > { %v5355_v18 = vpop.eup %4253 }
 0x566   : > { %v1993_v34 = vmul.f32 1.442695, %v1968_v22  ;;  %3928 = vmatprep.mubr.bf16.mxu1 %v2041_v28  ;;  %v2042_v38 = vpack.c.bf16 %v5355_v18, %v5348_v19 }
 0x567   : > { %v2512_v10 = vpop.permute.xlu1 %2511 }
 0x568   : > { %4259 = vpow2.f32 %v1993_v34  ;;  %v2555_v21 = vsel %vm351_vm0, %v2512_v10, 0 }
 0x569   : > { %4261 = vpow2.f32 %v1995_v29  ;;  %3929 = vmatmul.mubr.bf16.gmra.mxu1 %v2042_v38 }
 0x56a   : > { %3943 = vmatpush3.bf16.xpose.msra.mxu1 %v2564_v20 }
 0x56b   : > { %4030 = vmatprep.subr.msk.bf16.mxu1 %vm351_vm0, %v5315_v3  ;;  %v2558_v3 = vsel %vm351_vm0, %v5317_v16, 0 }
 0x56d   : > { %v5365_v53 = vpop.eup %4255 }
 0x571   : > { %v5367_v36 = vpop.eup %4257 }
 0x572   : > { %3945 = vmatpush3.bf16.xpose.msra.mxu1 %v2561_v56 }
 0x573   : > { %4031 = vmatprep.subr.msk.bf16.mxu1 %vm351_vm0, %v5317_v16 }
 0x575   : > { %v5371_v54 = vpop.eup %4259 }
 0x576   : > { %v5373_v62 = vpop.eup %4261  ;;  %v2043_v1 = vpack.c.bf16 %v5371_v54, %v5365_v53 }
 0x577   : > { %v2044_v37 = vpack.c.bf16 %v5367_v36, %v5373_v62 }
 0x578   : > { %3932 = vmatprep.mubr.bf16.mxu1 %v2043_v1 }
 0x579   : > { %3933 = vmatmul.mubr.bf16.gmra.mxu1 %v2044_v37 }
 0x57a   : > { %3947 = vmatpush3.bf16.xpose.msra.mxu1 %v2558_v3 }
 0x57b   : > { %4032 = vmatprep.subr.msk.bf16.mxu1 %vm351_vm0, %v2512_v10  ;;  %v4167_v10 = vld [vmem:[%s4721_s29 + $0x74] ss:$8 sps:$4 sm:$0xff]  }
 0x57c   : > { %2840 = vrot.lane.b32.xlu1 %v4167_v10, %s4581_s7 }
 0x582   : > { %3949 = vmatpush3.bf16.xpose.msra.mxu1 %v2555_v21  ;;  %v4169_v21 = vld [vmem:[%s4721_s29 + $0x54] ss:$8 sps:$4 sm:$0xff]  }
 0x583   : > { %4033 = vmatprep.subr.msk.bf16.mxu1 %vm351_vm0, %v2510_v12  ;;  %v4168_v12 = vld [vmem:[%s4721_s29 + $0x64] ss:$8 sps:$4 sm:$0xff]   ;;  %2836 = vrot.lane.b32.xlu1 %v4169_v21, %s4581_s7 }
 0x584   : > { %2838 = vrot.lane.b32.xlu0 %v4168_v12, %s4581_s7 }
 0x586   : > { %v1956_v8 = vpop.xlane.xlu0 %1955 }
 0x587   : > { %v1973_v59 = vsub.f32 %v5281_v31, %v1956_v8  ;;  %v4170_v8 = vld [vmem:[%s4721_s29 + $0x44] ss:$8 sps:$4 sm:$0xff]  }
 0x588   : > { %2834 = vrot.lane.b32.xlu0 %v4170_v8, %s4581_s7 }
 0x589   : > { %v2003_v39 = vmul.f32 1.442695, %v1973_v59 }
 0x58a   : > { %v1952_v4 = vpop.xlane.xlu0 %1951  ;;  %3951 = vmatpush3.bf16.xpose.msra.mxu1 %v2552_v51 }
 0x58b   : > { %v1971_v2 = vsub.f32 %v5284_v44, %v1952_v4 }
 0x58d   : > { %v1999_v61 = vmul.f32 1.442695, %v1971_v2  ;;  %v4173_v2 = vld [vmem:[%s4721_s29 + $0x14] ss:$8 sps:$4 sm:$0xff]  }
 0x58e   : > { %v1958_v23 = vpop.xlane.xlu0 %1957 }
 0x58f   : > { %v1974_v58 = vsub.f32 %v5287_v24, %v1958_v23  ;;  %4263 = vpow2.f32 %v1999_v61  ;;  %v4171_v23 = vld [vmem:[%s4721_s29 + $0x34] ss:$8 sps:$4 sm:$0xff]  }
 0x590   : > { %2832 = vrot.lane.b32.xlu1 %v4171_v23, %s4581_s7 }
 0x591   : > { %v2005_v48 = vmul.f32 1.442695, %v1974_v58 }
 0x592   : > { %v2508_v57 = vpop.permute.xlu0 %2507 }
 0x593   : > { %4034 = vmatprep.subr.msk.bf16.mxu1 %vm351_vm0, %v2508_v57  ;;  %v2549_v16 = vsel %vm351_vm0, %v2508_v57, 0  ;;  %4265 = vpow2.f32 %v2005_v48  ;;  %v4172_v57 = vld [vmem:[%s4721_s29 + $0x24] ss:$8 sps:$4 sm:$0xff]  }
 0x594   : > { %3953 = vmatpush3.bf16.xpose.msra.mxu1 %v2549_v16  ;;  %2830 = vrot.lane.b32.xlu0 %v4172_v57, %s4581_s7 }
 0x595   : > { %2828 = vrot.lane.b32.xlu1 %v4173_v2, %s4581_s7 }
 0x596   : > { %v2450_v20 = vpop.permute.xlu0 %2449 }
 0x598   : > { %v1954_v60 = vpop.xlane.xlu1 %1953 }
 0x599   : > { %v1972_v27 = vsub.f32 %v5290_v32, %v1954_v60 }
 0x59a   : > { %v2454_v1 = vpop.permute.xlu0 %2453 }
 0x59b   : > { %v2001_v22 = vmul.f32 1.442695, %v1972_v27 }
 0x59c   : > { %v2506_v28 = vpop.permute.xlu1 %2505  ;;  %v5393_v24 = vpop.eup %4263 }
 0x59d   : > { %4267 = vpow2.f32 %v2001_v22  ;;  %4035 = vmatprep.subr.msk.bf16.mxu1 %vm351_vm0, %v2506_v28  ;;  %v2546_v44 = vsel %vm351_vm0, %v2506_v28, 0 }
 0x59e   : > { %4269 = vpow2.f32 %v2003_v39  ;;  %3955 = vmatpush3.bf16.xpose.msra.mxu1 %v2546_v44  ;;  %v2458_v3 = vpop.permute.xlu0 %2457 }
 0x5a0   : > { %v5395_v31 = vpop.eup %4265  ;;  %v2452_v56 = vpop.permute.xlu1 %2451 }
 0x5a2   : > { %v2462_v4 = vpop.permute.xlu0 %2461 }
 0x5a4   : > { %v2456_v37 = vpop.permute.xlu1 %2455 }
 0x5a8   : > { %v2460_v51 = vpop.permute.xlu1 %2459 }
 0x5aa   : > { %v5397_v29 = vpop.eup %4267 }
 0x5ab   : > { %v5399_v32 = vpop.eup %4269  ;;  %v2045_v34 = vpack.c.bf16 %v5397_v29, %v5393_v24 }
 0x5ac   : > { %v2046_v38 = vpack.c.bf16 %v5395_v31, %v5399_v32  ;;  %v2464_v16 = vpop.permute.xlu1 %2463 }
 0x5ad   : > { %3936 = vmatprep.mubr.bf16.mxu1 %v2045_v34 }
 0x5ae   : > { %3937 = vmatmul.mubr.bf16.gmra.mxu1 %v2046_v38 }
 0x5af   : > { %3956 = vmatprep.mubr.msk.bf16.mxu1 %vm351_vm0, %v2450_v20 }
 0x5b6   : > { %3957 = vmatmul.mubr.msk.bf16.vlgmr.msra.gmra.mxu1 %vm351_vm0, %v2452_v56 }
 0x5b7   : > { %3960 = vmatprep.mubr.msk.bf16.mxu1 %vm351_vm0, %v2454_v1 }
 0x5be   : > { %3961 = vmatmul.mubr.msk.bf16.gmra.mxu1 %vm351_vm0, %v2456_v37 }
 0x5bf   : > { %3964 = vmatprep.mubr.msk.bf16.mxu1 %vm351_vm0, %v2458_v3 }
 0x5c6   : > { %3965 = vmatmul.mubr.msk.bf16.gmra.mxu1 %vm351_vm0, %v2460_v51 }
 0x5c7   : > { %3968 = vmatprep.mubr.msk.bf16.mxu1 %vm351_vm0, %v2462_v4 }
 0x5ce   : > { %3969 = vmatmul.mubr.msk.bf16.gmra.mxu1 %vm351_vm0, %v2464_v16 }
 0x5ee   : > { %v2841_v58 = vpop.permute.xlu1 %2840 }
 0x5ef   : > { %3972 = vmatprep.subr.bf16.mxu0 %v2841_v58 }
 0x5f0   : > { %3973 = vmatpush3.bf16.msra.mxu0 %v2841_v58 }
 0x5f5   : > { %v2837_v61 = vpop.permute.xlu1 %2836 }
 0x5f6   : > { %v2839_v59 = vpop.permute.xlu0 %2838 }
 0x5f7   : > { %3974 = vmatprep.subr.bf16.mxu0 %v2839_v59 }
 0x5f8   : > { %3975 = vmatpush3.bf16.msra.mxu0 %v2839_v59 }
 0x5f9   : > { %3976 = vmatprep.subr.bf16.mxu0 %v2837_v61 }
 0x5fa   : > { %v2835_v48 = vpop.permute.xlu0 %2834 }
 0x5fc   : > { %3977 = vmatpush3.bf16.msra.mxu0 %v2837_v61 }
 0x5fd   : > { %3978 = vmatprep.subr.bf16.mxu0 %v2835_v48 }
 0x600   : > { %3979 = vmatpush3.bf16.msra.mxu0 %v2835_v48 }
 0x602   : > { %v2833_v27 = vpop.permute.xlu1 %2832 }
 0x603   : > { %3980 = vmatprep.subr.bf16.mxu0 %v2833_v27 }
 0x604   : > { %3981 = vmatpush3.bf16.msra.mxu0 %v2833_v27 }
 0x606   : > { %v2831_v39 = vpop.permute.xlu0 %2830 }
 0x607   : > { %3982 = vmatprep.subr.bf16.mxu0 %v2831_v39  ;;  %v2829_v57 = vpop.permute.xlu1 %2828 }
 0x608   : > { %3983 = vmatpush3.bf16.msra.mxu0 %v2831_v39 }
 0x609   : > { %3984 = vmatprep.subr.bf16.mxu0 %v2829_v57 }
 0x60c   : > { %3985 = vmatpush3.bf16.msra.mxu0 %v2829_v57 }
 0x621   : > { %v5427_v60 = vpop.f32.mrf.mxu1 }
 0x623   : > { %v5429_v22 = vpop.f32.mrf.mxu1 }
 0x625   : > { %v5431_v28 = vpop.f32.mrf.mxu1 }
 0x627   : > { %v5433_v44 = vpop.f32.mrf.mxu1 }
 0x629   : > { %v5435_v34 = vpop.f32.mrf.mxu1 }
 0x62b   : > { %v5437_v38 = vpop.f32.mrf.mxu1 }
 0x62d   : > { %v5439_v20 = vpop.f32.mrf.mxu1 }
 0x62f   : > { %v5441_v56 = vpop.f32.mrf.mxu1 }
 0x639   : > { %v5443_v1 = vpop.f32.mrf.mxu1 }
 0x63a   : > { %6048 = vst [vmem:[#allocation54_spill] sm:$0xff] %v5443_v1  ;;  %v4174_v1 = vld [vmem:[%s4721_s29 + $0x4] ss:$8 sps:$4 sm:$0xff]  }
 0x63b   : > { %v5445_v37 = vpop.f32.mrf.mxu1 }
 0x63d   : > { %v5447_v3 = vpop.f32.mrf.mxu1 }
 0x63e   : > { %6049 = vst [vmem:[#allocation55_spill] sm:$0xff] %v5447_v3 }
 0x63f   : > { %v5449_v10 = vpop.f32.mrf.mxu1 }
 0x66e   : > { %v5451_v12 = vpop.f32.mrf.mxu1 }
 0x66f   : > { %6050 = vst [vmem:[#allocation56_spill] sm:$0xff] %v5451_v12 }
 0x670   : > { %v5453_v21 = vpop.f32.mrf.mxu1 }
 0x671   : > { %6051 = vst [vmem:[#allocation57_spill] sm:$0xff] %v5453_v21 }
 0x672   : > { %v5455_v8 = vpop.f32.mrf.mxu1 }
 0x673   : > { %6052 = vst [vmem:[#allocation58_spill] sm:$0xff] %v5455_v8 }
 0x674   : > { %v5457_v51 = vpop.f32.mrf.mxu1 }
 0x675   : > { %6053 = vst [vmem:[#allocation59_spill] sm:$0xff] %v5457_v51 }
 0x676   : > { %v5459_v4 = vpop.f32.mrf.mxu1 }
 0x677   : > { %2670 = vmax.xlane.f32.xlu0 %v5459_v4 }
 0x678   : > { %v5462_v23 = vpop.f32.mrf.mxu1 }
 0x67a   : > { %v5464_v2 = vpop.f32.mrf.mxu1 }
 0x67b   : > { %2666 = vmax.xlane.f32.xlu0 %v5462_v23 }
 0x67c   : > { %v5467_v16 = vpop.f32.mrf.mxu1 }
 0x67d   : > { %2668 = vmax.xlane.f32.xlu1 %v5467_v16 }
 0x67e   : > { %v5470_v58 = vpop.f32.mrf.mxu1 }
 0x67f   : > { %2672 = vmax.xlane.f32.xlu0 %v5464_v2 }
 0x680   : > { %v5473_v59 = vpop.f32.mrf.mxu1 }
 0x681   : > { %2678 = vmax.xlane.f32.xlu1 %v5470_v58 }
 0x682   : > { %v5476_v61 = vpop.f32.mrf.mxu1 }
 0x683   : > { %2680 = vmax.xlane.f32.xlu0 %v5476_v61 }
 0x684   : > { %v5479_v48 = vpop.f32.mrf.mxu1 }
 0x685   : > { %2674 = vmax.xlane.f32.xlu1 %v5473_v59 }
 0x686   : > { %v5482_v27 = vpop.f32.mrf.mxu1 }
 0x687   : > { %2676 = vmax.xlane.f32.xlu0 %v5479_v48 }
 0x688   : > { %v5485_v39 = vpop.f32.mrf.mxu1 }
 0x689   : > { %2686 = vmax.xlane.f32.xlu1 %v5482_v27 }
 0x68a   : > { %v5488_v57 = vpop.f32.mrf.mxu1 }
 0x68b   : > { %2688 = vmax.xlane.f32.xlu0 %v5488_v57 }
 0x68c   : > { %v5491_v8 = vpop.f32.mrf.mxu1 }
 0x68d   : > { %2682 = vmax.xlane.f32.xlu1 %v5485_v39 }
 0x68e   : > { %v5494_v12 = vpop.f32.mrf.mxu1 }
 0x68f   : > { %2684 = vmax.xlane.f32.xlu0 %v5491_v8 }
 0x690   : > { %v5497_v51 = vpop.f32.mrf.mxu1 }
 0x691   : > { %2694 = vmax.xlane.f32.xlu1 %v5494_v12 }
 0x692   : > { %v5500_v21 = vpop.f32.mrf.mxu1 }
 0x693   : > { %2696 = vmax.xlane.f32.xlu0 %v5500_v21 }
 0x694   : > { %v5504_v3 = vpop.f32.mrf.mxu1 }
 0x695   : > { %2690 = vmax.xlane.f32.xlu1 %v5497_v51 }
 0x697   : > { %2692 = vmax.xlane.f32.xlu0 %v5504_v3 }
 0x699   : > { %1268 = vadd.xlane.f32.xlu1 %v5097_v11  ;;  %v6054_v11 = vld [vmem:[#allocation17_spill] sm:$0xff] }
 0x69d   : > { %1272 = vadd.xlane.f32.xlu1 %v5103_v14 }
 0x6a1   : > { %1276 = vadd.xlane.f32.xlu1 %v5128_v40 }
 0x6a5   : > { %1280 = vadd.xlane.f32.xlu1 %v5135_v47 }
 0x6a9   : > { %1284 = vadd.xlane.f32.xlu1 %v5145_v30  ;;  %v6057_v30 = vld [vmem:[#allocation12_spill] sm:$0xff] }
 0x6ad   : > { %1288 = vadd.xlane.f32.xlu1 %v5155_v41  ;;  %2826 = vrot.lane.b32.xlu0 %v4174_v1, %s4581_s7 }
 0x6b1   : > { %1292 = vadd.xlane.f32.xlu1 %v5173_v25 }
 0x6b5   : > { %1296 = vadd.xlane.f32.xlu1 %v5181_v9 }
 0x6b9   : > { %2007 = vadd.xlane.f32.xlu1 %v5327_v33 }
 0x6bd   : > { %2011 = vadd.xlane.f32.xlu1 %v5334_v55 }
 0x6c1   : > { %2015 = vadd.xlane.f32.xlu1 %v5342_v6  ;;  %v6059_v6 = vld [vmem:[#allocation14_spill] sm:$0xff] }
 0x6c5   : > { %2019 = vadd.xlane.f32.xlu1 %v5348_v19 }
 0x6c9   : > { %2023 = vadd.xlane.f32.xlu1 %v5365_v53 }
 0x6cc   : > { %1270 = vadd.xlane.f32.xlu0 %v5101_v46 }
 0x6cd   : > { %2027 = vadd.xlane.f32.xlu1 %v5373_v62 }
 0x6d0   : > { %1274 = vadd.xlane.f32.xlu0 %v5099_v45 }
 0x6d1   : > { %2031 = vadd.xlane.f32.xlu1 %v5393_v24  ;;  %v6060_v24 = vld [vmem:[#allocation13_spill] sm:$0xff] }
 0x6d4   : > { %1278 = vadd.xlane.f32.xlu0 %v5133_v7 }
 0x6d5   : > { %2035 = vadd.xlane.f32.xlu1 %v5399_v32 }
 0x6d8   : > { %1282 = vadd.xlane.f32.xlu0 %v5130_v52 }
 0x6d9   : > { %577 = vadd.xlane.f32.xlu1 %v4875_v63  ;;  %v6055_v63 = vld [vmem:[#allocation19_spill] sm:$0xff] }
 0x6dc   : > { %1286 = vadd.xlane.f32.xlu0 %v5153_v43 }
 0x6dd   : > { %581 = vadd.xlane.f32.xlu1 %v4881_v5  ;;  %v6056_v5 = vld [vmem:[#allocation21_spill] sm:$0xff] }
 0x6e0   : > { %1290 = vadd.xlane.f32.xlu0 %v5147_v35 }
 0x6e1   : > { %585 = vadd.xlane.f32.xlu1 %v4890_v13 }
 0x6e4   : > { %1294 = vadd.xlane.f32.xlu0 %v5171_v49  ;;  %v6058_v49 = vld [vmem:[#allocation11_spill] sm:$0xff] }
 0x6e5   : > { %589 = vadd.xlane.f32.xlu1 %v4898_v17 }
 0x6e8   : > { %1298 = vadd.xlane.f32.xlu0 %v5183_v50 }
 0x6e9   : > { %593 = vadd.xlane.f32.xlu1 %v4923_v26 }
 0x6ec   : > { %2009 = vadd.xlane.f32.xlu0 %v5331_v15 }
 0x6ed   : > { %597 = vadd.xlane.f32.xlu1 %v6054_v11 }
 0x6f0   : > { %2013 = vadd.xlane.f32.xlu0 %v5329_v0 }
 0x6f1   : > { %601 = vadd.xlane.f32.xlu1 %v6055_v63 }
 0x6f4   : > { %2017 = vadd.xlane.f32.xlu0 %v5346_v42 }
 0x6f5   : > { %605 = vadd.xlane.f32.xlu1 %v6056_v5 }
 0x6f8   : > { %2021 = vadd.xlane.f32.xlu0 %v5355_v18 }
 0x6fc   : > { %2025 = vadd.xlane.f32.xlu0 %v5371_v54 }
 0x700   : > { %v2671_v13 = vpop.xlane.xlu0 %2670  ;;  %2029 = vadd.xlane.f32.xlu0 %v5367_v36 }
 0x701   : > { %v2700_v25 = vsub.f32 %v5459_v4, %v2671_v13 }
 0x703   : > { %v2718_v42 = vmul.f32 1.442695, %v2700_v25 }
 0x704   : > { %v2667_v17 = vpop.xlane.xlu0 %2666  ;;  %2033 = vadd.xlane.f32.xlu0 %v5397_v29 }
 0x705   : > { %v2698_v26 = vsub.f32 %v5462_v23, %v2667_v17 }
 0x706   : > { %v2669_v45 = vpop.xlane.xlu1 %2668 }
 0x707   : > { %v2714_v46 = vmul.f32 1.442695, %v2698_v26  ;;  %v2699_v14 = vsub.f32 %v5467_v16, %v2669_v45 }
 0x708   : > { %v2673_v40 = vpop.xlane.xlu0 %2672  ;;  %2037 = vadd.xlane.f32.xlu0 %v5395_v31 }
 0x709   : > { %v2716_v52 = vmul.f32 1.442695, %v2699_v14  ;;  %4271 = vpow2.f32 %v2714_v46  ;;  %v2701_v43 = vsub.f32 %v5464_v2, %v2673_v40  ;;  %v6063_v46 = vld [vmem:[#allocation16_spill] sm:$0xff] }
 0x70a   : > { %v2679_v7 = vpop.xlane.xlu1 %2678 }
 0x70b   : > { %4273 = vpow2.f32 %v2716_v52  ;;  %v2720_v0 = vmul.f32 1.442695, %v2701_v43  ;;  %v2704_v31 = vsub.f32 %v5470_v58, %v2679_v7 }
 0x70c   : > { %v2681_v47 = vpop.xlane.xlu0 %2680  ;;  %579 = vadd.xlane.f32.xlu0 %v6057_v30 }
 0x70d   : > { %4275 = vpow2.f32 %v2720_v0  ;;  %v2705_v36 = vsub.f32 %v5476_v61, %v2681_v47  ;;  %v2726_v61 = vmul.f32 1.442695, %v2704_v31 }
 0x70e   : > { %v2675_v35 = vpop.xlane.xlu1 %2674 }
 0x70f   : > { %v2702_v50 = vsub.f32 %v5473_v59, %v2675_v35  ;;  %v2728_v23 = vmul.f32 1.442695, %v2705_v36  ;;  %v6061_v59 = vld [vmem:[#allocation15_spill] sm:$0xff]  ;;  %v6064_v35 = vld [vmem:[#allocation20_spill] sm:$0xff] }
 0x710   : > { %v2677_v41 = vpop.xlane.xlu0 %2676  ;;  %583 = vadd.xlane.f32.xlu0 %v6058_v49 }
 0x711   : > { %v2703_v9 = vsub.f32 %v5479_v48, %v2677_v41  ;;  %v2722_v19 = vmul.f32 1.442695, %v2702_v50 }
 0x712   : > { %v2687_v33 = vpop.xlane.xlu1 %2686 }
 0x713   : > { %v2724_v15 = vmul.f32 1.442695, %v2703_v9 }
 0x714   : > { %v2689_v55 = vpop.xlane.xlu0 %2688  ;;  %587 = vadd.xlane.f32.xlu0 %v6059_v6 }
 0x715   : > { %4277 = vpow2.f32 %v2724_v15  ;;  %v2709_v48 = vsub.f32 %v5488_v57, %v2689_v55 }
 0x716   : > { %v2683_v18 = vpop.xlane.xlu1 %2682  ;;  %v5558_v53 = vpop.eup %4271  ;;  %4279 = vpow2.f32 %v2718_v42 }
 0x717   : > { %4281 = vpow2.f32 %v2722_v19  ;;  %v2706_v1 = vsub.f32 %v5485_v39, %v2683_v18  ;;  %v2708_v39 = vsub.f32 %v5482_v27, %v2687_v33  ;;  %v2736_v13 = vmul.f32 1.442695, %v2709_v48  ;;  %v6065_v19 = vld [vmem:[#allocation39_spill] sm:$0xff] }
 0x718   : > { %v5561_v54 = vpop.eup %4273  ;;  %v2685_v62 = vpop.xlane.xlu0 %2684  ;;  %591 = vadd.xlane.f32.xlu0 %v6060_v24  ;;  %4283 = vpow2.f32 %v2728_v23 }
 0x719   : > { %v2707_v29 = vsub.f32 %v5491_v8, %v2685_v62  ;;  %v2778_v32 = vpack.c.bf16 %v5561_v54, %v5558_v53  ;;  %v2730_v11 = vmul.f32 1.442695, %v2706_v1  ;;  %v6062_v8 = vld [vmem:[#allocation18_spill] sm:$0xff]  ;;  %v2734_v52 = vmul.f32 1.442695, %v2708_v39 }
 0x71a   : > { %v2695_v4 = vpop.xlane.xlu1 %2694  ;;  %v5575_v45 = vpop.eup %4275 }
 0x71b   : > { %3988 = vmatprep.mubr.bf16.mxu0 %v2778_v32  ;;  %v2732_v2 = vmul.f32 1.442695, %v2707_v29  ;;  %v2712_v41 = vsub.f32 %v5494_v12, %v2695_v4  ;;  %v6066_v29 = vld [vmem:[#allocation38_spill] sm:$0xff] }
 0x71c   : > { %v2697_v16 = vpop.xlane.xlu0 %2696  ;;  %595 = vadd.xlane.f32.xlu0 %v6061_v59 }
 0x71d   : > { %4285 = vpow2.f32 %v2732_v2  ;;  %v2742_v50 = vmul.f32 1.442695, %v2712_v41 }
 0x71e   : > { %v2691_v58 = vpop.xlane.xlu1 %2690  ;;  %4287 = vpow2.f32 %v2726_v61 }
 0x71f   : > { %4289 = vpow2.f32 %v2730_v11  ;;  %v2710_v17 = vsub.f32 %v5497_v51, %v2691_v58  ;;  %v2713_v51 = vsub.f32 %v5500_v21, %v2697_v16 }
 0x720   : > { %599 = vadd.xlane.f32.xlu0 %v6062_v8  ;;  %v2693_v63 = vpop.xlane.xlu0 %2692 }
 0x721   : > { %v2711_v5 = vsub.f32 %v5504_v3, %v2693_v63  ;;  %v2738_v3 = vmul.f32 1.442695, %v2710_v17  ;;  %v2744_v25 = vmul.f32 1.442695, %v2713_v51 }
 0x722   : > { %v1269_v26 = vpop.xlane.xlu1 %1268  ;;  %v5578_v40 = vpop.eup %4277 }
 0x723   : > { %v2740_v57 = vmul.f32 1.442695, %v2711_v5  ;;  %4291 = vrcp.f32 %v1269_v26  ;;  %v5580_v7 = vpop.eup %4279 }
 0x724   : > { %603 = vadd.xlane.f32.xlu0 %v6063_v46  ;;  %v2827_v14 = vpop.permute.xlu0 %2826  ;;  %4293 = vpow2.f32 %v2736_v13  ;;  %v5582_v47 = vpop.eup %4281  ;;  %v2779_v30 = vpack.c.bf16 %v5575_v45, %v5580_v7 }
 0x725   : > { %3986 = vmatprep.subr.bf16.mxu0 %v2827_v14  ;;  %v2780_v43 = vpack.c.bf16 %v5578_v40, %v5582_v47  ;;  %v5591_v9 = vpop.eup %4283 }
 0x726   : > { %3987 = vmatpush3.bf16.msra.mxu0 %v2827_v14  ;;  %v1273_v27 = vpop.xlane.xlu1 %1272 }
 0x727   : > { %4295 = vrcp.f32 %v1273_v27 }
 0x728   : > { %4297 = vpow2.f32 %v2740_v57  ;;  %607 = vadd.xlane.f32.xlu0 %v6064_v35 }
 0x729   : > { %4299 = vpow2.f32 %v2734_v52  ;;  %3989 = vmatmul.mubr.bf16.vlgmr.msra.gmra.mxu0 %v2779_v30 }
 0x72a   : > { %4301 = vpow2.f32 %v2738_v3  ;;  %3992 = vmatprep.mubr.bf16.mxu0 %v2780_v43  ;;  %v1277_v49 = vpop.xlane.xlu1 %1276  ;;  %v5593_v21 = vpop.eup %4285  ;;  %v6067_v43 = vld [vmem:[#allocation41_spill] sm:$0xff] }
 0x72b   : > { %v5595_v33 = vpop.eup %4287  ;;  %4303 = vpow2.f32 %v2744_v25 }
 0x72c   : > { %v5597_v15 = vpop.eup %4289  ;;  %v2781_v55 = vpack.c.bf16 %v5591_v9, %v5595_v33  ;;  %4305 = vpow2.f32 %v2742_v50 }
 0x72d   : > { %v2782_v12 = vpack.c.bf16 %v5593_v21, %v5597_v15  ;;  %4307 = vrcp.f32 %v1277_v49 }
 0x72e   : > { %v1281_v0 = vpop.xlane.xlu1 %1280 }
 0x730   : > { %v4292_v6 = vpop.eup %4291 }
 0x731   : > { %3993 = vmatmul.mubr.bf16.gmra.mxu0 %v2781_v55  ;;  %v1485_v18 = vmul.f32 %v4292_v6, %v6065_v19  ;;  %v5604_v36 = vpop.eup %4293  ;;  %v6068_v55 = vld [vmem:[#allocation43_spill] sm:$0xff] }
 0x732   : > { %3996 = vmatprep.mubr.bf16.mxu0 %v2782_v12  ;;  %v1285_v42 = vpop.xlane.xlu1 %1284 }
 0x733   : > { %v3415_v24 = vpack.c.bf16 %v1485_v18, %v1485_v18 }
 0x734   : > { %v4296_v62 = vpop.eup %4295 }
 0x735   : > { %v5606_v31 = vpop.eup %4297  ;;  %v1487_v32 = vmul.f32 %v4296_v62, %v6066_v29  ;;  %1549 = vrot.lane.b32.xlu1 %v3415_v24, %s4581_s7 }
 0x736   : > { %v5609_v1 = vpop.eup %4299  ;;  %v1289_v4 = vpop.xlane.xlu1 %1288 }
 0x737   : > { %v5612_v23 = vpop.eup %4301  ;;  %v2783_v2 = vpack.c.bf16 %v5604_v36, %v5609_v1  ;;  %v3417_v16 = vpack.c.bf16 %v1487_v32, %v1487_v32 }
 0x738   : > { %v2784_v59 = vpack.c.bf16 %v5606_v31, %v5612_v23  ;;  %v5619_v48 = vpop.eup %4303 }
 0x739   : > { %3997 = vmatmul.mubr.bf16.gmra.mxu0 %v2783_v2  ;;  %1553 = vrot.lane.b32.xlu1 %v3417_v16, %s4581_s7  ;;  %v5621_v11 = vpop.eup %4305 }
 0x73a   : > { %4000 = vmatprep.mubr.bf16.mxu0 %v2784_v59  ;;  %v1293_v61 = vpop.xlane.xlu1 %1292  ;;  %v2785_v8 = vpack.c.bf16 %v5619_v48, %v5621_v11  ;;  %v4308_v51 = vpop.eup %4307  ;;  %v6071_v59 = vld [vmem:[#allocation45_spill] sm:$0xff] }
 0x73b   : > { %v1489_v12 = vmul.f32 %v4308_v51, %v6068_v55 }
 0x73d   : > { %v3419_v32 = vpack.c.bf16 %v1489_v12, %v1489_v12 }
 0x73e   : > { %v1297_v58 = vpop.xlane.xlu1 %1296 }
 0x741   : > { %4001 = vmatmul.mubr.bf16.gmra.mxu0 %v2785_v8 }
 0x742   : > { %v5625_v63 = vpop.xlane.xlu1 %2007 }
 0x746   : > { %v5627_v39 = vpop.xlane.xlu1 %2011 }
 0x74a   : > { %v5629_v5 = vpop.xlane.xlu1 %2015 }
 0x74e   : > { %v5631_v13 = vpop.xlane.xlu1 %2019 }
 0x752   : > { %v5633_v17 = vpop.xlane.xlu1 %2023 }
 0x755   : > { %v1271_v26 = vpop.xlane.xlu0 %1270 }
 0x756   : > { %4309 = vrcp.f32 %v1271_v26  ;;  %v5635_v57 = vpop.xlane.xlu1 %2027 }
 0x757   : > { %4311 = vrcp.f32 %v1281_v0 }
 0x759   : > { %v1275_v46 = vpop.xlane.xlu0 %1274 }
 0x75a   : > { %4313 = vrcp.f32 %v1275_v46  ;;  %v5637_v14 = vpop.xlane.xlu1 %2031 }
 0x75b   : > { %4315 = vrcp.f32 %v1285_v42  ;;  %v6069_v42 = vld [vmem:[#allocation40_spill] sm:$0xff] }
 0x75d   : > { %v1279_v52 = vpop.xlane.xlu0 %1278 }
 0x75e   : > { %4317 = vrcp.f32 %v1279_v52  ;;  %v5639_v3 = vpop.xlane.xlu1 %2035 }
 0x75f   : > { %4319 = vrcp.f32 %v1289_v4  ;;  %v6070_v4 = vld [vmem:[#allocation42_spill] sm:$0xff] }
 0x761   : > { %v1283_v27 = vpop.xlane.xlu0 %1282 }
 0x762   : > { %4321 = vrcp.f32 %v1283_v27  ;;  %v578_v30 = vpop.xlane.xlu1 %577  ;;  %v6072_v27 = vld [vmem:[#allocation47_spill] sm:$0xff] }
 0x763   : > { %v4310_v35 = vpop.eup %4309  ;;  %4323 = vrcp.f32 %v578_v30 }
 0x764   : > { %v1486_v41 = vmul.f32 %v4310_v35, %v6067_v43  ;;  %4325 = vrcp.f32 %v1293_v61  ;;  %v4312_v25 = vpop.eup %4311  ;;  %v6073_v43 = vld [vmem:[#allocation44_spill] sm:$0xff] }
 0x765   : > { %v1287_v49 = vpop.xlane.xlu0 %1286  ;;  %v1491_v2 = vmul.f32 %v4312_v25, %v6070_v4  ;;  %v6077_v4 = vld [vmem:[#allocation22_spill] sm:$0xff] }
 0x766   : > { %4327 = vrcp.f32 %v1287_v49  ;;  %v582_v50 = vpop.xlane.xlu1 %581  ;;  %v3416_v0 = vpack.c.bf16 %v1486_v41, %v1486_v41  ;;  %v6074_v49 = vld [vmem:[#allocation23_spill] sm:$0xff] }
 0x767   : > { %v4314_v6 = vpop.eup %4313  ;;  %4329 = vrcp.f32 %v582_v50  ;;  %v3421_v52 = vpack.c.bf16 %v1491_v2, %v1491_v2 }
 0x768   : > { %1551 = vrot.lane.b32.xlu0 %v3416_v0, %s4581_s7  ;;  %v1488_v19 = vmul.f32 %v4314_v6, %v6069_v42  ;;  %4331 = vrcp.f32 %v1297_v58  ;;  %v4316_v62 = vpop.eup %4315  ;;  %v6075_v42 = vld [vmem:[#allocation46_spill] sm:$0xff] }
 0x769   : > { %v1291_v18 = vpop.xlane.xlu0 %1290  ;;  %v1493_v51 = vmul.f32 %v4316_v62, %v6072_v27 }
 0x76a   : > { %4333 = vrcp.f32 %v1291_v18  ;;  %v586_v24 = vpop.xlane.xlu1 %585  ;;  %v3418_v29 = vpack.c.bf16 %v1488_v19, %v1488_v19 }
 0x76b   : > { %v4318_v16 = vpop.eup %4317  ;;  %4335 = vrcp.f32 %v586_v24  ;;  %v3423_v6 = vpack.c.bf16 %v1493_v51, %v1493_v51 }
 0x76c   : > { %1555 = vrot.lane.b32.xlu1 %v3418_v29, %s4581_s7  ;;  %1557 = vrot.lane.b32.xlu0 %v3419_v32, %s4581_s7  ;;  %v1490_v61 = vmul.f32 %v4318_v16, %v6071_v59  ;;  %v4320_v26 = vpop.eup %4319  ;;  %v6076_v29 = vld [vmem:[#allocation49_spill] sm:$0xff] }
 0x76d   : > { %v1295_v8 = vpop.xlane.xlu0 %1294  ;;  %v1495_v19 = vmul.f32 %v4320_v26, %v6075_v42 }
 0x76e   : > { %4337 = vrcp.f32 %v1295_v8  ;;  %v590_v58 = vpop.xlane.xlu1 %589  ;;  %v3420_v46 = vpack.c.bf16 %v1490_v61, %v1490_v61 }
 0x76f   : > { %v4322_v30 = vpop.eup %4321  ;;  %4339 = vrcp.f32 %v590_v58  ;;  %v3425_v26 = vpack.c.bf16 %v1495_v19, %v1495_v19  ;;  %v6078_v58 = vld [vmem:[#allocation51_spill] sm:$0xff] }
 0x770   : > { %v4324_v35 = vpop.eup %4323  ;;  %1559 = vrot.lane.b32.xlu1 %v3420_v46, %s4581_s7  ;;  %1561 = vrot.lane.b32.xlu0 %v3421_v52, %s4581_s7  ;;  %v1492_v41 = vmul.f32 %v4322_v30, %v6073_v43  ;;  %v6079_v30 = vld [vmem:[#allocation48_spill] sm:$0xff]  ;;  %v6080_v43 = vld [vmem:[#allocation27_spill] sm:$0xff] }
 0x771   : > { %v778_v25 = vmul.f32 %v4324_v35, %v6074_v49  ;;  %v1299_v50 = vpop.xlane.xlu0 %1298  ;;  %v4326_v0 = vpop.eup %4325 }
 0x772   : > { %4341 = vrcp.f32 %v1299_v50  ;;  %v594_v55 = vpop.xlane.xlu1 %593  ;;  %v3422_v12 = vpack.c.bf16 %v1492_v41, %v1492_v41  ;;  %v1497_v46 = vmul.f32 %v4326_v0, %v6078_v58  ;;  %v6084_v58 = vld [vmem:[#allocation52_spill] sm:$0xff] }
 0x773   : > { %v4328_v18 = vpop.eup %4327  ;;  %v3399_v62 = vpack.c.bf16 %v778_v25, %v778_v25  ;;  %4343 = vrcp.f32 %v594_v55  ;;  %v6081_v55 = vld [vmem:[#allocation50_spill] sm:$0xff] }
 0x774   : > { %v4330_v24 = vpop.eup %4329  ;;  %1563 = vrot.lane.b32.xlu1 %v3422_v12, %s4581_s7  ;;  %1565 = vrot.lane.b32.xlu0 %v3423_v6, %s4581_s7  ;;  %v1494_v32 = vmul.f32 %v4328_v18, %v6076_v29  ;;  %v3427_v0 = vpack.c.bf16 %v1497_v46, %v1497_v46  ;;  %v6082_v18 = vld [vmem:[#allocation53_spill] sm:$0xff] }
 0x775   : > { %v780_v2 = vmul.f32 %v4330_v24, %v6077_v4  ;;  %v5659_v16 = vpop.xlane.xlu0 %2009  ;;  %859 = vst.msk [vmem:[%s5663_s8] sm:$0xf] %vm858_vm1, %v3399_v62  ;;  %v4332_v59 = vpop.eup %4331  ;;  %v6083_v24 = vld [vmem:[#allocation26_spill] sm:$0xff] }
 0x776   : > { %v598_v61 = vpop.xlane.xlu1 %597  ;;  %v3424_v8 = vpack.c.bf16 %v1494_v32, %v1494_v32  ;;  %v1499_v12 = vmul.f32 %v4332_v59, %v6081_v55 }
 0x777   : > { %v4334_v52 = vpop.eup %4333  ;;  %v3401_v27 = vpack.c.bf16 %v780_v2, %v780_v2  ;;  %4345 = vrcp.f32 %v598_v61 }
 0x778   : > { %v4336_v51 = vpop.eup %4335  ;;  %1567 = vrot.lane.b32.xlu1 %v3424_v8, %s4581_s7  ;;  %1569 = vrot.lane.b32.xlu0 %v3425_v26, %s4581_s7  ;;  %v1496_v35 = vmul.f32 %v4334_v52, %v6079_v30  ;;  %v3429_v59 = vpack.c.bf16 %v1499_v12, %v1499_v12  ;;  %v6085_v52 = vld [vmem:[#allocation31_spill] sm:$0xff] }
 0x779   : > { %v782_v41 = vmul.f32 %v4336_v51, %v6080_v43  ;;  %v5672_v49 = vpop.xlane.xlu0 %2013  ;;  %861 = vst.msk [vmem:[%s5663_s8 + $0x8] sm:$0xf] %vm858_vm1, %v3401_v27  ;;  %v6087_v12 = vld [vmem:[#allocation35_spill] sm:$0xff] }
 0x77a   : > { %v602_v25 = vpop.xlane.xlu1 %601  ;;  %v3426_v50 = vpack.c.bf16 %v1496_v35, %v1496_v35 }
 0x77b   : > { %v4338_v6 = vpop.eup %4337  ;;  %v3403_v42 = vpack.c.bf16 %v782_v41, %v782_v41  ;;  %4347 = vrcp.f32 %v602_v25  ;;  %v6086_v41 = vld [vmem:[#allocation30_spill] sm:$0xff] }
 0x77c   : > { %v4340_v19 = vpop.eup %4339  ;;  %1571 = vrot.lane.b32.xlu1 %v3426_v50, %s4581_s7  ;;  %1573 = vrot.lane.b32.xlu0 %v3427_v0, %s4581_s7  ;;  %v1498_v62 = vmul.f32 %v4338_v6, %v6082_v18 }
 0x77d   : > { %v784_v29 = vmul.f32 %v4340_v19, %v6083_v24  ;;  %v5681_v32 = vpop.xlane.xlu0 %2017  ;;  %863 = vst.msk [vmem:[%s5663_s8 + $0x10] sm:$0xf] %vm858_vm1, %v3403_v42 }
 0x77e   : > { %v606_v4 = vpop.xlane.xlu1 %605  ;;  %v3428_v2 = vpack.c.bf16 %v1498_v62, %v1498_v62  ;;  %v6088_v62 = vld [vmem:[#allocation34_spill] sm:$0xff] }
 0x77f   : > { %v4342_v61 = vpop.eup %4341  ;;  %v3405_v8 = vpack.c.bf16 %v784_v29, %v784_v29  ;;  %4349 = vrcp.f32 %v606_v4 }
 0x780   : > { %v4344_v26 = vpop.eup %4343  ;;  %1575 = vrot.lane.b32.xlu1 %v3428_v2, %s4581_s7  ;;  %1577 = vrot.lane.b32.xlu0 %v3429_v59, %s4581_s7  ;;  %v1500_v46 = vmul.f32 %v4342_v61, %v6084_v58 }
 0x781   : > { %v786_v27 = vmul.f32 %v4344_v26, %v6085_v52  ;;  %v5689_v51 = vpop.xlane.xlu0 %2021  ;;  %865 = vst.msk [vmem:[%s5663_s8 + $0x18] sm:$0xf] %vm858_vm1, %v3405_v8 }
 0x782   : > { %v3430_v30 = vpack.c.bf16 %v1500_v46, %v1500_v46  ;;  %v6089_v46 = vld [vmem:[#allocation25_spill] sm:$0xff] }
 0x783   : > { %v3407_v35 = vpack.c.bf16 %v786_v27, %v786_v27 }
 0x784   : > { %v4346_v43 = vpop.eup %4345  ;;  %1579 = vrot.lane.b32.xlu1 %v3430_v30, %s4581_s7 }
 0x785   : > { %v788_v25 = vmul.f32 %v4346_v43, %v6086_v41  ;;  %v5695_v50 = vpop.xlane.xlu0 %2025  ;;  %867 = vst.msk [vmem:[%s5663_s8 + $0x20] sm:$0xf] %vm858_vm1, %v3407_v35  ;;  %v6090_v43 = vld [vmem:[#allocation24_spill] sm:$0xff] }
 0x787   : > { %v3409_v0 = vpack.c.bf16 %v788_v25, %v788_v25 }
 0x788   : > { %v4348_v55 = vpop.eup %4347 }
 0x789   : > { %v790_v6 = vmul.f32 %v4348_v55, %v6087_v12  ;;  %v5700_v42 = vpop.xlane.xlu0 %2029  ;;  %869 = vst.msk [vmem:[%s5663_s8 + $0x28] sm:$0xf] %vm858_vm1, %v3409_v0  ;;  %v6091_v55 = vld [vmem:[#allocation29_spill] sm:$0xff] }
 0x78b   : > { %v3411_v19 = vpack.c.bf16 %v790_v6, %v790_v6 }
 0x78c   : > { %v4350_v18 = vpop.eup %4349 }
 0x78d   : > { %v792_v24 = vmul.f32 %v4350_v18, %v6088_v62  ;;  %v5705_v29 = vpop.xlane.xlu0 %2033  ;;  %871 = vst.msk [vmem:[%s5663_s8 + $0x30] sm:$0xf] %vm858_vm1, %v3411_v19  ;;  %v6092_v18 = vld [vmem:[#allocation28_spill] sm:$0xff] }
 0x78f   : > { %v3413_v4 = vpack.c.bf16 %v792_v24, %v792_v24 }
 0x791   : > { %v5709_v2 = vpop.xlane.xlu0 %2037  ;;  %873 = vst.msk [vmem:[%s5663_s8 + $0x38] sm:$0xf] %vm858_vm1, %v3413_v4  ;;  %v6093_v4 = vld [vmem:[#allocation33_spill] sm:$0xff] }
 0x795   : > { %v580_v59 = vpop.xlane.xlu0 %579 }
 0x796   : > { %4351 = vrcp.f32 %v580_v59 }
 0x799   : > { %v584_v61 = vpop.xlane.xlu0 %583 }
 0x79a   : > { %4353 = vrcp.f32 %v584_v61 }
 0x79d   : > { %v588_v8 = vpop.xlane.xlu0 %587 }
 0x79e   : > { %4355 = vrcp.f32 %v588_v8 }
 0x79f   : > { %2752 = vadd.xlane.f32.xlu0 %v5575_v45 }
 0x7a1   : > { %v592_v26 = vpop.xlane.xlu0 %591 }
 0x7a2   : > { %4357 = vrcp.f32 %v592_v26 }
 0x7a3   : > { %v4352_v58 = vpop.eup %4351  ;;  %2748 = vadd.xlane.f32.xlu0 %v5561_v54 }
 0x7a4   : > { %v779_v52 = vmul.f32 %v4352_v58, %v6089_v46 }
 0x7a5   : > { %v596_v27 = vpop.xlane.xlu0 %595 }
 0x7a6   : > { %v3400_v30 = vpack.c.bf16 %v779_v52, %v779_v52  ;;  %4359 = vrcp.f32 %v596_v27 }
 0x7a7   : > { %v4354_v35 = vpop.eup %4353  ;;  %2760 = vadd.xlane.f32.xlu0 %v5591_v9  ;;  %v1550_v45 = vpop.permute.xlu1 %1549 }
 0x7a8   : > { %v781_v41 = vmul.f32 %v4354_v35, %v6090_v43  ;;  %860 = vst.msk [vmem:[%s5663_s8 + $0x4] sm:$0xf] %vm858_vm1, %v3400_v30  ;;  %2750 = vadd.xlane.f32.xlu1 %v5580_v7 }
 0x7a9   : > { %1598 = vst.msk [vmem:[%s5663_s8] sm:$0xf] %vm1597_vm2, %v1550_v45  ;;  %v600_v54 = vpop.xlane.xlu0 %599 }
 0x7aa   : > { %v3402_v25 = vpack.c.bf16 %v781_v41, %v781_v41  ;;  %4361 = vrcp.f32 %v600_v54 }
 0x7ab   : > { %v4356_v0 = vpop.eup %4355  ;;  %2756 = vadd.xlane.f32.xlu0 %v5578_v40  ;;  %v1554_v9 = vpop.permute.xlu1 %1553 }
 0x7ac   : > { %v783_v12 = vmul.f32 %v4356_v0, %v6091_v55  ;;  %862 = vst.msk [vmem:[%s5663_s8 + $0xc] sm:$0xf] %vm858_vm1, %v3402_v25  ;;  %2746 = vadd.xlane.f32.xlu1 %v5558_v53  ;;  %v6097_v25 = vld [vmem:[#allocation54_spill] sm:$0xff] }
 0x7ad   : > { %1600 = vst.msk [vmem:[%s5663_s8 + $0x8] sm:$0xf] %vm1597_vm2, %v1554_v9  ;;  %v604_v7 = vpop.xlane.xlu0 %603 }
 0x7ae   : > { %v3404_v6 = vpack.c.bf16 %v783_v12, %v783_v12  ;;  %4363 = vrcp.f32 %v604_v7 }
 0x7af   : > { %v4358_v19 = vpop.eup %4357  ;;  %2768 = vadd.xlane.f32.xlu0 %v5604_v36 }
 0x7b0   : > { %v785_v62 = vmul.f32 %v4358_v19, %v6092_v18  ;;  %864 = vst.msk [vmem:[%s5663_s8 + $0x14] sm:$0xf] %vm858_vm1, %v3404_v6  ;;  %2758 = vadd.xlane.f32.xlu1 %v5595_v33  ;;  %v6094_v33 = vld [vmem:[#allocation32_spill] sm:$0xff]  ;;  %v6098_v19 = vld [vmem:[#allocation55_spill] sm:$0xff]  ;;  %v6099_v18 = vld [vmem:[#allocation57_spill] sm:$0xff] }
 0x7b1   : > { %v608_v40 = vpop.xlane.xlu0 %607 }
 0x7b2   : > { %v3406_v24 = vpack.c.bf16 %v785_v62, %v785_v62  ;;  %4365 = vrcp.f32 %v608_v40 }
 0x7b3   : > { %v4360_v53 = vpop.eup %4359  ;;  %2764 = vadd.xlane.f32.xlu0 %v5593_v21  ;;  %4367 = vrcp.f32 %v5625_v63 }
 0x7b4   : > { %v787_v59 = vmul.f32 %v4360_v53, %v6093_v4  ;;  %866 = vst.msk [vmem:[%s5663_s8 + $0x1c] sm:$0xf] %vm858_vm1, %v3406_v24  ;;  %2754 = vadd.xlane.f32.xlu1 %v5582_v47  ;;  %v6095_v47 = vld [vmem:[#allocation37_spill] sm:$0xff]  ;;  %4369 = vrcp.f32 %v5627_v39 }
 0x7b5   : > { %4371 = vrcp.f32 %v5659_v16 }
 0x7b6   : > { %v3408_v36 = vpack.c.bf16 %v787_v59, %v787_v59  ;;  %4373 = vrcp.f32 %v5629_v5 }
 0x7b7   : > { %v4362_v61 = vpop.eup %4361  ;;  %2776 = vadd.xlane.f32.xlu0 %v5619_v48  ;;  %4375 = vrcp.f32 %v5672_v49 }
 0x7b8   : > { %868 = vst.msk [vmem:[%s5663_s8 + $0x24] sm:$0xf] %vm858_vm1, %v3408_v36  ;;  %v789_v8 = vmul.f32 %v4362_v61, %v6094_v33  ;;  %2766 = vadd.xlane.f32.xlu1 %v5609_v1  ;;  %v6096_v1 = vld [vmem:[#allocation36_spill] sm:$0xff]  ;;  %4377 = vrcp.f32 %v5631_v13  ;;  %v6100_v36 = vld [vmem:[#allocation59_spill] sm:$0xff] }
 0x7b9   : > { %4379 = vrcp.f32 %v5681_v32  ;;  %v6101_v33 = vld [vmem:[#allocation56_spill] sm:$0xff] }
 0x7ba   : > { %v3410_v26 = vpack.c.bf16 %v789_v8, %v789_v8  ;;  %4381 = vrcp.f32 %v5633_v17 }
 0x7bb   : > { %v4364_v58 = vpop.eup %4363  ;;  %2772 = vadd.xlane.f32.xlu0 %v5606_v31  ;;  %4383 = vrcp.f32 %v5689_v51 }
 0x7bc   : > { %870 = vst.msk [vmem:[%s5663_s8 + $0x2c] sm:$0xf] %vm858_vm1, %v3410_v26  ;;  %v791_v21 = vmul.f32 %v4364_v58, %v6095_v47  ;;  %2762 = vadd.xlane.f32.xlu1 %v5597_v15  ;;  %4385 = vrcp.f32 %v5635_v57 }
 0x7bd   : > { %4387 = vrcp.f32 %v5695_v50 }
 0x7be   : > { %v3412_v48 = vpack.c.bf16 %v791_v21, %v791_v21  ;;  %4389 = vrcp.f32 %v5637_v14 }
 0x7bf   : > { %v4366_v46 = vpop.eup %4365  ;;  %4391 = vrcp.f32 %v5700_v42 }
 0x7c0   : > { %872 = vst.msk [vmem:[%s5663_s8 + $0x34] sm:$0xf] %vm858_vm1, %v3412_v48  ;;  %v793_v52 = vmul.f32 %v4366_v46, %v6096_v1  ;;  %2774 = vadd.xlane.f32.xlu1 %v5621_v11  ;;  %v4368_v15 = vpop.eup %4367  ;;  %4393 = vrcp.f32 %v5639_v3  ;;  %v6102_v46 = vld [vmem:[#allocation58_spill] sm:$0xff] }
 0x7c1   : > { %v4370_v63 = vpop.eup %4369  ;;  %v2224_v11 = vmul.f32 %v4368_v15, %v5429_v22  ;;  %4395 = vrcp.f32 %v5705_v29 }
 0x7c2   : > { %v3414_v31 = vpack.c.bf16 %v793_v52, %v793_v52  ;;  %v4372_v39 = vpop.eup %4371  ;;  %v2226_v5 = vmul.f32 %v4370_v63, %v5427_v60  ;;  %4397 = vrcp.f32 %v5709_v2 }
 0x7c3   : > { %v4374_v16 = vpop.eup %4373  ;;  %v2225_v13 = vmul.f32 %v4372_v39, %v5433_v44 }
 0x7c4   : > { %874 = vst.msk [vmem:[%s5663_s8 + $0x3c] sm:$0xf] %vm858_vm1, %v3414_v31  ;;  %2770 = vadd.xlane.f32.xlu1 %v5612_v23  ;;  %v3431_v23 = vpack.c.bf16 %v2224_v11, %v2224_v11  ;;  %v4376_v49 = vpop.eup %4375  ;;  %v3433_v17 = vpack.c.bf16 %v2226_v5, %v2226_v5  ;;  %v2228_v60 = vmul.f32 %v4374_v16, %v5437_v38 }
 0x7c5   : > { %v4378_v32 = vpop.eup %4377  ;;  %v3432_v22 = vpack.c.bf16 %v2225_v13, %v2225_v13  ;;  %v2227_v57 = vmul.f32 %v4376_v49, %v5431_v28 }
 0x7c6   : > { %v4380_v51 = vpop.eup %4379  ;;  %v2230_v44 = vmul.f32 %v4378_v32, %v5435_v34  ;;  %v3435_v42 = vpack.c.bf16 %v2228_v60, %v2228_v60 }
 0x7c7   : > { %v4382_v14 = vpop.eup %4381  ;;  %v3434_v50 = vpack.c.bf16 %v2227_v57, %v2227_v57  ;;  %v2229_v27 = vmul.f32 %v4380_v51, %v5441_v56 }
 0x7c8   : > { %v4384_v28 = vpop.eup %4383  ;;  %v3437_v30 = vpack.c.bf16 %v2230_v44, %v2230_v44  ;;  %v2232_v29 = vmul.f32 %v4382_v14, %v5445_v37 }
 0x7c9   : > { %v4386_v35 = vpop.eup %4385  ;;  %v3436_v34 = vpack.c.bf16 %v2229_v27, %v2229_v27  ;;  %v2231_v3 = vmul.f32 %v4384_v28, %v5439_v20 }
 0x7ca   : > { %v4388_v56 = vpop.eup %4387  ;;  %v3439_v54 = vpack.c.bf16 %v2232_v29, %v2232_v29  ;;  %v2234_v37 = vmul.f32 %v4386_v35, %v6097_v25 }
 0x7cb   : > { %v4390_v45 = vpop.eup %4389  ;;  %v3438_v2 = vpack.c.bf16 %v2231_v3, %v2231_v3  ;;  %v2233_v20 = vmul.f32 %v4388_v56, %v5449_v10 }
 0x7cc   : > { %v4392_v0 = vpop.eup %4391  ;;  %v3441_v6 = vpack.c.bf16 %v2234_v37, %v2234_v37  ;;  %v2236_v62 = vmul.f32 %v4390_v45, %v6099_v18 }
 0x7cd   : > { %v4394_v9 = vpop.eup %4393  ;;  %v3440_v7 = vpack.c.bf16 %v2233_v20, %v2233_v20  ;;  %v2235_v10 = vmul.f32 %v4392_v0, %v6098_v19 }
 0x7ce   : > { %v4396_v40 = vpop.eup %4395  ;;  %v3443_v59 = vpack.c.bf16 %v2236_v62, %v2236_v62  ;;  %v2238_v8 = vmul.f32 %v4394_v9, %v6101_v33 }
 0x7cf   : > { %v3442_v4 = vpack.c.bf16 %v2235_v10, %v2235_v10  ;;  %v2237_v61 = vmul.f32 %v4396_v40, %v6100_v36  ;;  %v4398_v26 = vpop.eup %4397 }
 0x7d0   : > { %v3445_v48 = vpack.c.bf16 %v2238_v8, %v2238_v8  ;;  %v2239_v1 = vmul.f32 %v4398_v26, %v6102_v46 }
 0x7d1   : > { %2288 = vrot.lane.b32.xlu0 %v3431_v23, %s4580_s3  ;;  %v3444_v21 = vpack.c.bf16 %v2237_v61, %v2237_v61 }
 0x7d2   : > { %v3446_v15 = vpack.c.bf16 %v2239_v1, %v2239_v1 }
 0x7d5   : > { %2290 = vrot.lane.b32.xlu1 %v3432_v22, %s4580_s3  ;;  %2292 = vrot.lane.b32.xlu0 %v3433_v17, %s4580_s3 }
 0x7d9   : > { %2294 = vrot.lane.b32.xlu1 %v3434_v50, %s4580_s3  ;;  %2296 = vrot.lane.b32.xlu0 %v3435_v42, %s4580_s3 }
 0x7da   : > { %v1552_v38 = vpop.permute.xlu0 %1551 }
 0x7db   : > { %1599 = vst.msk [vmem:[%s5663_s8 + $0x4] sm:$0xf] %vm1597_vm2, %v1552_v38 }
 0x7dd   : > { %2298 = vrot.lane.b32.xlu1 %v3436_v34, %s4580_s3  ;;  %2300 = vrot.lane.b32.xlu0 %v3437_v30, %s4580_s3 }
 0x7de   : > { %v1558_v43 = vpop.permute.xlu0 %1557  ;;  %v1556_v41 = vpop.permute.xlu1 %1555 }
 0x7df   : > { %1602 = vst.msk [vmem:[%s5663_s8 + $0x10] sm:$0xf] %vm1597_vm2, %v1558_v43  ;;  %1601 = vst.msk [vmem:[%s5663_s8 + $0xc] sm:$0xf] %vm1597_vm2, %v1556_v41 }
 0x7e1   : > { %2302 = vrot.lane.b32.xlu1 %v3438_v2, %s4580_s3  ;;  %2304 = vrot.lane.b32.xlu0 %v3439_v54, %s4580_s3 }
 0x7e2   : > { %v1562_v55 = vpop.permute.xlu0 %1561  ;;  %v1560_v12 = vpop.permute.xlu1 %1559 }
 0x7e3   : > { %1604 = vst.msk [vmem:[%s5663_s8 + $0x18] sm:$0xf] %vm1597_vm2, %v1562_v55  ;;  %1603 = vst.msk [vmem:[%s5663_s8 + $0x14] sm:$0xf] %vm1597_vm2, %v1560_v12 }
 0x7e5   : > { %2306 = vrot.lane.b32.xlu1 %v3440_v7, %s4580_s3  ;;  %2308 = vrot.lane.b32.xlu0 %v3441_v6, %s4580_s3 }
 0x7e6   : > { %v1566_v24 = vpop.permute.xlu0 %1565  ;;  %v1564_v53 = vpop.permute.xlu1 %1563 }
 0x7e7   : > { %1606 = vst.msk [vmem:[%s5663_s8 + $0x20] sm:$0xf] %vm1597_vm2, %v1566_v24  ;;  %1605 = vst.msk [vmem:[%s5663_s8 + $0x1c] sm:$0xf] %vm1597_vm2, %v1564_v53 }
 0x7e9   : > { %2310 = vrot.lane.b32.xlu1 %v3442_v4, %s4580_s3  ;;  %2312 = vrot.lane.b32.xlu0 %v3443_v59, %s4580_s3  ;;  %v3990_v5 = vpop.f32.mrf.mxu0 }
 0x7ea   : > { %v1570_v58 = vpop.permute.xlu0 %1569  ;;  %v1568_v47 = vpop.permute.xlu1 %1567 }
 0x7eb   : > { %1608 = vst.msk [vmem:[%s5663_s8 + $0x28] sm:$0xf] %vm1597_vm2, %v1570_v58  ;;  %1607 = vst.msk [vmem:[%s5663_s8 + $0x24] sm:$0xf] %vm1597_vm2, %v1568_v47  ;;  %v2884_v16 = vpop.f32.mrf.mxu0 }
 0x7ed   : > { %2314 = vrot.lane.b32.xlu1 %v3444_v21, %s4580_s3  ;;  %2316 = vrot.lane.b32.xlu0 %v3445_v48, %s4580_s3  ;;  %v3991_v23 = vpop.f32.mrf.mxu0 }
 0x7ee   : > { %v1574_v52 = vpop.permute.xlu0 %1573  ;;  %v1572_v31 = vpop.permute.xlu1 %1571 }
 0x7ef   : > { %1610 = vst.msk [vmem:[%s5663_s8 + $0x30] sm:$0xf] %vm1597_vm2, %v1574_v52  ;;  %1609 = vst.msk [vmem:[%s5663_s8 + $0x2c] sm:$0xf] %vm1597_vm2, %v1572_v31  ;;  %v2887_v13 = vpop.f32.mrf.mxu0 }
 0x7f1   : > { %2318 = vrot.lane.b32.xlu1 %v3446_v15, %s4580_s3  ;;  %v5833_v49 = vpop.f32.mrf.mxu0 }
 0x7f2   : > { %v1578_v63 = vpop.permute.xlu0 %1577  ;;  %v1576_v11 = vpop.permute.xlu1 %1575 }
 0x7f3   : > { %1612 = vst.msk [vmem:[%s5663_s8 + $0x38] sm:$0xf] %vm1597_vm2, %v1578_v63  ;;  %1611 = vst.msk [vmem:[%s5663_s8 + $0x34] sm:$0xf] %vm1597_vm2, %v1576_v11  ;;  %v5835_v32 = vpop.f32.mrf.mxu0 }
 0x7f5   : > { %v3995_v57 = vpop.f32.mrf.mxu0 }
 0x7f6   : > { %v1580_v39 = vpop.permute.xlu1 %1579 }
 0x7f7   : > { %1613 = vst.msk [vmem:[%s5663_s8 + $0x3c] sm:$0xf] %vm1597_vm2, %v1580_v39  ;;  %v2903_v44 = vpop.f32.mrf.mxu0 }
 0x7f9   : > { %v5837_v27 = vpop.f32.mrf.mxu0 }
 0x7fb   : > { %v5839_v3 = vpop.f32.mrf.mxu0 }
 0x7fd   : > { %v3999_v2 = vpop.f32.mrf.mxu0 }
 0x7ff   : > { %v2919_v9 = vpop.f32.mrf.mxu0 }
 0x801   : > { %v5845_v53 = vpop.f32.mrf.mxu0 }
 0x803   : > { %v2932_v47 = vpop.f32.mrf.mxu0 }
 0x805   : > { %v4003_v63 = vpop.f32.mrf.mxu0 }
 0x828   : > { %v2753_v17 = vpop.xlane.xlu0 %2752 }
 0x829   : > { %4399 = vrcp.f32 %v2753_v17  ;;  %v2935_v17 = vpop.f32.mrf.mxu0 }
 0x82c   : > { %v2749_v22 = vpop.xlane.xlu0 %2748 }
 0x82d   : > { %4401 = vrcp.f32 %v2749_v22 }
 0x830   : > { %v2761_v60 = vpop.xlane.xlu0 %2760 }
 0x831   : > { %4403 = vrcp.f32 %v2761_v60  ;;  %v2751_v51 = vpop.xlane.xlu1 %2750 }
 0x832   : > { %4405 = vrcp.f32 %v2751_v51 }
 0x834   : > { %v2757_v14 = vpop.xlane.xlu0 %2756 }
 0x835   : > { %4407 = vrcp.f32 %v2757_v14  ;;  %v2747_v50 = vpop.xlane.xlu1 %2746 }
 0x836   : > { %v4400_v42 = vpop.eup %4399  ;;  %4409 = vrcp.f32 %v2747_v50 }
 0x837   : > { %v2966_v28 = vmul.f32 %v4400_v42, %v3991_v23 }
 0x838   : > { %v2769_v38 = vpop.xlane.xlu0 %2768 }
 0x839   : > { %4411 = vrcp.f32 %v2769_v38  ;;  %v2759_v30 = vpop.xlane.xlu1 %2758  ;;  %v3450_v35 = vpack.c.bf16 %v2966_v28, %v2966_v28 }
 0x83a   : > { %v4402_v34 = vpop.eup %4401  ;;  %4413 = vrcp.f32 %v2759_v30 }
 0x83b   : > { %3033 = vrot.lane.b32.xlu1 %v3450_v35, %s4579_s21  ;;  %v2964_v29 = vmul.f32 %v4402_v34, %v2887_v13 }
 0x83c   : > { %v2765_v56 = vpop.xlane.xlu0 %2764 }
 0x83d   : > { %4415 = vrcp.f32 %v2765_v56  ;;  %v2755_v43 = vpop.xlane.xlu1 %2754  ;;  %v3448_v41 = vpack.c.bf16 %v2964_v29, %v2964_v29 }
 0x83e   : > { %v4404_v45 = vpop.eup %4403  ;;  %4417 = vrcp.f32 %v2755_v43 }
 0x83f   : > { %v4406_v54 = vpop.eup %4405  ;;  %3029 = vrot.lane.b32.xlu1 %v3448_v41, %s4579_s21  ;;  %v2970_v20 = vmul.f32 %v4404_v45, %v3995_v57 }
 0x840   : > { %v2777_v25 = vpop.xlane.xlu0 %2776  ;;  %v2965_v37 = vmul.f32 %v4406_v54, %v3990_v5 }
 0x841   : > { %v2767_v0 = vpop.xlane.xlu1 %2766  ;;  %v3454_v55 = vpack.c.bf16 %v2970_v20, %v2970_v20 }
 0x842   : > { %v4408_v12 = vpop.eup %4407  ;;  %4419 = vrcp.f32 %v2767_v0  ;;  %v3449_v7 = vpack.c.bf16 %v2965_v37, %v2965_v37 }
 0x843   : > { %v4410_v6 = vpop.eup %4409  ;;  %3041 = vrot.lane.b32.xlu1 %v3454_v55, %s4579_s21  ;;  %v2968_v19 = vmul.f32 %v4408_v12, %v2903_v44  ;;  %4421 = vrcp.f32 %v2777_v25 }
 0x844   : > { %v2773_v10 = vpop.xlane.xlu0 %2772  ;;  %3031 = vrot.lane.b32.xlu0 %v3449_v7, %s4579_s21  ;;  %v2963_v18 = vmul.f32 %v4410_v6, %v2884_v16 }
 0x845   : > { %4423 = vrcp.f32 %v2773_v10  ;;  %v2763_v62 = vpop.xlane.xlu1 %2762  ;;  %v3452_v40 = vpack.c.bf16 %v2968_v19, %v2968_v19 }
 0x846   : > { %v4412_v24 = vpop.eup %4411  ;;  %4425 = vrcp.f32 %v2763_v62  ;;  %v3447_v4 = vpack.c.bf16 %v2963_v18, %v2963_v18 }
 0x847   : > { %v4414_v59 = vpop.eup %4413  ;;  %3037 = vrot.lane.b32.xlu1 %v3452_v40, %s4579_s21  ;;  %v2974_v36 = vmul.f32 %v4412_v24, %v3999_v2 }
 0x848   : > { %v2289_v61 = vpop.permute.xlu0 %2288  ;;  %3027 = vrot.lane.b32.xlu0 %v3447_v4, %s4579_s21  ;;  %v2969_v33 = vmul.f32 %v4414_v59, %v5833_v49 }
 0x849   : > { %2337 = vst.msk [vmem:[%s5663_s8] sm:$0xf] %vm2336_vm3, %v2289_v61  ;;  %v2775_v8 = vpop.xlane.xlu1 %2774  ;;  %v3458_v26 = vpack.c.bf16 %v2974_v36, %v2974_v36 }
 0x84a   : > { %v4416_v58 = vpop.eup %4415  ;;  %v3453_v21 = vpack.c.bf16 %v2969_v33, %v2969_v33  ;;  %4427 = vrcp.f32 %v2775_v8 }
 0x84b   : > { %v4418_v48 = vpop.eup %4417  ;;  %3049 = vrot.lane.b32.xlu1 %v3458_v26, %s4579_s21  ;;  %v2972_v46 = vmul.f32 %v4416_v58, %v2919_v9 }
 0x84c   : > { %v2293_v1 = vpop.permute.xlu0 %2292  ;;  %3039 = vrot.lane.b32.xlu0 %v3453_v21, %s4579_s21  ;;  %v2967_v52 = vmul.f32 %v4418_v48, %v5835_v32 }
 0x84d   : > { %2339 = vst.msk [vmem:[%s5663_s8 + $0x8] sm:$0xf] %vm2336_vm3, %v2293_v1  ;;  %v2771_v31 = vpop.xlane.xlu1 %2770  ;;  %v3456_v15 = vpack.c.bf16 %v2972_v46, %v2972_v46 }
 0x84e   : > { %4429 = vrcp.f32 %v2771_v31  ;;  %v3451_v11 = vpack.c.bf16 %v2967_v52, %v2967_v52 }
 0x84f   : > { %v4420_v39 = vpop.eup %4419  ;;  %3045 = vrot.lane.b32.xlu1 %v3456_v15, %s4579_s21 }
 0x850   : > { %v2297_v5 = vpop.permute.xlu0 %2296  ;;  %3035 = vrot.lane.b32.xlu0 %v3451_v11, %s4579_s21  ;;  %v2973_v16 = vmul.f32 %v4420_v39, %v5837_v27  ;;  %v4422_v23 = vpop.eup %4421 }
 0x851   : > { %2341 = vst.msk [vmem:[%s5663_s8 + $0x10] sm:$0xf] %vm2336_vm3, %v2297_v5  ;;  %v2291_v13 = vpop.permute.xlu1 %2290  ;;  %v2978_v50 = vmul.f32 %v4422_v23, %v4003_v63 }
 0x852   : > { %v4424_v49 = vpop.eup %4423  ;;  %2338 = vst.msk [vmem:[%s5663_s8 + $0x4] sm:$0xf] %vm2336_vm3, %v2291_v13  ;;  %v3457_v32 = vpack.c.bf16 %v2973_v16, %v2973_v16 }
 0x853   : > { %v4426_v22 = vpop.eup %4425  ;;  %v2976_v57 = vmul.f32 %v4424_v49, %v2935_v17  ;;  %v3462_v38 = vpack.c.bf16 %v2978_v50, %v2978_v50 }
 0x854   : > { %v2301_v60 = vpop.permute.xlu0 %2300  ;;  %3047 = vrot.lane.b32.xlu0 %v3457_v32, %s4579_s21  ;;  %v2971_v51 = vmul.f32 %v4426_v22, %v5839_v3 }
 0x855   : > { %2343 = vst.msk [vmem:[%s5663_s8 + $0x18] sm:$0xf] %vm2336_vm3, %v2301_v60  ;;  %v2295_v44 = vpop.permute.xlu1 %2294  ;;  %v3460_v14 = vpack.c.bf16 %v2976_v57, %v2976_v57 }
 0x856   : > { %2340 = vst.msk [vmem:[%s5663_s8 + $0xc] sm:$0xf] %vm2336_vm3, %v2295_v44  ;;  %v3455_v42 = vpack.c.bf16 %v2971_v51, %v2971_v51 }
 0x857   : > { %3053 = vrot.lane.b32.xlu1 %v3460_v14, %s4579_s21  ;;  %v4428_v30 = vpop.eup %4427 }
 0x858   : > { %v2305_v27 = vpop.permute.xlu0 %2304  ;;  %3043 = vrot.lane.b32.xlu0 %v3455_v42, %s4579_s21  ;;  %v2977_v43 = vmul.f32 %v4428_v30, %v5845_v53 }
 0x859   : > { %2345 = vst.msk [vmem:[%s5663_s8 + $0x20] sm:$0xf] %vm2336_vm3, %v2305_v27  ;;  %v2299_v28 = vpop.permute.xlu1 %2298 }
 0x85a   : > { %2342 = vst.msk [vmem:[%s5663_s8 + $0x14] sm:$0xf] %vm2336_vm3, %v2299_v28  ;;  %v3461_v2 = vpack.c.bf16 %v2977_v43, %v2977_v43 }
 0x85b   : > { %v4430_v35 = vpop.eup %4429  ;;  %3057 = vrot.lane.b32.xlu1 %v3462_v38, %s4579_s21 }
 0x85c   : > { %v2309_v34 = vpop.permute.xlu0 %2308  ;;  %v2975_v3 = vmul.f32 %v4430_v35, %v2932_v47 }
 0x85d   : > { %2347 = vst.msk [vmem:[%s5663_s8 + $0x28] sm:$0xf] %vm2336_vm3, %v2309_v34  ;;  %v2303_v29 = vpop.permute.xlu1 %2302 }
 0x85e   : > { %2344 = vst.msk [vmem:[%s5663_s8 + $0x1c] sm:$0xf] %vm2336_vm3, %v2303_v29  ;;  %v3459_v56 = vpack.c.bf16 %v2975_v3, %v2975_v3 }
 0x860   : > { %v2313_v41 = vpop.permute.xlu0 %2312  ;;  %3051 = vrot.lane.b32.xlu0 %v3459_v56, %s4579_s21 }
 0x861   : > { %2349 = vst.msk [vmem:[%s5663_s8 + $0x30] sm:$0xf] %vm2336_vm3, %v2313_v41  ;;  %v2307_v45 = vpop.permute.xlu1 %2306 }
 0x862   : > { %2346 = vst.msk [vmem:[%s5663_s8 + $0x24] sm:$0xf] %vm2336_vm3, %v2307_v45 }
 0x864   : > { %v2317_v54 = vpop.permute.xlu0 %2316  ;;  %3055 = vrot.lane.b32.xlu0 %v3461_v2, %s4579_s21 }
 0x865   : > { %2351 = vst.msk [vmem:[%s5663_s8 + $0x38] sm:$0xf] %vm2336_vm3, %v2317_v54  ;;  %v2311_v20 = vpop.permute.xlu1 %2310 }
 0x866   : > { %2348 = vst.msk [vmem:[%s5663_s8 + $0x2c] sm:$0xf] %vm2336_vm3, %v2311_v20 }
 0x869   : > { %v2315_v25 = vpop.permute.xlu1 %2314 }
 0x86a   : > { %2350 = vst.msk [vmem:[%s5663_s8 + $0x34] sm:$0xf] %vm2336_vm3, %v2315_v25 }
 0x86d   : > { %v2319_v37 = vpop.permute.xlu1 %2318 }
 0x86e   : > { %2352 = vst.msk [vmem:[%s5663_s8 + $0x3c] sm:$0xf] %vm2336_vm3, %v2319_v37 }
 0x8ad   : > { %v3034_v0 = vpop.permute.xlu1 %3033 }
 0x8ae   : > { %3079 = vst.msk [vmem:[%s5663_s8 + $0xc] sm:$0xf] %vm3075_vm4, %v3034_v0 }
 0x8b1   : > { %v3030_v55 = vpop.permute.xlu1 %3029 }
 0x8b2   : > { %3077 = vst.msk [vmem:[%s5663_s8 + $0x4] sm:$0xf] %vm3075_vm4, %v3030_v55 }
 0x8b5   : > { %v3042_v12 = vpop.permute.xlu1 %3041 }
 0x8b6   : > { %3083 = vst.msk [vmem:[%s5663_s8 + $0x1c] sm:$0xf] %vm3075_vm4, %v3042_v12  ;;  %v3032_v9 = vpop.permute.xlu0 %3031 }
 0x8b7   : > { %3078 = vst.msk [vmem:[%s5663_s8 + $0x8] sm:$0xf] %vm3075_vm4, %v3032_v9 }
 0x8b9   : > { %v3038_v7 = vpop.permute.xlu1 %3037 }
 0x8ba   : > { %3081 = vst.msk [vmem:[%s5663_s8 + $0x14] sm:$0xf] %vm3075_vm4, %v3038_v7  ;;  %v3028_v6 = vpop.permute.xlu0 %3027 }
 0x8bb   : > { %3076 = vst.msk [vmem:[%s5663_s8] sm:$0xf] %vm3075_vm4, %v3028_v6 }
 0x8bd   : > { %v3050_v19 = vpop.permute.xlu1 %3049 }
 0x8be   : > { %3087 = vst.msk [vmem:[%s5663_s8 + $0x2c] sm:$0xf] %vm3075_vm4, %v3050_v19  ;;  %v3040_v10 = vpop.permute.xlu0 %3039 }
 0x8bf   : > { %3082 = vst.msk [vmem:[%s5663_s8 + $0x18] sm:$0xf] %vm3075_vm4, %v3040_v10 }
 0x8c1   : > { %v3046_v18 = vpop.permute.xlu1 %3045 }
 0x8c2   : > { %3085 = vst.msk [vmem:[%s5663_s8 + $0x24] sm:$0xf] %vm3075_vm4, %v3046_v18  ;;  %v3036_v62 = vpop.permute.xlu0 %3035 }
 0x8c3   : > { %3080 = vst.msk [vmem:[%s5663_s8 + $0x10] sm:$0xf] %vm3075_vm4, %v3036_v62 }
 0x8c6   : > { %v3048_v40 = vpop.permute.xlu0 %3047 }
 0x8c7   : > { %3086 = vst.msk [vmem:[%s5663_s8 + $0x28] sm:$0xf] %vm3075_vm4, %v3048_v40 }
 0x8c9   : > { %v3054_v24 = vpop.permute.xlu1 %3053 }
 0x8ca   : > { %3089 = vst.msk [vmem:[%s5663_s8 + $0x34] sm:$0xf] %vm3075_vm4, %v3054_v24  ;;  %v3044_v53 = vpop.permute.xlu0 %3043 }
 0x8cb   : > { %3084 = vst.msk [vmem:[%s5663_s8 + $0x20] sm:$0xf] %vm3075_vm4, %v3044_v53 }
 0x8cd   : > { %v3058_v4 = vpop.permute.xlu1 %3057 }
 0x8ce   : > { %3091 = vst.msk [vmem:[%s5663_s8 + $0x3c] sm:$0xf] %vm3075_vm4, %v3058_v4 }
 0x8d2   : > { %v3052_v59 = vpop.permute.xlu0 %3051 }
 0x8d3   : > { %3088 = vst.msk [vmem:[%s5663_s8 + $0x30] sm:$0xf] %vm3075_vm4, %v3052_v59 }
 0x8d6   : > { %v3056_v36 = vpop.permute.xlu0 %3055 }
 0x8d7   : > { %3090 = vst.msk [vmem:[%s5663_s8 + $0x38] sm:$0xf] %vm3075_vm4, %v3056_v36 }
 0x8d8   : > { %4500 = shalt.err (!%p4497_p7)
}
 0x8d9   : > { %s4501_s28 = scalar_lea.hbm %s5931_s6, 1024  ;;  %s4505_s29 = scalar_lea.hbm %s5987_s2, 2048 }
 0x8da   : > { %p4502_p1 = scmp.ne.s32.totalorder %s5931_s6, %s4501_s28  ;;  %p4506_p3 = scmp.lt.s32.totalorder %s5931_s6, %s5987_s2 }
 0x8db   : > { %p4507_p8 = scmp.lt.s32.totalorder %s4505_s29, %s4501_s28 }
 0x8dc   : > { %p4503_p10 = pnand %p4502_p1, %p4650_p9 }
 0x8dd   : > { %p4508_p0 = por %p4507_p8, %p4506_p3 }
 0x8de   : > { %p4504_p13 = pneg %p4503_p10 }
 0x8e0   : > { %p4509_p2 = pnand %p4508_p0, %p4504_p13 }
 0x8e2   : > { %4512 = shalt.err (!%p4509_p2)
}
 0x8e3   : > { %s4583_s8 = smov 4  }
 0x8e4   : > { %4040 = dma.vmem_to_hbm [thread:$0]  (%p4650_p9), %s5933_s16, 1024, %s5931_s6, %s3093_s18, %s4580_s3, %s4580_s3, %s4583_s8  }
 0x8e5 PF: > { %s3123_s15 = sand.u32 1, %s4551_s9   ;;  %p4050_p5 = pnand %p3221_p12, %p4657_p11 }
 0x8e6   : > { %s3124_s30 = scalar_lea.sflag [#allocation4], %s3123_s15 }
 0x8e7   : > { %p4051_p6 = pneg %p4050_p5 }
 0x8e9   : > { %4546 = dma.done.wait (%p4051_p6), %s3124_s30, 1024  }
 0x8ea   : > { %4548 = vsyncadd (%p4051_p6), %s3124_s30, 4294966272  ;;  %s21_s14 = sadd.s32 1, %s4571_s14   ;;  %s6103_s9 = smov %s4555_s10 }
 0x8eb   : > { %p18_p4 = scmp.ge.s32.totalorder %s21_s14, 4   ;;  %s6104_s10 = smov %s4559_s11 }
 0x8ec   : > { %s6105_s11 = smov %s4655_s23  ;;  %s6106_s12 = smov %s4567_s13 }
 0x8ed   : > { %s6107_s13 = smov %s6109_s17  ;;  %20 = sbr.rel (!%p18_p4) target bundleno = 8 (0x8), region = 86 }
 0x8f2   :  { %3129 = vsyncpa [#allocation3], 1 }
 0x8f3   :  { %3131 = vsyncpa [#allocation3 + $0x1], 1 }
 0x8f4   :  { %3132 = vsyncpa [#allocation6], 1 }
 0x8f5   :  { %3134 = vsyncpa [#allocation6 + $0x1], 1 }
 0x8f6   :  { %3135 = vsyncpa [#allocation4], 1 }
 0x8f7   :  { %3137 = vsyncpa [#allocation4 + $0x1], 1 }

</bundles_post_ra>
